<compile_context>
chip_gen: v7x
topology: tpu7x:2x2x1
jax: 0.10.0
libtpu: 0.0.40
codegen_flags: <defaults>
</compile_context>

<pallas_src>
import functools

import jax
import jax.numpy as jnp
from jax import lax
from jax.experimental import pallas as pl
from jax.experimental.pallas import tpu as pltpu

C = 256          # fixed by the module definition
EPS = 1e-5       # nn.InstanceNorm2d default eps


def _instance_norm(h):
    """h: (H*W, C) f32 -> normalize over spatial axis (biased var), one-pass stats."""
    n = h.shape[0]
    s1 = jnp.sum(h, axis=0, keepdims=True)
    s2 = jnp.sum(h * h, axis=0, keepdims=True)
    mean = s1 * (1.0 / n)
    var = jnp.maximum(s2 * (1.0 / n) - mean * mean, 0.0)
    return (h - mean) * lax.rsqrt(var + EPS)


def _conv3x3(xp, w_ref, H, W):
    """3x3 'same' conv of a zero-padded block as 9 MXU matmuls.

    xp:    (H+2, W+2, C) f32 value (already zero-padded, loaded once).
    w_ref: (3, 3, C, C) bf16 HWIO weight ref (resident in VMEM).
    Returns (H*W, C) f32.
    """
    acc = None
    for kx in range(3):
        # One sublane (W) shift per kx, hoisted out of the ky loop.
        col = xp[:, kx:kx + W, :].reshape((H + 2) * W, C)
        for ky in range(3):
            # Contiguous, aligned row-range slice (leading/flat dim) + cheap bf16 cast.
            patch = col[ky * W:(ky + H) * W].astype(jnp.bfloat16)
            t = jnp.dot(patch, w_ref[ky, kx],
                        preferred_element_type=jnp.float32)
            acc = t if acc is None else acc + t          # first tap assigns (no zero-fill)
    return acc


def residual_block_kernel(x_ref, w1_ref, w2_ref, out_ref, pad_ref, *, H, W):
    # ---- zero only the 1-px border of the pad scratch (interior is overwritten) ----
    zrow = jnp.zeros((1, W + 2, C), jnp.float32)
    zcol = jnp.zeros((H + 2, 1, C), jnp.float32)
    pad_ref[0:1, :, :] = zrow
    pad_ref[H + 1:H + 2, :, :] = zrow
    pad_ref[:, 0:1, :] = zcol
    pad_ref[:, W + 1:W + 2, :] = zcol

    # ---- conv1 on the in-kernel padded input ----------------------------------------
    x = x_ref[0]                                     # (H, W, C) f32, exact residual copy
    pad_ref[1:H + 1, 1:W + 1, :] = x
    acc1 = _conv3x3(pad_ref[...], w1_ref, H, W)      # (H*W, C) f32

    # ---- InstanceNorm + ReLU ---------------------------------------------------------
    h1 = jnp.maximum(_instance_norm(acc1), 0.0)

    # ---- conv2 (reuse padded scratch; border is still zero) ---------------------------
    pad_ref[1:H + 1, 1:W + 1, :] = h1.reshape(H, W, C)
    acc2 = _conv3x3(pad_ref[...], w2_ref, H, W)

    # ---- InstanceNorm + residual add ---------------------------------------------------
    h2 = _instance_norm(acc2).reshape(H, W, C)
    out_ref[...] = (x + h2)[None].astype(out_ref.dtype)


def residual_block(x_nchw, w1_oihw, w2_oihw):
    """x_nchw: (N, 256, H, W) f32; weights: (256, 256, 3, 3) PyTorch OIHW."""
    N, Cin, H, W = x_nchw.shape
    assert Cin == C

    x = jnp.transpose(x_nchw, (0, 2, 3, 1)).astype(jnp.float32)       # NHWC, f32
    w1 = jnp.transpose(w1_oihw, (2, 3, 1, 0)).astype(jnp.bfloat16)    # (3,3,Cin,Cout) bf16
    w2 = jnp.transpose(w2_oihw, (2, 3, 1, 0)).astype(jnp.bfloat16)

    kernel = functools.partial(residual_block_kernel, H=H, W=W)

    out_nhwc = pl.pallas_call(
        kernel,
        out_shape=jax.ShapeDtypeStruct((N, H, W, C), jnp.float32),
        grid_spec=pltpu.PrefetchScalarGridSpec(
            num_scalar_prefetch=0,
            grid=(N,),
            in_specs=[
                pl.BlockSpec((1, H, W, C), lambda n: (n, 0, 0, 0)),
                pl.BlockSpec((3, 3, C, C), lambda n: (0, 0, 0, 0)),    # resident weights
                pl.BlockSpec((3, 3, C, C), lambda n: (0, 0, 0, 0)),
            ],
            out_specs=pl.BlockSpec((1, H, W, C), lambda n: (n, 0, 0, 0)),
            scratch_shapes=[pltpu.VMEM((H + 2, W + 2, C), jnp.float32)],
        ),
        compiler_params=pltpu.CompilerParams(
            dimension_semantics=("parallel",),
            vmem_limit_bytes=64 * 1024 * 1024),
    )(x, w1, w2)

    return jnp.transpose(out_nhwc, (0, 3, 1, 2))                       # back to NCHW


# ----------------------------- pure-JAX references -----------------------------
def _conv_same(a, w):
    return lax.conv_general_dilated(
        a, w, (1, 1), "SAME",
        dimension_numbers=("NHWC", "HWIO", "NHWC"),
        preferred_element_type=jnp.float32)


def _inorm_ref(a):
    m = jnp.mean(a, axis=(1, 2), keepdims=True)
    v = jnp.mean((a - m) ** 2, axis=(1, 2), keepdims=True)
    return (a - m) * lax.rsqrt(v + EPS)


def _ref_residual_block_f32(x_nchw, w1_oihw, w2_oihw):
    """Pure-f32 reference (exact PyTorch module semantics)."""
    x = jnp.transpose(x_nchw, (0, 2, 3, 1)).astype(jnp.float32)
    w1 = jnp.transpose(w1_oihw, (2, 3, 1, 0)).astype(jnp.float32)
    w2 = jnp.transpose(w2_oihw, (2, 3, 1, 0)).astype(jnp.float32)
    h = jnp.maximum(_inorm_ref(_conv_same(x, w1)), 0.0)
    h = _inorm_ref(_conv_same(h, w2))
    return jnp.transpose(x + h, (0, 3, 1, 2))


def _ref_residual_block_mixed(x_nchw, w1_oihw, w2_oihw):
    """Reference with the kernel's precision: bf16 conv operands, f32 everything else."""
    x = jnp.transpose(x_nchw, (0, 2, 3, 1)).astype(jnp.float32)
    w1 = jnp.transpose(w1_oihw, (2, 3, 1, 0)).astype(jnp.bfloat16)
    w2 = jnp.transpose(w2_oihw, (2, 3, 1, 0)).astype(jnp.bfloat16)
    h = jnp.maximum(_inorm_ref(_conv_same(x.astype(jnp.bfloat16), w1)), 0.0)
    h = _inorm_ref(_conv_same(h.astype(jnp.bfloat16), w2))
    return jnp.transpose(x + h, (0, 3, 1, 2))


if __name__ == "__main__":
    key = jax.random.PRNGKey(0)
    k_x, k_w1, k_w2 = jax.random.split(key, 3)

    N, H, W = 2, 8, 8                       # small spatial; C=256 fixed by the module
    x = jax.random.normal(k_x, (N, C, H, W), dtype=jnp.float32)
    w1 = jax.random.normal(k_w1, (C, C, 3, 3), dtype=jnp.float32) * 0.05
    w2 = jax.random.normal(k_w2, (C, C, 3, 3), dtype=jnp.float32) * 0.05

    out = residual_block(x, w1, w2)
    jax.block_until_ready(out)
    assert out.shape == (N, C, H, W)

    # Tight check vs. a reference using the SAME precision choices (bf16 MXU operands,
    # f32 accumulation / InstanceNorm / residual) -> validates the kernel structure.
    ref_mixed = _ref_residual_block_mixed(x, w1, w2)
    err_mixed = float(jnp.max(jnp.abs(out - ref_mixed)))
    assert err_mixed < 3e-3, f"mismatch vs mixed-precision reference: {err_mixed}"

    # Loose sanity check vs. exact f32 module semantics (drift dominated by bf16
    # rounding of the MXU operands).
    ref_f32 = _ref_residual_block_f32(x, w1, w2)
    err_f32 = float(jnp.max(jnp.abs(out - ref_f32)))
    assert err_f32 < 1e-1, f"bf16 drift vs f32 reference too large: {err_f32}"

    print("KERNEL_OK")
</pallas_src>

<mosaic_0001>
module attributes {stable_mosaic.version = 11 : i64} {
  func.func @residual_block_kernel(%arg0: i32, %arg1: memref<1x8x8x256xf32, #tpu.memory_space<vmem>>, %arg2: memref<3x3x256x256xbf16, #tpu.memory_space<vmem>>, %arg3: memref<3x3x256x256xbf16, #tpu.memory_space<vmem>>, %arg4: memref<1x8x8x256xf32, #tpu.memory_space<vmem>>, %arg5: memref<10x10x256xf32, #tpu.memory_space<vmem>>) attributes {dimension_semantics = [#tpu.dimension_semantics<parallel>], iteration_bounds = array<i64: 2>, scalar_prefetch = 0 : i64, scratch_operands = 1 : i64, tpu.core_type = #tpu.core_type<tc>, window_params = [{transform_indices = @transform_0, window_bounds = array<i64: 1, 8, 8, 256>}, {pipeline_mode = #tpu.pipeline_mode<synchronous>, transform_indices = @transform_1, window_bounds = array<i64: 3, 3, 256, 256>}, {pipeline_mode = #tpu.pipeline_mode<synchronous>, transform_indices = @transform_2, window_bounds = array<i64: 3, 3, 256, 256>}, {transform_indices = @transform_3, window_bounds = array<i64: 1, 8, 8, 256>}]} {
    %cst = arith.constant 0.000000e+00 : f32
    %0 = vector.broadcast %cst : f32 to vector<1x10x256xf32>
    %cst_0 = arith.constant 0.000000e+00 : f32
    %1 = vector.broadcast %cst_0 : f32 to vector<10x1x256xf32>
    %c0 = arith.constant 0 : index
    %c0_1 = arith.constant 0 : index
    %c0_2 = arith.constant 0 : index
    %2 = vector.load %arg5[%c0, %c0_1, %c0_2] : memref<10x10x256xf32, #tpu.memory_space<vmem>>, vector<1x10x256xf32>
    tpu.vector_store %arg5[%c0, %c0_1, %c0_2], %0 {strides = array<i32>} : memref<10x10x256xf32, #tpu.memory_space<vmem>>, vector<1x10x256xf32>,
    %c9 = arith.constant 9 : index
    %c0_3 = arith.constant 0 : index
    %c0_4 = arith.constant 0 : index
    %3 = vector.load %arg5[%c9, %c0_3, %c0_4] : memref<10x10x256xf32, #tpu.memory_space<vmem>>, vector<1x10x256xf32>
    tpu.vector_store %arg5[%c9, %c0_3, %c0_4], %0 {strides = array<i32>} : memref<10x10x256xf32, #tpu.memory_space<vmem>>, vector<1x10x256xf32>,
    %c0_5 = arith.constant 0 : index
    %c0_6 = arith.constant 0 : index
    %c0_7 = arith.constant 0 : index
    %4 = vector.load %arg5[%c0_5, %c0_6, %c0_7] : memref<10x10x256xf32, #tpu.memory_space<vmem>>, vector<10x1x256xf32>
    tpu.vector_store %arg5[%c0_5, %c0_6, %c0_7], %1 {strides = array<i32>} : memref<10x10x256xf32, #tpu.memory_space<vmem>>, vector<10x1x256xf32>,
    %c0_8 = arith.constant 0 : index
    %c9_9 = arith.constant 9 : index
    %c0_10 = arith.constant 0 : index
    %5 = vector.load %arg5[%c0_8, %c9_9, %c0_10] : memref<10x10x256xf32, #tpu.memory_space<vmem>>, vector<10x1x256xf32>
    tpu.vector_store %arg5[%c0_8, %c9_9, %c0_10], %1 {strides = array<i32>} : memref<10x10x256xf32, #tpu.memory_space<vmem>>, vector<10x1x256xf32>,
    %c0_11 = arith.constant 0 : index
    %c0_12 = arith.constant 0 : index
    %c0_13 = arith.constant 0 : index
    %c0_14 = arith.constant 0 : index
    %6 = vector.load %arg1[%c0_11, %c0_12, %c0_13, %c0_14] : memref<1x8x8x256xf32, #tpu.memory_space<vmem>>, vector<1x8x8x256xf32>
    %7 = vector.shape_cast %6 : vector<1x8x8x256xf32> to vector<8x8x256xf32>
    %c1 = arith.constant 1 : index
    %c1_15 = arith.constant 1 : index
    %c0_16 = arith.constant 0 : index
    %8 = vector.load %arg5[%c1, %c1_15, %c0_16] : memref<10x10x256xf32, #tpu.memory_space<vmem>>, vector<8x8x256xf32>
    tpu.vector_store %arg5[%c1, %c1_15, %c0_16], %7 {strides = array<i32>} : memref<10x10x256xf32, #tpu.memory_space<vmem>>, vector<8x8x256xf32>,
    %c0_17 = arith.constant 0 : index
    %c0_18 = arith.constant 0 : index
    %c0_19 = arith.constant 0 : index
    %9 = vector.load %arg5[%c0_17, %c0_18, %c0_19] : memref<10x10x256xf32, #tpu.memory_space<vmem>>, vector<10x10x256xf32>
    %10 = vector.extract_strided_slice %9 {offsets = [0, 0, 0], sizes = [10, 8, 256], strides = [1, 1, 1]} : vector<10x10x256xf32> to vector<10x8x256xf32>
    %11 = vector.shape_cast %10 : vector<10x8x256xf32> to vector<80x256xf32>
    %12 = vector.extract_strided_slice %11 {offsets = [0, 0], sizes = [64, 256], strides = [1, 1]} : vector<80x256xf32> to vector<64x256xf32>
    %13 = arith.truncf %12 : vector<64x256xf32> to vector<64x256xbf16>
    %c0_20 = arith.constant 0 : index
    %c0_21 = arith.constant 0 : index
    %c0_22 = arith.constant 0 : index
    %c0_23 = arith.constant 0 : index
    %14 = vector.load %arg2[%c0_20, %c0_21, %c0_22, %c0_23] : memref<3x3x256x256xbf16, #tpu.memory_space<vmem>>, vector<1x1x256x256xbf16>
    %15 = vector.shape_cast %14 : vector<1x1x256x256xbf16> to vector<256x256xbf16>
    %cst_24 = arith.constant dense<0.000000e+00> : vector<64x256xf32>
    %16 = tpu.matmul %13, %15, %cst_24 {dimension_numbers = #tpu.dot_dimension_numbers<[1], [0], [0], [1], [0, 0, 1, 1], [], []>} : vector<64x256xbf16>, vector<256x256xbf16>, vector<64x256xf32> -> vector<64x256xf32>
    %17 = vector.extract_strided_slice %11 {offsets = [8, 0], sizes = [64, 256], strides = [1, 1]} : vector<80x256xf32> to vector<64x256xf32>
    %18 = arith.truncf %17 : vector<64x256xf32> to vector<64x256xbf16>
    %c1_25 = arith.constant 1 : index
    %c0_26 = arith.constant 0 : index
    %c0_27 = arith.constant 0 : index
    %c0_28 = arith.constant 0 : index
    %19 = vector.load %arg2[%c1_25, %c0_26, %c0_27, %c0_28] : memref<3x3x256x256xbf16, #tpu.memory_space<vmem>>, vector<1x1x256x256xbf16>
    %20 = vector.shape_cast %19 : vector<1x1x256x256xbf16> to vector<256x256xbf16>
    %cst_29 = arith.constant dense<0.000000e+00> : vector<64x256xf32>
    %21 = tpu.matmul %18, %20, %cst_29 {dimension_numbers = #tpu.dot_dimension_numbers<[1], [0], [0], [1], [0, 0, 1, 1], [], []>} : vector<64x256xbf16>, vector<256x256xbf16>, vector<64x256xf32> -> vector<64x256xf32>
    %22 = arith.addf %16, %21 : vector<64x256xf32>
    %23 = vector.extract_strided_slice %11 {offsets = [16, 0], sizes = [64, 256], strides = [1, 1]} : vector<80x256xf32> to vector<64x256xf32>
    %24 = arith.truncf %23 : vector<64x256xf32> to vector<64x256xbf16>
    %c2 = arith.constant 2 : index
    %c0_30 = arith.constant 0 : index
    %c0_31 = arith.constant 0 : index
    %c0_32 = arith.constant 0 : index
    %25 = vector.load %arg2[%c2, %c0_30, %c0_31, %c0_32] : memref<3x3x256x256xbf16, #tpu.memory_space<vmem>>, vector<1x1x256x256xbf16>
    %26 = vector.shape_cast %25 : vector<1x1x256x256xbf16> to vector<256x256xbf16>
    %cst_33 = arith.constant dense<0.000000e+00> : vector<64x256xf32>
    %27 = tpu.matmul %24, %26, %cst_33 {dimension_numbers = #tpu.dot_dimension_numbers<[1], [0], [0], [1], [0, 0, 1, 1], [], []>} : vector<64x256xbf16>, vector<256x256xbf16>, vector<64x256xf32> -> vector<64x256xf32>
    %28 = arith.addf %22, %27 : vector<64x256xf32>
    %29 = vector.extract_strided_slice %9 {offsets = [0, 1, 0], sizes = [10, 8, 256], strides = [1, 1, 1]} : vector<10x10x256xf32> to vector<10x8x256xf32>
    %30 = vector.shape_cast %29 : vector<10x8x256xf32> to vector<80x256xf32>
    %31 = vector.extract_strided_slice %30 {offsets = [0, 0], sizes = [64, 256], strides = [1, 1]} : vector<80x256xf32> to vector<64x256xf32>
    %32 = arith.truncf %31 : vector<64x256xf32> to vector<64x256xbf16>
    %c0_34 = arith.constant 0 : index
    %c1_35 = arith.constant 1 : index
    %c0_36 = arith.constant 0 : index
    %c0_37 = arith.constant 0 : index
    %33 = vector.load %arg2[%c0_34, %c1_35, %c0_36, %c0_37] : memref<3x3x256x256xbf16, #tpu.memory_space<vmem>>, vector<1x1x256x256xbf16>
    %34 = vector.shape_cast %33 : vector<1x1x256x256xbf16> to vector<256x256xbf16>
    %cst_38 = arith.constant dense<0.000000e+00> : vector<64x256xf32>
    %35 = tpu.matmul %32, %34, %cst_38 {dimension_numbers = #tpu.dot_dimension_numbers<[1], [0], [0], [1], [0, 0, 1, 1], [], []>} : vector<64x256xbf16>, vector<256x256xbf16>, vector<64x256xf32> -> vector<64x256xf32>
    %36 = arith.addf %28, %35 : vector<64x256xf32>
    %37 = vector.extract_strided_slice %30 {offsets = [8, 0], sizes = [64, 256], strides = [1, 1]} : vector<80x256xf32> to vector<64x256xf32>
    %38 = arith.truncf %37 : vector<64x256xf32> to vector<64x256xbf16>
    %c1_39 = arith.constant 1 : index
    %c1_40 = arith.constant 1 : index
    %c0_41 = arith.constant 0 : index
    %c0_42 = arith.constant 0 : index
    %39 = vector.load %arg2[%c1_39, %c1_40, %c0_41, %c0_42] : memref<3x3x256x256xbf16, #tpu.memory_space<vmem>>, vector<1x1x256x256xbf16>
    %40 = vector.shape_cast %39 : vector<1x1x256x256xbf16> to vector<256x256xbf16>
    %cst_43 = arith.constant dense<0.000000e+00> : vector<64x256xf32>
    %41 = tpu.matmul %38, %40, %cst_43 {dimension_numbers = #tpu.dot_dimension_numbers<[1], [0], [0], [1], [0, 0, 1, 1], [], []>} : vector<64x256xbf16>, vector<256x256xbf16>, vector<64x256xf32> -> vector<64x256xf32>
    %42 = arith.addf %36, %41 : vector<64x256xf32>
    %43 = vector.extract_strided_slice %30 {offsets = [16, 0], sizes = [64, 256], strides = [1, 1]} : vector<80x256xf32> to vector<64x256xf32>
    %44 = arith.truncf %43 : vector<64x256xf32> to vector<64x256xbf16>
    %c2_44 = arith.constant 2 : index
    %c1_45 = arith.constant 1 : index
    %c0_46 = arith.constant 0 : index
    %c0_47 = arith.constant 0 : index
    %45 = vector.load %arg2[%c2_44, %c1_45, %c0_46, %c0_47] : memref<3x3x256x256xbf16, #tpu.memory_space<vmem>>, vector<1x1x256x256xbf16>
    %46 = vector.shape_cast %45 : vector<1x1x256x256xbf16> to vector<256x256xbf16>
    %cst_48 = arith.constant dense<0.000000e+00> : vector<64x256xf32>
    %47 = tpu.matmul %44, %46, %cst_48 {dimension_numbers = #tpu.dot_dimension_numbers<[1], [0], [0], [1], [0, 0, 1, 1], [], []>} : vector<64x256xbf16>, vector<256x256xbf16>, vector<64x256xf32> -> vector<64x256xf32>
    %48 = arith.addf %42, %47 : vector<64x256xf32>
    %49 = vector.extract_strided_slice %9 {offsets = [0, 2, 0], sizes = [10, 8, 256], strides = [1, 1, 1]} : vector<10x10x256xf32> to vector<10x8x256xf32>
    %50 = vector.shape_cast %49 : vector<10x8x256xf32> to vector<80x256xf32>
    %51 = vector.extract_strided_slice %50 {offsets = [0, 0], sizes = [64, 256], strides = [1, 1]} : vector<80x256xf32> to vector<64x256xf32>
    %52 = arith.truncf %51 : vector<64x256xf32> to vector<64x256xbf16>
    %c0_49 = arith.constant 0 : index
    %c2_50 = arith.constant 2 : index
    %c0_51 = arith.constant 0 : index
    %c0_52 = arith.constant 0 : index
    %53 = vector.load %arg2[%c0_49, %c2_50, %c0_51, %c0_52] : memref<3x3x256x256xbf16, #tpu.memory_space<vmem>>, vector<1x1x256x256xbf16>
    %54 = vector.shape_cast %53 : vector<1x1x256x256xbf16> to vector<256x256xbf16>
    %cst_53 = arith.constant dense<0.000000e+00> : vector<64x256xf32>
    %55 = tpu.matmul %52, %54, %cst_53 {dimension_numbers = #tpu.dot_dimension_numbers<[1], [0], [0], [1], [0, 0, 1, 1], [], []>} : vector<64x256xbf16>, vector<256x256xbf16>, vector<64x256xf32> -> vector<64x256xf32>
    %56 = arith.addf %48, %55 : vector<64x256xf32>
    %57 = vector.extract_strided_slice %50 {offsets = [8, 0], sizes = [64, 256], strides = [1, 1]} : vector<80x256xf32> to vector<64x256xf32>
    %58 = arith.truncf %57 : vector<64x256xf32> to vector<64x256xbf16>
    %c1_54 = arith.constant 1 : index
    %c2_55 = arith.constant 2 : index
    %c0_56 = arith.constant 0 : index
    %c0_57 = arith.constant 0 : index
    %59 = vector.load %arg2[%c1_54, %c2_55, %c0_56, %c0_57] : memref<3x3x256x256xbf16, #tpu.memory_space<vmem>>, vector<1x1x256x256xbf16>
    %60 = vector.shape_cast %59 : vector<1x1x256x256xbf16> to vector<256x256xbf16>
    %cst_58 = arith.constant dense<0.000000e+00> : vector<64x256xf32>
    %61 = tpu.matmul %58, %60, %cst_58 {dimension_numbers = #tpu.dot_dimension_numbers<[1], [0], [0], [1], [0, 0, 1, 1], [], []>} : vector<64x256xbf16>, vector<256x256xbf16>, vector<64x256xf32> -> vector<64x256xf32>
    %62 = arith.addf %56, %61 : vector<64x256xf32>
    %63 = vector.extract_strided_slice %50 {offsets = [16, 0], sizes = [64, 256], strides = [1, 1]} : vector<80x256xf32> to vector<64x256xf32>
    %64 = arith.truncf %63 : vector<64x256xf32> to vector<64x256xbf16>
    %c2_59 = arith.constant 2 : index
    %c2_60 = arith.constant 2 : index
    %c0_61 = arith.constant 0 : index
    %c0_62 = arith.constant 0 : index
    %65 = vector.load %arg2[%c2_59, %c2_60, %c0_61, %c0_62] : memref<3x3x256x256xbf16, #tpu.memory_space<vmem>>, vector<1x1x256x256xbf16>
    %66 = vector.shape_cast %65 : vector<1x1x256x256xbf16> to vector<256x256xbf16>
    %cst_63 = arith.constant dense<0.000000e+00> : vector<64x256xf32>
    %67 = tpu.matmul %64, %66, %cst_63 {dimension_numbers = #tpu.dot_dimension_numbers<[1], [0], [0], [1], [0, 0, 1, 1], [], []>} : vector<64x256xbf16>, vector<256x256xbf16>, vector<64x256xf32> -> vector<64x256xf32>
    %68 = arith.addf %62, %67 : vector<64x256xf32>
    %cst_64 = arith.constant dense<0.000000e+00> : vector<256xf32>
    %69 = vector.multi_reduction <add>, %68, %cst_64 [0] : vector<64x256xf32> to vector<256xf32>
    %70 = vector.shape_cast %69 : vector<256xf32> to vector<1x256xf32>
    %71 = arith.mulf %68, %68 : vector<64x256xf32>
    %cst_65 = arith.constant dense<0.000000e+00> : vector<256xf32>
    %72 = vector.multi_reduction <add>, %71, %cst_65 [0] : vector<64x256xf32> to vector<256xf32>
    %73 = vector.shape_cast %72 : vector<256xf32> to vector<1x256xf32>
    %cst_66 = arith.constant 1.562500e-02 : f32
    %74 = vector.broadcast %cst_66 : f32 to vector<1x256xf32>
    %75 = arith.mulf %70, %74 : vector<1x256xf32>
    %cst_67 = arith.constant 1.562500e-02 : f32
    %76 = vector.broadcast %cst_67 : f32 to vector<1x256xf32>
    %77 = arith.mulf %73, %76 : vector<1x256xf32>
    %78 = arith.mulf %75, %75 : vector<1x256xf32>
    %79 = arith.subf %77, %78 : vector<1x256xf32>
    %cst_68 = arith.constant 0.000000e+00 : f32
    %80 = vector.broadcast %cst_68 : f32 to vector<1x256xf32>
    %81 = arith.maximumf %79, %80 : vector<1x256xf32>
    %82 = vector.broadcast %75 : vector<1x256xf32> to vector<64x256xf32>
    %83 = arith.subf %68, %82 : vector<64x256xf32>
    %cst_69 = arith.constant 9.99999974E-6 : f32
    %84 = vector.broadcast %cst_69 : f32 to vector<1x256xf32>
    %85 = arith.addf %81, %84 : vector<1x256xf32>
    %86 = math.rsqrt %85 : vector<1x256xf32>
    %87 = vector.broadcast %86 : vector<1x256xf32> to vector<64x256xf32>
    %88 = arith.mulf %83, %87 : vector<64x256xf32>
    %cst_70 = arith.constant 0.000000e+00 : f32
    %89 = vector.broadcast %cst_70 : f32 to vector<64x256xf32>
    %90 = arith.maximumf %88, %89 : vector<64x256xf32>
    %91 = vector.shape_cast %90 : vector<64x256xf32> to vector<8x8x256xf32>
    %c1_71 = arith.constant 1 : index
    %c1_72 = arith.constant 1 : index
    %c0_73 = arith.constant 0 : index
    %92 = vector.load %arg5[%c1_71, %c1_72, %c0_73] : memref<10x10x256xf32, #tpu.memory_space<vmem>>, vector<8x8x256xf32>
    tpu.vector_store %arg5[%c1_71, %c1_72, %c0_73], %91 {strides = array<i32>} : memref<10x10x256xf32, #tpu.memory_space<vmem>>, vector<8x8x256xf32>,
    %c0_74 = arith.constant 0 : index
    %c0_75 = arith.constant 0 : index
    %c0_76 = arith.constant 0 : index
    %93 = vector.load %arg5[%c0_74, %c0_75, %c0_76] : memref<10x10x256xf32, #tpu.memory_space<vmem>>, vector<10x10x256xf32>
    %94 = vector.extract_strided_slice %93 {offsets = [0, 0, 0], sizes = [10, 8, 256], strides = [1, 1, 1]} : vector<10x10x256xf32> to vector<10x8x256xf32>
    %95 = vector.shape_cast %94 : vector<10x8x256xf32> to vector<80x256xf32>
    %96 = vector.extract_strided_slice %95 {offsets = [0, 0], sizes = [64, 256], strides = [1, 1]} : vector<80x256xf32> to vector<64x256xf32>
    %97 = arith.truncf %96 : vector<64x256xf32> to vector<64x256xbf16>
    %c0_77 = arith.constant 0 : index
    %c0_78 = arith.constant 0 : index
    %c0_79 = arith.constant 0 : index
    %c0_80 = arith.constant 0 : index
    %98 = vector.load %arg3[%c0_77, %c0_78, %c0_79, %c0_80] : memref<3x3x256x256xbf16, #tpu.memory_space<vmem>>, vector<1x1x256x256xbf16>
    %99 = vector.shape_cast %98 : vector<1x1x256x256xbf16> to vector<256x256xbf16>
    %cst_81 = arith.constant dense<0.000000e+00> : vector<64x256xf32>
    %100 = tpu.matmul %97, %99, %cst_81 {dimension_numbers = #tpu.dot_dimension_numbers<[1], [0], [0], [1], [0, 0, 1, 1], [], []>} : vector<64x256xbf16>, vector<256x256xbf16>, vector<64x256xf32> -> vector<64x256xf32>
    %101 = vector.extract_strided_slice %95 {offsets = [8, 0], sizes = [64, 256], strides = [1, 1]} : vector<80x256xf32> to vector<64x256xf32>
    %102 = arith.truncf %101 : vector<64x256xf32> to vector<64x256xbf16>
    %c1_82 = arith.constant 1 : index
    %c0_83 = arith.constant 0 : index
    %c0_84 = arith.constant 0 : index
    %c0_85 = arith.constant 0 : index
    %103 = vector.load %arg3[%c1_82, %c0_83, %c0_84, %c0_85] : memref<3x3x256x256xbf16, #tpu.memory_space<vmem>>, vector<1x1x256x256xbf16>
    %104 = vector.shape_cast %103 : vector<1x1x256x256xbf16> to vector<256x256xbf16>
    %cst_86 = arith.constant dense<0.000000e+00> : vector<64x256xf32>
    %105 = tpu.matmul %102, %104, %cst_86 {dimension_numbers = #tpu.dot_dimension_numbers<[1], [0], [0], [1], [0, 0, 1, 1], [], []>} : vector<64x256xbf16>, vector<256x256xbf16>, vector<64x256xf32> -> vector<64x256xf32>
    %106 = arith.addf %100, %105 : vector<64x256xf32>
    %107 = vector.extract_strided_slice %95 {offsets = [16, 0], sizes = [64, 256], strides = [1, 1]} : vector<80x256xf32> to vector<64x256xf32>
    %108 = arith.truncf %107 : vector<64x256xf32> to vector<64x256xbf16>
    %c2_87 = arith.constant 2 : index
    %c0_88 = arith.constant 0 : index
    %c0_89 = arith.constant 0 : index
    %c0_90 = arith.constant 0 : index
    %109 = vector.load %arg3[%c2_87, %c0_88, %c0_89, %c0_90] : memref<3x3x256x256xbf16, #tpu.memory_space<vmem>>, vector<1x1x256x256xbf16>
    %110 = vector.shape_cast %109 : vector<1x1x256x256xbf16> to vector<256x256xbf16>
    %cst_91 = arith.constant dense<0.000000e+00> : vector<64x256xf32>
    %111 = tpu.matmul %108, %110, %cst_91 {dimension_numbers = #tpu.dot_dimension_numbers<[1], [0], [0], [1], [0, 0, 1, 1], [], []>} : vector<64x256xbf16>, vector<256x256xbf16>, vector<64x256xf32> -> vector<64x256xf32>
    %112 = arith.addf %106, %111 : vector<64x256xf32>
    %113 = vector.extract_strided_slice %93 {offsets = [0, 1, 0], sizes = [10, 8, 256], strides = [1, 1, 1]} : vector<10x10x256xf32> to vector<10x8x256xf32>
    %114 = vector.shape_cast %113 : vector<10x8x256xf32> to vector<80x256xf32>
    %115 = vector.extract_strided_slice %114 {offsets = [0, 0], sizes = [64, 256], strides = [1, 1]} : vector<80x256xf32> to vector<64x256xf32>
    %116 = arith.truncf %115 : vector<64x256xf32> to vector<64x256xbf16>
    %c0_92 = arith.constant 0 : index
    %c1_93 = arith.constant 1 : index
    %c0_94 = arith.constant 0 : index
    %c0_95 = arith.constant 0 : index
    %117 = vector.load %arg3[%c0_92, %c1_93, %c0_94, %c0_95] : memref<3x3x256x256xbf16, #tpu.memory_space<vmem>>, vector<1x1x256x256xbf16>
    %118 = vector.shape_cast %117 : vector<1x1x256x256xbf16> to vector<256x256xbf16>
    %cst_96 = arith.constant dense<0.000000e+00> : vector<64x256xf32>
    %119 = tpu.matmul %116, %118, %cst_96 {dimension_numbers = #tpu.dot_dimension_numbers<[1], [0], [0], [1], [0, 0, 1, 1], [], []>} : vector<64x256xbf16>, vector<256x256xbf16>, vector<64x256xf32> -> vector<64x256xf32>
    %120 = arith.addf %112, %119 : vector<64x256xf32>
    %121 = vector.extract_strided_slice %114 {offsets = [8, 0], sizes = [64, 256], strides = [1, 1]} : vector<80x256xf32> to vector<64x256xf32>
    %122 = arith.truncf %121 : vector<64x256xf32> to vector<64x256xbf16>
    %c1_97 = arith.constant 1 : index
    %c1_98 = arith.constant 1 : index
    %c0_99 = arith.constant 0 : index
    %c0_100 = arith.constant 0 : index
    %123 = vector.load %arg3[%c1_97, %c1_98, %c0_99, %c0_100] : memref<3x3x256x256xbf16, #tpu.memory_space<vmem>>, vector<1x1x256x256xbf16>
    %124 = vector.shape_cast %123 : vector<1x1x256x256xbf16> to vector<256x256xbf16>
    %cst_101 = arith.constant dense<0.000000e+00> : vector<64x256xf32>
    %125 = tpu.matmul %122, %124, %cst_101 {dimension_numbers = #tpu.dot_dimension_numbers<[1], [0], [0], [1], [0, 0, 1, 1], [], []>} : vector<64x256xbf16>, vector<256x256xbf16>, vector<64x256xf32> -> vector<64x256xf32>
    %126 = arith.addf %120, %125 : vector<64x256xf32>
    %127 = vector.extract_strided_slice %114 {offsets = [16, 0], sizes = [64, 256], strides = [1, 1]} : vector<80x256xf32> to vector<64x256xf32>
    %128 = arith.truncf %127 : vector<64x256xf32> to vector<64x256xbf16>
    %c2_102 = arith.constant 2 : index
    %c1_103 = arith.constant 1 : index
    %c0_104 = arith.constant 0 : index
    %c0_105 = arith.constant 0 : index
    %129 = vector.load %arg3[%c2_102, %c1_103, %c0_104, %c0_105] : memref<3x3x256x256xbf16, #tpu.memory_space<vmem>>, vector<1x1x256x256xbf16>
    %130 = vector.shape_cast %129 : vector<1x1x256x256xbf16> to vector<256x256xbf16>
    %cst_106 = arith.constant dense<0.000000e+00> : vector<64x256xf32>
    %131 = tpu.matmul %128, %130, %cst_106 {dimension_numbers = #tpu.dot_dimension_numbers<[1], [0], [0], [1], [0, 0, 1, 1], [], []>} : vector<64x256xbf16>, vector<256x256xbf16>, vector<64x256xf32> -> vector<64x256xf32>
    %132 = arith.addf %126, %131 : vector<64x256xf32>
    %133 = vector.extract_strided_slice %93 {offsets = [0, 2, 0], sizes = [10, 8, 256], strides = [1, 1, 1]} : vector<10x10x256xf32> to vector<10x8x256xf32>
    %134 = vector.shape_cast %133 : vector<10x8x256xf32> to vector<80x256xf32>
    %135 = vector.extract_strided_slice %134 {offsets = [0, 0], sizes = [64, 256], strides = [1, 1]} : vector<80x256xf32> to vector<64x256xf32>
    %136 = arith.truncf %135 : vector<64x256xf32> to vector<64x256xbf16>
    %c0_107 = arith.constant 0 : index
    %c2_108 = arith.constant 2 : index
    %c0_109 = arith.constant 0 : index
    %c0_110 = arith.constant 0 : index
    %137 = vector.load %arg3[%c0_107, %c2_108, %c0_109, %c0_110] : memref<3x3x256x256xbf16, #tpu.memory_space<vmem>>, vector<1x1x256x256xbf16>
    %138 = vector.shape_cast %137 : vector<1x1x256x256xbf16> to vector<256x256xbf16>
    %cst_111 = arith.constant dense<0.000000e+00> : vector<64x256xf32>
    %139 = tpu.matmul %136, %138, %cst_111 {dimension_numbers = #tpu.dot_dimension_numbers<[1], [0], [0], [1], [0, 0, 1, 1], [], []>} : vector<64x256xbf16>, vector<256x256xbf16>, vector<64x256xf32> -> vector<64x256xf32>
    %140 = arith.addf %132, %139 : vector<64x256xf32>
    %141 = vector.extract_strided_slice %134 {offsets = [8, 0], sizes = [64, 256], strides = [1, 1]} : vector<80x256xf32> to vector<64x256xf32>
    %142 = arith.truncf %141 : vector<64x256xf32> to vector<64x256xbf16>
    %c1_112 = arith.constant 1 : index
    %c2_113 = arith.constant 2 : index
    %c0_114 = arith.constant 0 : index
    %c0_115 = arith.constant 0 : index
    %143 = vector.load %arg3[%c1_112, %c2_113, %c0_114, %c0_115] : memref<3x3x256x256xbf16, #tpu.memory_space<vmem>>, vector<1x1x256x256xbf16>
    %144 = vector.shape_cast %143 : vector<1x1x256x256xbf16> to vector<256x256xbf16>
    %cst_116 = arith.constant dense<0.000000e+00> : vector<64x256xf32>
    %145 = tpu.matmul %142, %144, %cst_116 {dimension_numbers = #tpu.dot_dimension_numbers<[1], [0], [0], [1], [0, 0, 1, 1], [], []>} : vector<64x256xbf16>, vector<256x256xbf16>, vector<64x256xf32> -> vector<64x256xf32>
    %146 = arith.addf %140, %145 : vector<64x256xf32>
    %147 = vector.extract_strided_slice %134 {offsets = [16, 0], sizes = [64, 256], strides = [1, 1]} : vector<80x256xf32> to vector<64x256xf32>
    %148 = arith.truncf %147 : vector<64x256xf32> to vector<64x256xbf16>
    %c2_117 = arith.constant 2 : index
    %c2_118 = arith.constant 2 : index
    %c0_119 = arith.constant 0 : index
    %c0_120 = arith.constant 0 : index
    %149 = vector.load %arg3[%c2_117, %c2_118, %c0_119, %c0_120] : memref<3x3x256x256xbf16, #tpu.memory_space<vmem>>, vector<1x1x256x256xbf16>
    %150 = vector.shape_cast %149 : vector<1x1x256x256xbf16> to vector<256x256xbf16>
    %cst_121 = arith.constant dense<0.000000e+00> : vector<64x256xf32>
    %151 = tpu.matmul %148, %150, %cst_121 {dimension_numbers = #tpu.dot_dimension_numbers<[1], [0], [0], [1], [0, 0, 1, 1], [], []>} : vector<64x256xbf16>, vector<256x256xbf16>, vector<64x256xf32> -> vector<64x256xf32>
    %152 = arith.addf %146, %151 : vector<64x256xf32>
    %cst_122 = arith.constant dense<0.000000e+00> : vector<256xf32>
    %153 = vector.multi_reduction <add>, %152, %cst_122 [0] : vector<64x256xf32> to vector<256xf32>
    %154 = vector.shape_cast %153 : vector<256xf32> to vector<1x256xf32>
    %155 = arith.mulf %152, %152 : vector<64x256xf32>
    %cst_123 = arith.constant dense<0.000000e+00> : vector<256xf32>
    %156 = vector.multi_reduction <add>, %155, %cst_123 [0] : vector<64x256xf32> to vector<256xf32>
    %157 = vector.shape_cast %156 : vector<256xf32> to vector<1x256xf32>
    %cst_124 = arith.constant 1.562500e-02 : f32
    %158 = vector.broadcast %cst_124 : f32 to vector<1x256xf32>
    %159 = arith.mulf %154, %158 : vector<1x256xf32>
    %cst_125 = arith.constant 1.562500e-02 : f32
    %160 = vector.broadcast %cst_125 : f32 to vector<1x256xf32>
    %161 = arith.mulf %157, %160 : vector<1x256xf32>
    %162 = arith.mulf %159, %159 : vector<1x256xf32>
    %163 = arith.subf %161, %162 : vector<1x256xf32>
    %cst_126 = arith.constant 0.000000e+00 : f32
    %164 = vector.broadcast %cst_126 : f32 to vector<1x256xf32>
    %165 = arith.maximumf %163, %164 : vector<1x256xf32>
    %166 = vector.broadcast %159 : vector<1x256xf32> to vector<64x256xf32>
    %167 = arith.subf %152, %166 : vector<64x256xf32>
    %cst_127 = arith.constant 9.99999974E-6 : f32
    %168 = vector.broadcast %cst_127 : f32 to vector<1x256xf32>
    %169 = arith.addf %165, %168 : vector<1x256xf32>
    %170 = math.rsqrt %169 : vector<1x256xf32>
    %171 = vector.broadcast %170 : vector<1x256xf32> to vector<64x256xf32>
    %172 = arith.mulf %167, %171 : vector<64x256xf32>
    %173 = vector.shape_cast %172 : vector<64x256xf32> to vector<8x8x256xf32>
    %174 = arith.addf %7, %173 : vector<8x8x256xf32>
    %175 = vector.shape_cast %174 : vector<8x8x256xf32> to vector<1x8x8x256xf32>
    %c0_128 = arith.constant 0 : index
    %c0_129 = arith.constant 0 : index
    %c0_130 = arith.constant 0 : index
    %c0_131 = arith.constant 0 : index
    %176 = vector.load %arg4[%c0_128, %c0_129, %c0_130, %c0_131] : memref<1x8x8x256xf32, #tpu.memory_space<vmem>>, vector<1x8x8x256xf32>
    tpu.vector_store %arg4[%c0_128, %c0_129, %c0_130, %c0_131], %175 {strides = array<i32>} : memref<1x8x8x256xf32, #tpu.memory_space<vmem>>, vector<1x8x8x256xf32>,
    return
  }
  func.func @transform_0(%arg0: i32) -> (i32, i32, i32, i32) {
    %c0_i32 = arith.constant 0 : i32
    %c0_i32_0 = arith.constant 0 : i32
    %c0_i32_1 = arith.constant 0 : i32
    %c0_i32_2 = arith.constant 0 : i32
    return %arg0, %c0_i32, %c0_i32_0, %c0_i32_1 : i32, i32, i32, i32
  }
  func.func @transform_1(%arg0: i32) -> (i32, i32, i32, i32) {
    %c0_i32 = arith.constant 0 : i32
    %c0_i32_0 = arith.constant 0 : i32
    %c0_i32_1 = arith.constant 0 : i32
    %c0_i32_2 = arith.constant 0 : i32
    %c0_i32_3 = arith.constant 0 : i32
    return %c0_i32, %c0_i32_0, %c0_i32_1, %c0_i32_2 : i32, i32, i32, i32
  }
  func.func @transform_2(%arg0: i32) -> (i32, i32, i32, i32) {
    %c0_i32 = arith.constant 0 : i32
    %c0_i32_0 = arith.constant 0 : i32
    %c0_i32_1 = arith.constant 0 : i32
    %c0_i32_2 = arith.constant 0 : i32
    %c0_i32_3 = arith.constant 0 : i32
    return %c0_i32, %c0_i32_0, %c0_i32_1, %c0_i32_2 : i32, i32, i32, i32
  }
  func.func @transform_3(%arg0: i32) -> (i32, i32, i32, i32) {
    %c0_i32 = arith.constant 0 : i32
    %c0_i32_0 = arith.constant 0 : i32
    %c0_i32_1 = arith.constant 0 : i32
    %c0_i32_2 = arith.constant 0 : i32
    return %arg0, %c0_i32, %c0_i32_0, %c0_i32_1 : i32, i32, i32, i32
  }
}

</mosaic_0001>

<bundles_post_ra>
// kernel: tpu_custom_call.1
= control target key start
LH: loop header
LB: loop body
LE: loop exit
PB: predicated region body
PF: predicated region fallthrough
CT: control target
= control target key end

     0   :  { %8 = vsyncpa [#allocation4], 0  ;;  %s10036_s0 = inlined_call_operand.hbm [shape: f32[2,8,8,256], index: 0, kind: input, shape index: {}]   ;;  %s10037_s1 = inlined_call_operand.hbm [shape: bf16[3,3,256,256], index: 1, kind: input, shape index: {}]   ;;  %s10038_s2 = inlined_call_operand.hbm [shape: bf16[3,3,256,256], index: 2, kind: input, shape index: {}]   ;;  %s10039_s3 = inlined_call_operand.hbm [shape: f32[2,8,8,256], index: 3, kind: output, shape index: {}]  }
   0x1   :  { %10 = vsyncpa [#allocation4 + $0x1], 0 }
   0x2   :  { %11 = vsyncpa [#allocation7], 0 }
   0x3   :  { %12 = vsyncpa [#allocation5], 0 }
   0x4   :  { %14 = vsyncpa [#allocation5 + $0x1], 0  ;;  %s8478_s12 = smov 0   ;;  %s8480_s13 = smov 0  }
   0x5   :  { %s8482_s14 = smov 0   ;;  %s8484_s15 = smov 0  }
   0x6 LB: > { %s8499_s16 = sadd.s32 4294967295, %s8445_s15   ;;  %s6449_s17 = sadd.s32 4294967294, %s8445_s15   ;;  %s8445_s15 = sphi %s8484_s15, %s10152_s15   ;;  %s8441_s14 = sphi %s8482_s14, %s10151_s14   ;;  %s8437_s13 = sphi %s8480_s13, %s10150_s13   ;;  %s8433_s12 = sphi %s8478_s12, %s10149_s12  }
   0x7   : > { %p40_p0 = scmp.ne.s32.totalorder %s8437_s13, %s8433_s12  ;;  %p10040_p1 = scmp.eq.s32.totalorder %s8499_s16, 0 }
   0x8   : > { %p112_p3 = scmp.eq.s32.totalorder %s6449_s17, 1  ;;  %p6450_p5 = scmp.ge.s32.totalorder %s8445_s15, 1 }
   0x9   : > { %p8508_p4 = por %p10040_p1, %p40_p0  ;;  %p119_p7 = scmp.lt.s32.totalorder %s8445_s15, 3 }
   0xa   : > { %p8513_p6 = por %p112_p3, %p40_p0  ;;  %s8447_s21 = smov [#allocation6]  }
   0xb   : > { %s10068_s18 = scalar_select %p8508_p4, 1, 0 }
   0xc   : > { %s10069_s19 = scalar_select %p8513_p6, 1, 0 }
   0xd   : > { %p8518_p8 = pnand %p6450_p5, %p119_p7  ;;  %s131_s22 = sshll.u32 %s8447_s21, 4  ;;  %s8522_s22 = int_to_ptr.vmem [resolvable:$true] %s131_s22 }
   0xe   : > { %s8448_s24 = smov [#allocation8]   ;;  %s8289_s28 = scalar_lea.hbm %s10037_s1, 36864 }
   0xf   : > { %p7313_p9 = pneg %p8518_p8  ;;  %s144_s25 = sshll.u32 %s8448_s24, 4  ;;  %s8533_s25 = int_to_ptr.vmem [resolvable:$true] %s144_s25 }
  0x10   : > { %p8290_p12 = scmp.ne.s32.totalorder %s10037_s1, %s8289_s28  ;;  %p8296_p5 = scmp.lt.u32.totalorder %s8289_s28, %s10037_s1 }
  0x11   : > { %p8529_p11 = pnand %p7313_p9, %p10040_p1 }
  0x13   : > { %p8291_p13 = pneg %p8529_p11 }
  0x15   : > { %p8292_p0 = pnand %p8291_p13, %p8290_p12 }
  0x17   : > { %p8293_p3 = pneg %p8292_p0 }
  0x19   : > { %p8298_p7 = pnand %p8296_p5, %p8293_p3 }
  0x1b   : > { %8301 = shalt.err (!%p8298_p7)
}
  0x1c   : > { %s8302_s6 = scalar_lea.vmem %s8522_s22, 36864  ;;  %p8310_p2 = scmp.lt.s32.totalorder %s8522_s22, %s8522_s22 }
  0x1d   : > { %p8303_p9 = scmp.ne.s32.totalorder %s8522_s22, %s8302_s6  ;;  %p8311_p12 = scmp.lt.s32.totalorder %s8302_s6, %s8302_s6 }
  0x1f   : > { %p8305_p10 = pnand %p8303_p9, %p8291_p13  ;;  %p8312_p0 = por %p8311_p12, %p8310_p2 }
  0x21   : > { %p8306_p1 = pneg %p8305_p10 }
  0x23   : > { %p8313_p6 = pnand %p8312_p0, %p8306_p1 }
  0x25   : > { %8316 = shalt.err (!%p8313_p6)
}
  0x26   : > { %s8449_s7 = smov 128   ;;  %s8450_s8 = smov 8  }
  0x27   : > { %7316 = dma.hbm_to_vmem [thread:$0]  (!%p8529_p11), %s10037_s1, 36864, %s8522_s22, [#allocation7], %s8449_s7, %s8449_s7, %s8450_s8  }
  0x28   : > { %s8317_s21 = scalar_lea.hbm %s10038_s2, 36864 }
  0x29   : > { %p8318_p2 = scmp.ne.s32.totalorder %s10038_s2, %s8317_s21  ;;  %p8324_p10 = scmp.lt.u32.totalorder %s8317_s21, %s10038_s2 }
  0x2b   : > { %p8320_p1 = pnand %p8318_p2, %p8291_p13 }
  0x2d   : > { %p8321_p6 = pneg %p8320_p1 }
  0x2f   : > { %p8326_p3 = pnand %p8324_p10, %p8321_p6 }
  0x31   : > { %8329 = shalt.err (!%p8326_p3)
}
  0x32   : > { %s8330_s22 = scalar_lea.vmem %s8533_s25, 36864  ;;  %p8338_p12 = scmp.lt.s32.totalorder %s8533_s25, %s8533_s25 }
  0x33   : > { %p8331_p5 = scmp.ne.s32.totalorder %s8533_s25, %s8330_s22  ;;  %p8339_p0 = scmp.lt.s32.totalorder %s8330_s22, %s8330_s22 }
  0x35   : > { %p8333_p7 = pnand %p8331_p5, %p8291_p13  ;;  %p8340_p2 = por %p8339_p0, %p8338_p12 }
  0x37   : > { %p8334_p9 = pneg %p8333_p7 }
  0x39   : > { %p8341_p1 = pnand %p8340_p2, %p8334_p9 }
  0x3b   : > { %8344 = shalt.err (!%p8341_p1)
}
  0x3c   : > { %7319 = dma.hbm_to_vmem [thread:$0]  (!%p8529_p11), %s10038_s2, 36864, %s8533_s25, [#allocation7], %s8449_s7, %s8449_s7, %s8450_s8  }
  0x3d   : > { %s8588_s4 = sadd.s32 1, %s8445_s15   ;;  %s27_s23 = sadd.s32 1, %s8441_s14 }
  0x3e   : > { %s24_s5 = ssub.s32 %s8445_s15, %s8588_s4  ;;  %p34_p13 = scmp.ne.s32.totalorder %s8441_s14, %s8437_s13 }
  0x3f   : > { %p25_p6 = scmp.eq.s32.totalorder %s24_s5, 0  ;;  %p35_p10 = scmp.eq.s32.totalorder %s8445_s15, 0 }
  0x40   : > { %p10072_p3 = scmp.eq.s32.totalorder %s8499_s16, 1  ;;  %p7330_p7 = scmp.lt.s32.totalorder %s8445_s15, 2 }
  0x41   : > { %s8604_s9 = scalar_select %p25_p6, %s8441_s14, %s27_s23  }
  0x42   : > { %p8598_p5 = por %p10072_p3, %p34_p13  ;;  %p36_p9 = por %p35_p10, %p34_p13 }
  0x43   : > { %s158_s10 = sand.u32 1, %s8441_s14   ;;  %s7043_s25 = sshll.u32 %s8445_s15, 11 }
  0x44   : > { %s10073_s6 = scalar_select %p8598_p5, 1, 0 }
  0x45   : > { %s6454_s11 = sshll.u32 %s158_s10, 7  ;;  %s8611_s17 = scalar_lea.hbm %s10036_s0, %s7043_s25 }
  0x46   : > { %s162_s21 = scalar_lea.vmem [#allocation3], %s6454_s11  ;;  %p8615_p11 = pnand %p7330_p7, %p36_p9 }
  0x47   : > { %s169_s24 = sshll.u32 %s162_s21, 4  ;;  %s8619_s27 = scalar_lea.sflag [#allocation4], %s158_s10  ;;  %s8613_s24 = int_to_ptr.vmem [resolvable:$true] %s169_s24 }
  0x48   : > { %s8345_s28 = scalar_lea.hbm %s8611_s17, 2048  ;;  %p8347_p0 = pneg %p8615_p11 }
  0x49   : > { %p8346_p12 = scmp.ne.s32.totalorder %s8611_s17, %s8345_s28  ;;  %s8350_s30 = scalar_lea.hbm %s10036_s0, 4096 }
  0x4a   : > { %p8351_p13 = scmp.lt.u32.totalorder %s8611_s17, %s10036_s0  ;;  %p8352_p6 = scmp.lt.u32.totalorder %s8350_s30, %s8345_s28 }
  0x4b   : > { %p8348_p2 = pnand %p8347_p0, %p8346_p12  ;;  %p8354_p3 = scmp.lt.u32.totalorder %s8345_s28, %s8611_s17 }
  0x4c   : > { %p8353_p10 = por %p8352_p6, %p8351_p13 }
  0x4d   : > { %p8349_p1 = pneg %p8348_p2 }
  0x4e   : > { %p8355_p7 = por %p8354_p3, %p8353_p10 }
  0x50   : > { %p8356_p9 = pnand %p8355_p7, %p8349_p1 }
  0x52   : > { %8359 = shalt.err (!%p8356_p9)
}
  0x53   : > { %s8360_s10 = scalar_lea.vmem %s8613_s24, 2048  ;;  %s8451_s11 = smov [#allocation3]  }
  0x54   : > { %p8361_p12 = scmp.ne.s32.totalorder %s8613_s24, %s8360_s10  ;;  %s8365_s25 = sshll.u32 %s8451_s11, 4  ;;  %s8366_s25 = int_to_ptr.vmem [resolvable:$false] %s8365_s25 }
  0x55   : > { %s8367_s7 = scalar_lea.vmem %s8366_s25, 4096  ;;  %p8368_p4 = scmp.lt.s32.totalorder %s8613_s24, %s8366_s25 }
  0x56   : > { %p8363_p2 = pnand %p8361_p12, %p8347_p0  ;;  %p8369_p13 = scmp.lt.s32.totalorder %s8367_s7, %s8360_s10 }
  0x58   : > { %p8364_p5 = pneg %p8363_p2  ;;  %p8370_p6 = por %p8369_p13, %p8368_p4 }
  0x5a   : > { %p8371_p10 = pnand %p8370_p6, %p8364_p5 }
  0x5c   : > { %8374 = shalt.err (!%p8371_p10)
}
  0x5d   : > { %s8452_s8 = smov 256   ;;  %s8453_s21 = smov 16  }
  0x5e   : > { %7323 = dma.hbm_to_vmem [thread:$0]  (!%p8615_p11), %s8611_s17, 2048, %s8613_s24, %s8619_s27, %s8452_s8, %s8452_s8, %s8453_s21  }
  0x5f   : > { %181 = sbr.rel (%p8518_p8) target bundleno = 1800 (0x708), region = 32 }
  0x66   : > { %s8650_s28 = sand.u32 1, %s8437_s13   ;;  %p10075_p4 = scmp.ne.s32.totalorder %s10068_s18, 0 }
  0x67   : > { %s6458_s22 = sshll.u32 %s8650_s28, 7  ;;  %s184_s29 = scalar_lea.sflag [#allocation4], %s8650_s28 }
  0x68   : > { %s8656_s30 = scalar_lea.vmem [#allocation3], %s6458_s22 }
  0x69   : > { %8420 = dma.done.wait (%p10075_p4), %s184_s29, 2048  }
  0x6a   : > { %8422 = vsyncadd (%p10075_p4), %s184_s29, 4294965248  ;;  %p10076_p5 = scmp.eq.s32.totalorder %s8499_s16, 0 }
  0x6c   : > { %8424 = dma.done.wait (%p10076_p5), [#allocation7], 73728   ;;  %p10077_p8 = pmov %p10076_p5 }
  0x6d   : > { %v227_v0 = vlaneseq  ;;  %v8454_v1 = vmov 0.0   ;;  %v7375_v3 = vld [vmem:[#allocation6 + $0x304] ss:$8 sps:$4 sm:$0xff]   ;;  %v7377_v4 = vld [vmem:[#allocation6 + $0x300] ss:$8 sps:$4 sm:$0xff]   ;;  %v293_v17 = vld [vmem:[%s8656_s30 + $0x18] sm:$0xff] }
  0x6e   : > { %8426 = vsyncadd (%p10077_p8), [#allocation7], 4294893568  ;;  %218 = vst [vmem:[#allocation2] sm:$0xff] %v8454_v1  ;;  %668 = vmatprep.subr.bf16.mxu0 %v7375_v3  ;;  %v7378_v5 = vld [vmem:[#allocation6 + $0x314] ss:$8 sps:$4 sm:$0xff]   ;;  %v291_v16 = vld [vmem:[%s8656_s30 + $0x8] sm:$0xff] }
  0x6f   : > { %219 = vst [vmem:[#allocation2 + $0x8] sm:$0xff] %v8454_v1  ;;  %220 = vst [vmem:[#allocation2 + $0x10] sm:$0x3] %v8454_v1  ;;  %vm8666_vm0 = vcmp.lt.s32.totalorder %v227_v0, 256  ;;  %669 = vmatpush1.bf16.msra.mxu0 %v7377_v4  ;;  %v7380_v6 = vld [vmem:[#allocation6 + $0x310] ss:$8 sps:$4 sm:$0xff]  }
  0x70   : > { %221 = vst [vmem:[#allocation2 + $0x18] sm:$0x3] %v8454_v1  ;;  %223 = vst [vmem:[#allocation2 + $0x120] sm:$0xff] %v8454_v1  ;;  %670 = vmatprep.subr.bf16.mxu0 %v7378_v5  ;;  %v7381_v7 = vld [vmem:[#allocation6 + $0x324] ss:$8 sps:$4 sm:$0xff]   ;;  %v323_v18 = vrot.slane %v291_v16, 7 }
  0x71   : > { %224 = vst [vmem:[#allocation2 + $0x128] sm:$0xff] %v8454_v1  ;;  %225 = vst [vmem:[#allocation2 + $0x130] sm:$0x3] %v8454_v1  ;;  %v7383_v8 = vld [vmem:[#allocation6 + $0x320] ss:$8 sps:$4 sm:$0xff]   ;;  %v325_v19 = vrot.slane %v293_v17, 7 }
  0x72   : > { %226 = vst [vmem:[#allocation2 + $0x138] sm:$0x3] %v8454_v1  ;;  %234 = vst.msk [vmem:[#allocation2 + $0x20] ss:$8 sm:$0x3] %vm8666_vm0, %v8454_v1  ;;  %v290_v21 = vld [vmem:[%s8656_s30] sm:$0xff] }
  0x73   : > { %237 = vst.msk [vmem:[#allocation2 + $0x40] ss:$8 sm:$0x3] %vm8666_vm0, %v8454_v1  ;;  %240 = vst.msk [vmem:[#allocation2 + $0x60] ss:$8 sm:$0x3] %vm8666_vm0, %v8454_v1  ;;  %671 = vmatpush1.bf16.msra.mxu0 %v7380_v6 }
  0x74   : > { %243 = vst.msk [vmem:[#allocation2 + $0x80] ss:$8 sm:$0x3] %vm8666_vm0, %v8454_v1  ;;  %246 = vst.msk [vmem:[#allocation2 + $0xa0] ss:$8 sm:$0x3] %vm8666_vm0, %v8454_v1  ;;  %672 = vmatprep.subr.bf16.mxu0 %v7381_v7 }
  0x75   : > { %249 = vst.msk [vmem:[#allocation2 + $0xc0] ss:$8 sm:$0x3] %vm8666_vm0, %v8454_v1  ;;  %252 = vst.msk [vmem:[#allocation2 + $0xe0] ss:$8 sm:$0x3] %vm8666_vm0, %v8454_v1 }
  0x76   : > { %255 = vst.msk [vmem:[#allocation2 + $0x100] ss:$8 sm:$0x3] %vm8666_vm0, %v8454_v1  ;;  %264 = vst.msk [vmem:[#allocation2 + $0x31] ss:$8 sm:$0x3] %vm8666_vm0, %v8454_v1 }
  0x77   : > { %267 = vst.msk [vmem:[#allocation2 + $0x51] ss:$8 sm:$0x3] %vm8666_vm0, %v8454_v1  ;;  %270 = vst.msk [vmem:[#allocation2 + $0x71] ss:$8 sm:$0x3] %vm8666_vm0, %v8454_v1  ;;  %673 = vmatpush1.bf16.msra.mxu0 %v7383_v8 }
  0x78   : > { %273 = vst.msk [vmem:[#allocation2 + $0x91] ss:$8 sm:$0x3] %vm8666_vm0, %v8454_v1  ;;  %276 = vst.msk [vmem:[#allocation2 + $0xb1] ss:$8 sm:$0x3] %vm8666_vm0, %v8454_v1 }
  0x79   : > { %279 = vst.msk [vmem:[#allocation2 + $0xd1] ss:$8 sm:$0x3] %vm8666_vm0, %v8454_v1  ;;  %282 = vst.msk [vmem:[#allocation2 + $0xf1] ss:$8 sm:$0x3] %vm8666_vm0, %v8454_v1 }
  0x7a   : > { %285 = vst.msk [vmem:[#allocation2 + $0x111] ss:$8 sm:$0x3] %vm8666_vm0, %v8454_v1  ;;  %231 = vst.msk [vmem:[#allocation2] ss:$8 sm:$0x3] %vm8666_vm0, %v8454_v1 }
  0x7b   : > { %258 = vst.msk [vmem:[#allocation2 + $0x120] ss:$8 sm:$0x3] %vm8666_vm0, %v8454_v1  ;;  %261 = vst.msk [vmem:[#allocation2 + $0x11] ss:$8 sm:$0x3] %vm8666_vm0, %v8454_v1 }
  0x7c   : > { %288 = vst.msk [vmem:[#allocation2 + $0x131] ss:$8 sm:$0x3] %vm8666_vm0, %v8454_v1  ;;  %v7384_v9 = vld [vmem:[#allocation6 + $0x334] ss:$8 sps:$4 sm:$0xff]   ;;  %v322_v24 = vrot.slane %v290_v21, 7 }
  0x7d   : > { %v7386_v10 = vld [vmem:[#allocation6 + $0x330] ss:$8 sps:$4 sm:$0xff]   ;;  %674 = vmatprep.subr.bf16.mxu0 %v7384_v9  ;;  %v7387_v11 = vld [vmem:[#allocation6 + $0x344] ss:$8 sps:$4 sm:$0xff]   ;;  %v7389_v12 = vld [vmem:[#allocation6 + $0x340] ss:$8 sps:$4 sm:$0xff]  }
  0x7e   : > { %675 = vmatpush1.bf16.msra.mxu0 %v7386_v10  ;;  %v7390_v13 = vld [vmem:[#allocation6 + $0x354] ss:$8 sps:$4 sm:$0xff]   ;;  %v7392_v14 = vld [vmem:[#allocation6 + $0x350] ss:$8 sps:$4 sm:$0xff]   ;;  %v7393_v15 = vld [vmem:[#allocation6 + $0x364] ss:$8 sps:$4 sm:$0xff]  }
  0x7f   : > { %676 = vmatprep.subr.bf16.mxu0 %v7387_v11  ;;  %v7395_v20 = vld [vmem:[#allocation6 + $0x360] ss:$8 sps:$4 sm:$0xff]   ;;  %v292_v22 = vld [vmem:[%s8656_s30 + $0x10] sm:$0xff]  ;;  %356 = vst [vmem:[#allocation2 + $0x28] sm:$0xfe] %v323_v18  ;;  %v297_v36 = vld [vmem:[%s8656_s30 + $0x38] sm:$0xff] }
  0x80   : > { %v7396_v23 = vld [vmem:[#allocation6 + $0x374] ss:$8 sps:$4 sm:$0xff]   ;;  %358 = vst [vmem:[#allocation2 + $0x38] sm:$0x1] %v323_v18  ;;  %360 = vst [vmem:[#allocation2 + $0x48] sm:$0xfe] %v325_v19 }
  0x81   : > { %362 = vst [vmem:[#allocation2 + $0x58] sm:$0x1] %v325_v19  ;;  %v324_v25 = vrot.slane %v292_v22, 7  ;;  %355 = vst [vmem:[#allocation2 + $0x20] sm:$0xfe] %v322_v24  ;;  %v295_v35 = vld [vmem:[%s8656_s30 + $0x28] sm:$0xff] }
  0x82   : > { %677 = vmatpush1.bf16.msra.mxu0 %v7389_v12  ;;  %357 = vst [vmem:[#allocation2 + $0x30] sm:$0x1] %v322_v24  ;;  %v7398_v26 = vld [vmem:[#allocation6 + $0x370] ss:$8 sps:$4 sm:$0xff]   ;;  %v7399_v27 = vld [vmem:[#allocation6 + $0x384] ss:$8 sps:$4 sm:$0xff]  }
  0x83   : > { %678 = vmatprep.subr.bf16.mxu0 %v7390_v13  ;;  %359 = vst [vmem:[#allocation2 + $0x40] sm:$0xfe] %v324_v25  ;;  %361 = vst [vmem:[#allocation2 + $0x50] sm:$0x1] %v324_v25  ;;  %v7401_v28 = vld [vmem:[#allocation6 + $0x380] ss:$8 sps:$4 sm:$0xff]  }
  0x84   : > { %v7402_v31 = vld [vmem:[#allocation6 + $0x394] ss:$8 sps:$4 sm:$0xff]   ;;  %v7404_v33 = vld [vmem:[#allocation6 + $0x390] ss:$8 sps:$4 sm:$0xff]   ;;  %v7405_v34 = vld [vmem:[#allocation6 + $0x3a4] ss:$8 sps:$4 sm:$0xff]  }
  0x85   : > { %v327_v37 = vrot.slane %v295_v35, 7  ;;  %v7407_v38 = vld [vmem:[#allocation6 + $0x3a0] ss:$8 sps:$4 sm:$0xff]   ;;  %v7408_v39 = vld [vmem:[#allocation6 + $0x3b4] ss:$8 sps:$4 sm:$0xff]   ;;  %v329_v40 = vrot.slane %v297_v36, 7 }
  0x86   : > { %679 = vmatpush1.bf16.msra.mxu0 %v7392_v14  ;;  %v8714_v29 = vld [vmem:[#allocation2 + $0x28] sm:$0xff]  ;;  %v294_v41 = vld [vmem:[%s8656_s30 + $0x20] sm:$0xff]  ;;  %v296_v42 = vld [vmem:[%s8656_s30 + $0x30] sm:$0xff]  ;;  %vm1298_vm1 = vcmask 1046528   ;;  %vm2243_vm2 = vcmask 1045504   ;;  %s7044_s18 = sshll.u32 %s8499_s16, 11 }
  0x87   : > { %680 = vmatprep.subr.bf16.mxu0 %v7393_v15  ;;  %v8716_v30 = vld [vmem:[#allocation2 + $0x48] sm:$0xff]  ;;  %364 = vst [vmem:[#allocation2 + $0x68] sm:$0xfe] %v327_v37  ;;  %366 = vst [vmem:[#allocation2 + $0x78] sm:$0x1] %v327_v37  ;;  %v326_v43 = vrot.slane %v294_v41, 7  ;;  %s9978_s26 = scalar_lea.hbm %s10039_s3, %s7044_s18 }
  0x88   : > { %v468_v32 = vpack.c.bf16 %v8716_v30, %v8714_v29  ;;  %368 = vst [vmem:[#allocation2 + $0x88] sm:$0xfe] %v329_v40  ;;  %370 = vst [vmem:[#allocation2 + $0x98] sm:$0x1] %v329_v40  ;;  %v328_v44 = vrot.slane %v296_v42, 7  ;;  %v299_v45 = vld [vmem:[%s8656_s30 + $0x48] sm:$0xff] }
  0x89   : > { %363 = vst [vmem:[#allocation2 + $0x60] sm:$0xfe] %v326_v43  ;;  %365 = vst [vmem:[#allocation2 + $0x70] sm:$0x1] %v326_v43  ;;  %v301_v46 = vld [vmem:[%s8656_s30 + $0x58] sm:$0xff]  ;;  %v331_v47 = vrot.slane %v299_v45, 7 }
  0x8a   : > { %681 = vmatpush1.bf16.msra.mxu0 %v7395_v20  ;;  %700 = vmatprep.mubr.bf16.mxu0 %v468_v32  ;;  %v7410_v48 = vld [vmem:[#allocation6 + $0x3b0] ss:$8 sps:$4 sm:$0xff]   ;;  %v7411_v49 = vld [vmem:[#allocation6 + $0x3c4] ss:$8 sps:$4 sm:$0xff]   ;;  %367 = vst [vmem:[#allocation2 + $0x80] sm:$0xfe] %v328_v44 }
  0x8b   : > { %682 = vmatprep.subr.bf16.mxu0 %v7396_v23  ;;  %369 = vst [vmem:[#allocation2 + $0x90] sm:$0x1] %v328_v44  ;;  %v333_v50 = vrot.slane %v301_v46, 7  ;;  %v298_v51 = vld [vmem:[%s8656_s30 + $0x40] sm:$0xff]  ;;  %372 = vst [vmem:[#allocation2 + $0xa8] sm:$0xfe] %v331_v47 }
  0x8c   : > { %374 = vst [vmem:[#allocation2 + $0xb8] sm:$0x1] %v331_v47  ;;  %v300_v52 = vld [vmem:[%s8656_s30 + $0x50] sm:$0xff]  ;;  %v330_v53 = vrot.slane %v298_v51, 7  ;;  %v303_v55 = vld [vmem:[%s8656_s30 + $0x68] sm:$0xff]  ;;  %v305_v56 = vld [vmem:[%s8656_s30 + $0x78] sm:$0xff] }
  0x8d   : > { %376 = vst [vmem:[#allocation2 + $0xc8] sm:$0xfe] %v333_v50  ;;  %378 = vst [vmem:[#allocation2 + $0xd8] sm:$0x1] %v333_v50  ;;  %v332_v54 = vrot.slane %v300_v52, 7  ;;  %v335_v57 = vrot.slane %v303_v55, 7 }
  0x8e   : > { %683 = vmatpush1.bf16.msra.mxu0 %v7398_v26  ;;  %371 = vst [vmem:[#allocation2 + $0xa0] sm:$0xfe] %v330_v53  ;;  %373 = vst [vmem:[#allocation2 + $0xb0] sm:$0x1] %v330_v53  ;;  %v7413_v58 = vld [vmem:[#allocation6 + $0x3c0] ss:$8 sps:$4 sm:$0xff]  }
  0x8f   : > { %684 = vmatprep.subr.bf16.mxu0 %v7399_v27  ;;  %375 = vst [vmem:[#allocation2 + $0xc0] sm:$0xfe] %v332_v54  ;;  %377 = vst [vmem:[#allocation2 + $0xd0] sm:$0x1] %v332_v54  ;;  %v337_v59 = vrot.slane %v305_v56, 7  ;;  %v302_v61 = vld [vmem:[%s8656_s30 + $0x60] sm:$0xff] }
  0x90   : > { %v7414_v60 = vld [vmem:[#allocation6 + $0x3d4] ss:$8 sps:$4 sm:$0xff]   ;;  %380 = vst [vmem:[#allocation2 + $0xe8] sm:$0xfe] %v335_v57  ;;  %382 = vst [vmem:[#allocation2 + $0xf8] sm:$0x1] %v335_v57 }
  0x91   : > { %v304_v62 = vld [vmem:[%s8656_s30 + $0x70] sm:$0xff]  ;;  %384 = vst [vmem:[#allocation2 + $0x108] sm:$0xfe] %v337_v59  ;;  %386 = vst [vmem:[#allocation2 + $0x118] sm:$0x1] %v337_v59  ;;  %v334_v63 = vrot.slane %v302_v61, 7 }
  0x92   : > { %685 = vmatpush1.bf16.msra.mxu0 %v7401_v28  ;;  %v336_v0 = vrot.slane %v304_v62, 7  ;;  %v7416_v1 = vld [vmem:[#allocation6 + $0x3d0] ss:$8 sps:$4 sm:$0xff]   ;;  %v7417_v2 = vld [vmem:[#allocation6 + $0x3e4] ss:$8 sps:$4 sm:$0xff]   ;;  %s9960_s20 = scalar_lea.vmem [#allocation9], %s6458_s22 }
  0x93   : > { %686 = vmatprep.subr.bf16.mxu0 %v7402_v31  ;;  %379 = vst [vmem:[#allocation2 + $0xe0] sm:$0xfe] %v334_v63  ;;  %381 = vst [vmem:[#allocation2 + $0xf0] sm:$0x1] %v334_v63  ;;  %v7419_v3 = vld [vmem:[#allocation6 + $0x3e0] ss:$8 sps:$4 sm:$0xff]  }
  0x94   : > { %383 = vst [vmem:[#allocation2 + $0x100] sm:$0xfe] %v336_v0  ;;  %385 = vst [vmem:[#allocation2 + $0x110] sm:$0x1] %v336_v0  ;;  %v7420_v4 = vld [vmem:[#allocation6 + $0x3f4] ss:$8 sps:$4 sm:$0xff]  }
  0x95   : > { %v7422_v5 = vld [vmem:[#allocation6 + $0x3f0] ss:$8 sps:$4 sm:$0xff]   ;;  %v7425_v6 = vld [vmem:[#allocation6 + $0x4] ss:$8 sps:$4 sm:$0xff]   ;;  %v7423_v12 = vld [vmem:[#allocation6] ss:$8 sps:$4 sm:$0xff]  }
  0x96   : > { %687 = vmatpush1.bf16.msra.mxu0 %v7404_v33  ;;  %v8732_v7 = vld [vmem:[#allocation2 + $0x20] sm:$0xff]  ;;  %v8736_v9 = vld [vmem:[#allocation2 + $0x68] sm:$0xff]  ;;  %v7428_v14 = vld [vmem:[#allocation6 + $0x14] ss:$8 sps:$4 sm:$0xff]   ;;  %s6357_s17 = sshll.u32 %s9960_s20, 4  ;;  %s6344_s27 = scalar_lea.sflag [#allocation5], %s8650_s28  ;;  %s9980_s17 = int_to_ptr.vmem [resolvable:$true] %s6357_s17 }
  0x97   : > { %688 = vmatprep.subr.bf16.mxu0 %v7405_v34  ;;  %v8734_v8 = vld [vmem:[#allocation2 + $0x40] sm:$0xff]  ;;  %v8738_v10 = vld [vmem:[#allocation2 + $0x88] sm:$0xff]  ;;  %v7426_v15 = vld [vmem:[#allocation6 + $0x10] ss:$8 sps:$4 sm:$0xff]   ;;  %s8375_s23 = scalar_lea.vmem %s9980_s17, 2048  ;;  %p10146_p0 = scmp.ne.s32.totalorder %s10073_s6, 0 }
  0x98   : > { %v467_v11 = vpack.c.bf16 %v8734_v8, %v8732_v7  ;;  %v470_v13 = vpack.c.bf16 %v8738_v10, %v8736_v9  ;;  %v7431_v16 = vld [vmem:[#allocation6 + $0x24] ss:$8 sps:$4 sm:$0xff]   ;;  %v7429_v22 = vld [vmem:[#allocation6 + $0x20] ss:$8 sps:$4 sm:$0xff]   ;;  %v7434_v24 = vld [vmem:[#allocation6 + $0x34] ss:$8 sps:$4 sm:$0xff]   ;;  %p8376_p11 = scmp.ne.s32.totalorder %s9980_s17, %s8375_s23 }
  0x99   : > { %v8744_v17 = vld [vmem:[#allocation2 + $0x60] sm:$0xff]  ;;  %v8748_v19 = vld [vmem:[#allocation2 + $0xa8] sm:$0xff]  ;;  %v7432_v25 = vld [vmem:[#allocation6 + $0x30] ss:$8 sps:$4 sm:$0xff]   ;;  %s8455_s5 = smov [#allocation9]  }
  0x9a   : > { %689 = vmatpush1.bf16.msra.mxu0 %v7407_v38  ;;  %v8746_v18 = vld [vmem:[#allocation2 + $0x80] sm:$0xff]  ;;  %v8750_v20 = vld [vmem:[#allocation2 + $0xc8] sm:$0xff]  ;;  %v7440_v36 = vld [vmem:[#allocation6 + $0x54] ss:$8 sps:$4 sm:$0xff]   ;;  %p8377_p1 = pnand %p8376_p11, %p10146_p0  ;;  %s8379_s10 = sshll.u32 %s8455_s5, 4  ;;  %s8380_s10 = int_to_ptr.vmem [resolvable:$false] %s8379_s10 }
  0x9b   : > { %690 = vmatprep.subr.bf16.mxu0 %v7408_v39  ;;  %v469_v21 = vpack.c.bf16 %v8746_v18, %v8744_v17  ;;  %v472_v23 = vpack.c.bf16 %v8750_v20, %v8748_v19  ;;  %v7437_v26 = vld [vmem:[#allocation6 + $0x44] ss:$8 sps:$4 sm:$0xff]   ;;  %v7435_v34 = vld [vmem:[#allocation6 + $0x40] ss:$8 sps:$4 sm:$0xff]   ;;  %v7438_v37 = vld [vmem:[#allocation6 + $0x50] ss:$8 sps:$4 sm:$0xff]   ;;  %p8382_p7 = scmp.lt.s32.totalorder %s9980_s17, %s8380_s10 }
  0x9c   : > { %v8756_v27 = vld [vmem:[#allocation2 + $0xa0] sm:$0xff]  ;;  %v8760_v31 = vld [vmem:[#allocation2 + $0xe8] sm:$0xff]  ;;  %v7446_v44 = vld [vmem:[#allocation6 + $0x74] ss:$8 sps:$4 sm:$0xff]   ;;  %p8378_p3 = pneg %p8377_p1  ;;  %s8381_s11 = scalar_lea.vmem %s8380_s10, 4096 }
  0x9d   : > { %v8758_v28 = vld [vmem:[#allocation2 + $0xc0] sm:$0xff]  ;;  %v8762_v32 = vld [vmem:[#allocation2 + $0x108] sm:$0xff]  ;;  %v7444_v46 = vld [vmem:[#allocation6 + $0x70] ss:$8 sps:$4 sm:$0xff]   ;;  %p8383_p9 = scmp.lt.s32.totalorder %s8381_s11, %s8375_s23 }
  0x9e   : > { %691 = vmatpush1.bf16.msra.mxu0 %v7410_v48  ;;  %v471_v33 = vpack.c.bf16 %v8758_v28, %v8756_v27  ;;  %v474_v35 = vpack.c.bf16 %v8762_v32, %v8760_v31  ;;  %v7443_v38 = vld [vmem:[#allocation6 + $0x64] ss:$8 sps:$4 sm:$0xff]   ;;  %v7441_v43 = vld [vmem:[#allocation6 + $0x60] ss:$8 sps:$4 sm:$0xff]   ;;  %v7450_v50 = vld [vmem:[#allocation6 + $0x90] ss:$8 sps:$4 sm:$0xff]  }
  0x9f   : > { %692 = vmatprep.subr.bf16.mxu0 %v7411_v49  ;;  %v8768_v39 = vld [vmem:[#allocation2 + $0x8] sm:$0xff]  ;;  %v8770_v40 = vld [vmem:[#allocation2 + $0xe0] sm:$0xff]  ;;  %v7452_v49 = vld [vmem:[#allocation6 + $0x94] ss:$8 sps:$4 sm:$0xff]   ;;  %p8384_p12 = por %p8383_p9, %p8382_p7 }
  0xa0   : > { %v8772_v41 = vld [vmem:[#allocation2 + $0x100] sm:$0xff]  ;;  %v428_v45 = vpack.c.bf16 %v8714_v29, %v8768_v39  ;;  %v7458_v53 = vld [vmem:[#allocation6 + $0xb4] ss:$8 sps:$4 sm:$0xff]   ;;  %v7456_v29 = vld [vmem:[#allocation6 + $0xb0] ss:$8 sps:$4 sm:$0xff]  }
  0xa1   : > { %v473_v42 = vpack.c.bf16 %v8772_v41, %v8770_v40  ;;  %v7449_v47 = vld [vmem:[#allocation6 + $0x84] ss:$8 sps:$4 sm:$0xff]   ;;  %v7447_v48 = vld [vmem:[#allocation6 + $0x80] ss:$8 sps:$4 sm:$0xff]   ;;  %v7464_v56 = vld [vmem:[#allocation6 + $0xd4] ss:$8 sps:$4 sm:$0xff]   ;;  %p8385_p2 = pnand %p8384_p12, %p8378_p3 }
  0xa2   : > { %693 = vmatpush1.bf16.msra.mxu0 %v7413_v58  ;;  %v7455_v51 = vld [vmem:[#allocation6 + $0xa4] ss:$8 sps:$4 sm:$0xff]   ;;  %v7453_v52 = vld [vmem:[#allocation6 + $0xa0] ss:$8 sps:$4 sm:$0xff]   ;;  %v7462_v57 = vld [vmem:[#allocation6 + $0xd0] ss:$8 sps:$4 sm:$0xff]  }
  0xa3   : > { %694 = vmatprep.subr.bf16.mxu0 %v7414_v60  ;;  %v7461_v54 = vld [vmem:[#allocation6 + $0xc4] ss:$8 sps:$4 sm:$0xff]   ;;  %v7459_v55 = vld [vmem:[#allocation6 + $0xc0] ss:$8 sps:$4 sm:$0xff]   ;;  %v7470_v60 = vld [vmem:[#allocation6 + $0xf4] ss:$8 sps:$4 sm:$0xff]  }
  0xa4   : > { %v7467_v58 = vld [vmem:[#allocation6 + $0xe4] ss:$8 sps:$4 sm:$0xff]   ;;  %v7465_v59 = vld [vmem:[#allocation6 + $0xe0] ss:$8 sps:$4 sm:$0xff]   ;;  %v7468_v61 = vld [vmem:[#allocation6 + $0xf0] ss:$8 sps:$4 sm:$0xff]  }
  0xa5   : > { %v8778_v62 = vld [vmem:[#allocation2] sm:$0xff] }
  0xa6   : > { %695 = vmatpush1.bf16.msra.mxu0 %v7416_v1  ;;  %v7473_v63 = vld [vmem:[#allocation6 + $0x604] ss:$8 sps:$4 sm:$0xff]   ;;  %v427_v0 = vpack.c.bf16 %v8732_v7, %v8778_v62  ;;  %v7471_v1 = vld [vmem:[#allocation6 + $0x600] ss:$8 sps:$4 sm:$0xff]   ;;  %v7482_v7 = vld [vmem:[#allocation6 + $0x634] ss:$8 sps:$4 sm:$0xff]  }
  0xa7   : > { %696 = vmatprep.subr.bf16.mxu0 %v7417_v2  ;;  %v7476_v2 = vld [vmem:[#allocation6 + $0x614] ss:$8 sps:$4 sm:$0xff]  }
  0xaa   : > { %697 = vmatpush1.bf16.msra.mxu0 %v7419_v3  ;;  %v430_v3 = vpack.c.bf16 %v8736_v9, %v8716_v30  ;;  %v7480_v30 = vld [vmem:[#allocation6 + $0x630] ss:$8 sps:$4 sm:$0xff]   ;;  %v7485_v9 = vld [vmem:[#allocation6 + $0x644] ss:$8 sps:$4 sm:$0xff]  }
  0xab   : > { %698 = vmatprep.subr.bf16.mxu0 %v7420_v4  ;;  %v7474_v4 = vld [vmem:[#allocation6 + $0x610] ss:$8 sps:$4 sm:$0xff]  }
  0xae   : > { %699 = vmatpush1.bf16.msra.mxu0 %v7422_v5  ;;  %v7479_v5 = vld [vmem:[#allocation6 + $0x624] ss:$8 sps:$4 sm:$0xff]  }
  0xaf   : > { %901 = vmatprep.subr.bf16.mxu0 %v7425_v6  ;;  %v8786_v6 = vpack.c.bf16 %v8744_v17, %v8734_v8  ;;  %v8796_v8 = vpack.c.bf16 %v8756_v27, %v8746_v18  ;;  %v8806_v17 = vpack.c.bf16 %v8770_v40, %v8758_v28  ;;  %v7489_v18 = vld [vmem:[#allocation6 + $0x660] ss:$8 sps:$4 sm:$0xff]   ;;  %v7506_v27 = vld [vmem:[#allocation6 + $0x6b4] ss:$8 sps:$4 sm:$0xff]   ;;  %v7504_v28 = vld [vmem:[#allocation6 + $0x6b0] ss:$8 sps:$4 sm:$0xff]  }
  0xb0   : > { %v7516_v40 = vld [vmem:[#allocation6 + $0x6f0] ss:$8 sps:$4 sm:$0xff]  }
  0xb1   : > { %701 = vmatmul.mubr.bf16.vlgmr.msra.gmra.mrb[0].mxu0 %v467_v11  ;;  %v7477_v11 = vld [vmem:[#allocation6 + $0x620] ss:$8 sps:$4 sm:$0xff]  }
  0xb2   : > { %902 = vmatpush1.bf16.msra.mxu0 %v7423_v12  ;;  %710 = vmatprep.mubr.bf16.mxu0 %v470_v13  ;;  %v8790_v12 = vpack.c.bf16 %v8748_v19, %v8738_v10  ;;  %v7483_v13 = vld [vmem:[#allocation6 + $0x640] ss:$8 sps:$4 sm:$0xff]   ;;  %v8800_v10 = vpack.c.bf16 %v8760_v31, %v8750_v20  ;;  %v7494_v19 = vld [vmem:[#allocation6 + $0x674] ss:$8 sps:$4 sm:$0xff]   ;;  %v7492_v20 = vld [vmem:[#allocation6 + $0x670] ss:$8 sps:$4 sm:$0xff]  }
  0xb3   : > { %903 = vmatprep.subr.bf16.mxu0 %v7428_v14  ;;  %v7488_v14 = vld [vmem:[#allocation6 + $0x654] ss:$8 sps:$4 sm:$0xff]   ;;  %v7509_v31 = vld [vmem:[#allocation6 + $0x6c4] ss:$8 sps:$4 sm:$0xff]  }
  0xb6   : > { %904 = vmatpush1.bf16.msra.mxu0 %v7426_v15  ;;  %v7486_v15 = vld [vmem:[#allocation6 + $0x650] ss:$8 sps:$4 sm:$0xff]  }
  0xb7   : > { %905 = vmatprep.subr.bf16.mxu0 %v7431_v16  ;;  %v7491_v16 = vld [vmem:[#allocation6 + $0x664] ss:$8 sps:$4 sm:$0xff]  }
  0xb9   : > { %711 = vmatmul.mubr.bf16.gmra.mrb[4].mxu0 %v469_v21  ;;  %v7497_v21 = vld [vmem:[#allocation6 + $0x684] ss:$8 sps:$4 sm:$0xff]  }
  0xba   : > { %906 = vmatpush1.bf16.msra.mxu0 %v7429_v22  ;;  %720 = vmatprep.mubr.bf16.mxu0 %v472_v23  ;;  %v7495_v22 = vld [vmem:[#allocation6 + $0x680] ss:$8 sps:$4 sm:$0xff]   ;;  %v7500_v23 = vld [vmem:[#allocation6 + $0x694] ss:$8 sps:$4 sm:$0xff]  }
  0xbb   : > { %907 = vmatprep.subr.bf16.mxu0 %v7434_v24  ;;  %v7498_v24 = vld [vmem:[#allocation6 + $0x690] ss:$8 sps:$4 sm:$0xff]  }
  0xbe   : > { %908 = vmatpush1.bf16.msra.mxu0 %v7432_v25  ;;  %v7503_v25 = vld [vmem:[#allocation6 + $0x6a4] ss:$8 sps:$4 sm:$0xff]  }
  0xbf   : > { %909 = vmatprep.subr.bf16.mxu0 %v7437_v26  ;;  %v7501_v26 = vld [vmem:[#allocation6 + $0x6a0] ss:$8 sps:$4 sm:$0xff]  }
  0xc1   : > { %721 = vmatmul.mubr.bf16.gmra.mrb[8].mxu0 %v471_v33  ;;  %v7507_v33 = vld [vmem:[#allocation6 + $0x6c0] ss:$8 sps:$4 sm:$0xff]  }
  0xc2   : > { %910 = vmatpush1.bf16.msra.mxu0 %v7435_v34  ;;  %730 = vmatprep.mubr.bf16.mxu0 %v474_v35  ;;  %v7512_v34 = vld [vmem:[#allocation6 + $0x6d4] ss:$8 sps:$4 sm:$0xff]   ;;  %v7510_v35 = vld [vmem:[#allocation6 + $0x6d0] ss:$8 sps:$4 sm:$0xff]  }
  0xc3   : > { %911 = vmatprep.subr.bf16.mxu0 %v7440_v36  ;;  %v7515_v36 = vld [vmem:[#allocation6 + $0x6e4] ss:$8 sps:$4 sm:$0xff]  }
  0xc6   : > { %912 = vmatpush1.bf16.msra.mxu0 %v7438_v37  ;;  %v7513_v37 = vld [vmem:[#allocation6 + $0x6e0] ss:$8 sps:$4 sm:$0xff]  }
  0xc7   : > { %913 = vmatprep.subr.bf16.mxu0 %v7443_v38  ;;  %v7518_v38 = vld [vmem:[#allocation6 + $0x6f4] ss:$8 sps:$4 sm:$0xff]  }
  0xc9   : > { %731 = vmatmul.mubr.bf16.gmra.mrb[12].mxu0 %v473_v42  ;;  %v7521_v42 = vld [vmem:[#allocation6 + $0x104] ss:$8 sps:$4 sm:$0xff]  }
  0xca   : > { %914 = vmatpush1.bf16.msra.mxu0 %v7441_v43  ;;  %933 = vmatprep.mubr.bf16.mxu0 %v428_v45  ;;  %v7519_v43 = vld [vmem:[#allocation6 + $0x100] ss:$8 sps:$4 sm:$0xff]   ;;  %v7522_v45 = vld [vmem:[#allocation6 + $0x110] ss:$8 sps:$4 sm:$0xff]  }
  0xcb   : > { %915 = vmatprep.subr.bf16.mxu0 %v7446_v44  ;;  %v7524_v44 = vld [vmem:[#allocation6 + $0x114] ss:$8 sps:$4 sm:$0xff]  }
  0xce   : > { %916 = vmatpush1.bf16.msra.mxu0 %v7444_v46  ;;  %v7527_v46 = vld [vmem:[#allocation6 + $0x124] ss:$8 sps:$4 sm:$0xff]  }
  0xcf   : > { %917 = vmatprep.subr.bf16.mxu0 %v7449_v47  ;;  %v7525_v47 = vld [vmem:[#allocation6 + $0x120] ss:$8 sps:$4 sm:$0xff]  }
  0xd2   : > { %918 = vmatpush1.bf16.msra.mxu0 %v7447_v48  ;;  %v7530_v48 = vld [vmem:[#allocation6 + $0x134] ss:$8 sps:$4 sm:$0xff]  }
  0xd3   : > { %919 = vmatprep.subr.bf16.mxu0 %v7452_v49  ;;  %v7528_v49 = vld [vmem:[#allocation6 + $0x130] ss:$8 sps:$4 sm:$0xff]  }
  0xd6   : > { %920 = vmatpush1.bf16.msra.mxu0 %v7450_v50  ;;  %v7533_v50 = vld [vmem:[#allocation6 + $0x144] ss:$8 sps:$4 sm:$0xff]  }
  0xd7   : > { %921 = vmatprep.subr.bf16.mxu0 %v7455_v51  ;;  %v8812_v51 = vld [vmem:[#allocation2 + $0x128] sm:$0xff] }
  0xda   : > { %922 = vmatpush1.bf16.msra.mxu0 %v7453_v52  ;;  %v390_v52 = vld [vmem:[#allocation2 + $0x18] sm:$0x3] }
  0xdb   : > { %923 = vmatprep.subr.bf16.mxu0 %v7458_v53  ;;  %v394_v53 = vld [vmem:[#allocation2 + $0x38] sm:$0x3] }
  0xde   : > { %924 = vmatpush1.bf16.msra.mxu0 %v7456_v29  ;;  %v1302_v29 = vrot.slane %v8768_v39, 1  ;;  %v8822_v39 = vld [vmem:[#allocation2 + $0x120] sm:$0xff] }
  0xdf   : > { %925 = vmatprep.subr.bf16.mxu0 %v7461_v54  ;;  %v7531_v54 = vld [vmem:[#allocation6 + $0x140] ss:$8 sps:$4 sm:$0xff]  }
  0xe2   : > { %926 = vmatpush1.bf16.msra.mxu0 %v7459_v55  ;;  %v7536_v55 = vld [vmem:[#allocation6 + $0x154] ss:$8 sps:$4 sm:$0xff]  }
  0xe3   : > { %927 = vmatprep.subr.bf16.mxu0 %v7464_v56  ;;  %v975_v56 = vpack.c.bf16 %v8812_v51, %v8762_v32 }
  0xe6   : > { %928 = vmatpush1.bf16.msra.mxu0 %v7462_v57  ;;  %v1303_v57 = vrot.slane %v390_v52, 1 }
  0xe7   : > { %929 = vmatprep.subr.bf16.mxu0 %v7467_v58  ;;  %v8818_v58 = vld [vmem:[#allocation2 + $0x28] sm:$0xff] }
  0xea   : > { %930 = vmatpush1.bf16.msra.mxu0 %v7465_v59  ;;  %v1308_v59 = vrot.slane %v8818_v58, 1 }
  0xeb   : > { %931 = vmatprep.subr.bf16.mxu0 %v7470_v60  ;;  %v1309_v60 = vrot.slane %v394_v53, 1 }
  0xed   : > { %v8826_v32 = vsel %vm1298_vm1, %v1308_v59, %v1309_v60  ;;  %v8884_v59 = vld [vmem:[#allocation2 + $0x88] sm:$0xff] }
  0xee   : > { %932 = vmatpush1.bf16.msra.mxu0 %v7468_v61  ;;  %v7534_v61 = vld [vmem:[#allocation6 + $0x150] ss:$8 sps:$4 sm:$0xff]   ;;  %v1326_v60 = vrot.slane %v8884_v59, 1 }
  0xef   : > { %1169 = vmatprep.subr.bf16.mxu0 %v7473_v63  ;;  %v7539_v63 = vld [vmem:[#allocation6 + $0x164] ss:$8 sps:$4 sm:$0xff]  }
  0xf1   : > { %934 = vmatmul.mubr.bf16.vlgmr.msra.gmra.mrb[0].mxu0 %v427_v0  ;;  %v1304_v0 = vsel %vm1298_vm1, %v1302_v29, %v1303_v57  ;;  %v7572_v29 = vld [vmem:[#allocation6 + $0x414] ss:$8 sps:$4 sm:$0xff]  }
  0xf2   : > { %1170 = vmatpush1.bf16.msra.mxu0 %v7471_v1  ;;  %943 = vmatprep.mubr.bf16.mxu0 %v430_v3  ;;  %v974_v1 = vpack.c.bf16 %v8822_v39, %v8772_v41  ;;  %v7549_v41 = vld [vmem:[#allocation6 + $0x1a0] ss:$8 sps:$4 sm:$0xff]  }
  0xf3   : > { %1171 = vmatprep.subr.bf16.mxu0 %v7476_v2  ;;  %v7537_v2 = vld [vmem:[#allocation6 + $0x160] ss:$8 sps:$4 sm:$0xff]  }
  0xf6   : > { %1172 = vmatpush1.bf16.msra.mxu0 %v7474_v4  ;;  %v1380_v4 = vpack.c.bf16 %v8826_v32, %v1304_v0 }
  0xf7   : > { %1173 = vmatprep.subr.bf16.mxu0 %v7479_v5  ;;  %v7540_v5 = vld [vmem:[#allocation6 + $0x170] ss:$8 sps:$4 sm:$0xff]  }
  0xf9   : > { %944 = vmatmul.mubr.bf16.gmra.mrb[4].mxu0 %v8786_v6 }
  0xfa   : > { %1174 = vmatpush1.bf16.msra.mxu0 %v7477_v11  ;;  %953 = vmatprep.mubr.bf16.mxu0 %v8790_v12  ;;  %v7543_v11 = vld [vmem:[#allocation6 + $0x180] ss:$8 sps:$4 sm:$0xff]  }
  0xfb   : > { %1175 = vmatprep.subr.bf16.mxu0 %v7482_v7  ;;  %v7548_v7 = vld [vmem:[#allocation6 + $0x194] ss:$8 sps:$4 sm:$0xff]  }
  0xfe   : > { %1176 = vmatpush1.bf16.msra.mxu0 %v7480_v30  ;;  %v7551_v30 = vld [vmem:[#allocation6 + $0x1a4] ss:$8 sps:$4 sm:$0xff]  }
  0xff   : > { %1177 = vmatprep.subr.bf16.mxu0 %v7485_v9  ;;  %v7554_v9 = vld [vmem:[#allocation6 + $0x1b4] ss:$8 sps:$4 sm:$0xff]  }
 0x101   : > { %954 = vmatmul.mubr.bf16.gmra.mrb[8].mxu0 %v8796_v8 }
 0x102   : > { %1178 = vmatpush1.bf16.msra.mxu0 %v7483_v13  ;;  %963 = vmatprep.mubr.bf16.mxu0 %v8800_v10  ;;  %v7557_v13 = vld [vmem:[#allocation6 + $0x1c4] ss:$8 sps:$4 sm:$0xff]  }
 0x103   : > { %1179 = vmatprep.subr.bf16.mxu0 %v7488_v14  ;;  %v7555_v14 = vld [vmem:[#allocation6 + $0x1c0] ss:$8 sps:$4 sm:$0xff]  }
 0x106   : > { %1180 = vmatpush1.bf16.msra.mxu0 %v7486_v15  ;;  %v7558_v15 = vld [vmem:[#allocation6 + $0x1d0] ss:$8 sps:$4 sm:$0xff]  }
 0x107   : > { %1181 = vmatprep.subr.bf16.mxu0 %v7491_v16  ;;  %v7563_v16 = vld [vmem:[#allocation6 + $0x1e4] ss:$8 sps:$4 sm:$0xff]  }
 0x109   : > { %964 = vmatmul.mubr.bf16.gmra.mrb[12].mxu0 %v8806_v17 }
 0x10a   : > { %1182 = vmatpush1.bf16.msra.mxu0 %v7489_v18  ;;  %1201 = vmatprep.mubr.bf16.mxu0 %v430_v3  ;;  %v7542_v3 = vld [vmem:[#allocation6 + $0x174] ss:$8 sps:$4 sm:$0xff]   ;;  %v8833_v18 = vld [vmem:[#allocation2 + $0x30] sm:$0x3] }
 0x10b   : > { %1183 = vmatprep.subr.bf16.mxu0 %v7494_v19  ;;  %v8835_v19 = vld [vmem:[#allocation2 + $0x58] sm:$0x3] }
 0x10e   : > { %1184 = vmatpush1.bf16.msra.mxu0 %v7492_v20  ;;  %v7561_v20 = vld [vmem:[#allocation6 + $0x1e0] ss:$8 sps:$4 sm:$0xff]  }
 0x10f   : > { %1185 = vmatprep.subr.bf16.mxu0 %v7497_v21  ;;  %v8837_v21 = vld [vmem:[#allocation2 + $0x78] sm:$0x3] }
 0x112   : > { %1186 = vmatpush1.bf16.msra.mxu0 %v7495_v22  ;;  %v8839_v22 = vld [vmem:[#allocation2 + $0x20] sm:$0xff] }
 0x113   : > { %1187 = vmatprep.subr.bf16.mxu0 %v7500_v23  ;;  %v1305_v23 = vrot.slane %v8839_v22, 1 }
 0x116   : > { %1188 = vmatpush1.bf16.msra.mxu0 %v7498_v24  ;;  %v1299_v24 = vrot.slane %v8778_v62, 1  ;;  %v7564_v62 = vld [vmem:[#allocation6 + $0x1f0] ss:$8 sps:$4 sm:$0xff]  }
 0x117   : > { %1189 = vmatprep.subr.bf16.mxu0 %v7503_v25  ;;  %v7566_v25 = vld [vmem:[#allocation6 + $0x1f4] ss:$8 sps:$4 sm:$0xff]  }
 0x11a   : > { %1190 = vmatpush1.bf16.msra.mxu0 %v7501_v26 }
 0x11b   : > { %1191 = vmatprep.subr.bf16.mxu0 %v7506_v27  ;;  %v1306_v27 = vrot.slane %v8833_v18, 1 }
 0x11e   : > { %1192 = vmatpush1.bf16.msra.mxu0 %v7504_v28  ;;  %v8845_v28 = vld [vmem:[#allocation2 + $0x48] sm:$0xff] }
 0x11f   : > { %1193 = vmatprep.subr.bf16.mxu0 %v7509_v31  ;;  %v1314_v31 = vrot.slane %v8845_v28, 1 }
 0x122   : > { %1194 = vmatpush1.bf16.msra.mxu0 %v7507_v33  ;;  %v1315_v33 = vrot.slane %v8835_v19, 1 }
 0x123   : > { %1195 = vmatprep.subr.bf16.mxu0 %v7512_v34  ;;  %v8849_v34 = vld [vmem:[#allocation2 + $0x68] sm:$0xff] }
 0x126   : > { %1196 = vmatpush1.bf16.msra.mxu0 %v7510_v35  ;;  %v1320_v35 = vrot.slane %v8849_v34, 1 }
 0x127   : > { %1197 = vmatprep.subr.bf16.mxu0 %v7515_v36  ;;  %v1321_v36 = vrot.slane %v8837_v21, 1 }
 0x12a   : > { %1198 = vmatpush1.bf16.msra.mxu0 %v7513_v37  ;;  %v8853_v37 = vld [vmem:[#allocation2 + $0x50] sm:$0x3] }
 0x12b   : > { %1199 = vmatprep.subr.bf16.mxu0 %v7518_v38  ;;  %v7569_v38 = vld [vmem:[#allocation6 + $0x404] ss:$8 sps:$4 sm:$0xff]   ;;  %v1312_v53 = vrot.slane %v8853_v37, 1 }
 0x12e   : > { %1200 = vmatpush1.bf16.msra.mxu0 %v7516_v40  ;;  %v8855_v40 = vld [vmem:[#allocation2 + $0x70] sm:$0x3] }
 0x12f   : > { %1580 = vmatprep.subr.bf16.mxu0 %v7521_v42  ;;  %v1318_v57 = vrot.slane %v8855_v40, 1 }
 0x131   : > { %1202 = vmatmul.mubr.bf16.vlgmr.msra.gmra.mrb[0].mxu0 %v8786_v6  ;;  %v7545_v6 = vld [vmem:[#allocation6 + $0x184] ss:$8 sps:$4 sm:$0xff]  }
 0x132   : > { %1581 = vmatpush1.bf16.msra.mxu0 %v7519_v43  ;;  %1211 = vmatprep.mubr.bf16.mxu0 %v8790_v12  ;;  %v7546_v12 = vld [vmem:[#allocation6 + $0x190] ss:$8 sps:$4 sm:$0xff]   ;;  %v8859_v43 = vsel %vm1298_vm1, %v1305_v23, %v1306_v27 }
 0x133   : > { %1582 = vmatprep.subr.bf16.mxu0 %v7524_v44  ;;  %v8861_v44 = vld [vmem:[#allocation2 + $0x98] sm:$0x3] }
 0x136   : > { %1583 = vmatpush1.bf16.msra.mxu0 %v7522_v45  ;;  %v8863_v45 = vld [vmem:[#allocation2 + $0xb8] sm:$0x3] }
 0x137   : > { %1584 = vmatprep.subr.bf16.mxu0 %v7527_v46  ;;  %v8866_v46 = vsel %vm1298_vm1, %v1314_v31, %v1315_v33  ;;  %v8933_v31 = vld [vmem:[#allocation2 + $0xe8] sm:$0xff] }
 0x138   : > { %v1344_v33 = vrot.slane %v8933_v31, 1 }
 0x139   : > { %1212 = vmatmul.mubr.bf16.gmra.mrb[4].mxu0 %v8796_v8  ;;  %v7552_v8 = vld [vmem:[#allocation6 + $0x1b0] ss:$8 sps:$4 sm:$0xff]  }
 0x13a   : > { %1585 = vmatpush1.bf16.msra.mxu0 %v7525_v47  ;;  %1221 = vmatprep.mubr.bf16.mxu0 %v8800_v10  ;;  %v7560_v10 = vld [vmem:[#allocation6 + $0x1d4] ss:$8 sps:$4 sm:$0xff]   ;;  %v8869_v47 = vsel %vm1298_vm1, %v1320_v35, %v1321_v36  ;;  %v7576_v36 = vld [vmem:[#allocation6 + $0x430] ss:$8 sps:$4 sm:$0xff]  }
 0x13b   : > { %1586 = vmatprep.subr.bf16.mxu0 %v7530_v48  ;;  %v7567_v48 = vld [vmem:[#allocation6 + $0x400] ss:$8 sps:$4 sm:$0xff]  }
 0x13e   : > { %1587 = vmatpush1.bf16.msra.mxu0 %v7528_v49 }
 0x13f   : > { %1588 = vmatprep.subr.bf16.mxu0 %v7533_v50  ;;  %v8872_v50 = vld [vmem:[#allocation2 + $0x40] sm:$0xff] }
 0x140   : > { %v1311_v52 = vrot.slane %v8872_v50, 1 }
 0x141   : > { %1222 = vmatmul.mubr.bf16.gmra.mrb[8].mxu0 %v8806_v17  ;;  %v8831_v17 = vld [vmem:[#allocation2 + $0x10] sm:$0x3] }
 0x142   : > { %1589 = vmatpush1.bf16.msra.mxu0 %v7531_v54  ;;  %1231 = vmatprep.mubr.bf16.mxu0 %v975_v56  ;;  %v1300_v26 = vrot.slane %v8831_v17, 1  ;;  %v8878_v54 = vpack.c.bf16 %v8869_v47, %v8866_v46 }
 0x143   : > { %1590 = vmatprep.subr.bf16.mxu0 %v7536_v55  ;;  %v8880_v55 = vld [vmem:[#allocation2 + $0x60] sm:$0xff] }
 0x144   : > { %v1301_v42 = vsel %vm1298_vm1, %v1299_v24, %v1300_v26  ;;  %v1317_v56 = vrot.slane %v8880_v55, 1 }
 0x145   : > { %v1379_v49 = vpack.c.bf16 %v8859_v43, %v1301_v42 }
 0x146   : > { %1591 = vmatpush1.bf16.msra.mxu0 %v7534_v61  ;;  %v1327_v61 = vrot.slane %v8861_v44, 1 }
 0x147   : > { %1592 = vmatprep.subr.bf16.mxu0 %v7539_v63  ;;  %v8888_v63 = vld [vmem:[#allocation2 + $0xa8] sm:$0xff] }
 0x148   : > { %v1332_v0 = vrot.slane %v8888_v63, 1 }
 0x149   : > { %1232 = vmatmul.mubr.bf16.gmra.mrb[12].mxu0 %v974_v1  ;;  %v1333_v1 = vrot.slane %v8863_v45, 1 }
 0x14a   : > { %1593 = vmatpush1.bf16.msra.mxu0 %v7537_v2  ;;  %1612 = vmatprep.mubr.bf16.mxu0 %v1380_v4  ;;  %v7570_v2 = vld [vmem:[#allocation6 + $0x410] ss:$8 sps:$4 sm:$0xff]   ;;  %v7575_v4 = vld [vmem:[#allocation6 + $0x424] ss:$8 sps:$4 sm:$0xff]  }
 0x14b   : > { %1594 = vmatprep.subr.bf16.mxu0 %v7542_v3  ;;  %v8892_v3 = vld [vmem:[#allocation2 + $0x90] sm:$0x3] }
 0x14e   : > { %1595 = vmatpush1.bf16.msra.mxu0 %v7540_v5  ;;  %v8894_v5 = vld [vmem:[#allocation2 + $0xb0] sm:$0x3] }
 0x14f   : > { %1596 = vmatprep.subr.bf16.mxu0 %v7545_v6  ;;  %v8898_v6 = vsel %vm1298_vm1, %v1311_v52, %v1312_v53  ;;  %v1330_v24 = vrot.slane %v8894_v5, 1 }
 0x152   : > { %1597 = vmatpush1.bf16.msra.mxu0 %v7543_v11  ;;  %v8901_v11 = vsel %vm1298_vm1, %v1317_v56, %v1318_v57  ;;  %v8959_v57 = vld [vmem:[#allocation2 + $0xc0] sm:$0xff] }
 0x153   : > { %1598 = vmatprep.subr.bf16.mxu0 %v7548_v7  ;;  %v8903_v7 = vld [vmem:[#allocation2 + $0xd8] sm:$0x3] }
 0x154   : > { %v1339_v27 = vrot.slane %v8903_v7, 1 }
 0x156   : > { %1599 = vmatpush1.bf16.msra.mxu0 %v7546_v12  ;;  %v8905_v12 = vld [vmem:[#allocation2 + $0xf8] sm:$0x3] }
 0x157   : > { %1600 = vmatprep.subr.bf16.mxu0 %v7551_v30  ;;  %v8908_v30 = vsel %vm1298_vm1, %v1326_v60, %v1327_v61  ;;  %v1345_v35 = vrot.slane %v8905_v12, 1  ;;  %v1335_v60 = vrot.slane %v8959_v57, 1  ;;  %v7584_v61 = vld [vmem:[#allocation6 + $0x454] ss:$8 sps:$4 sm:$0xff]  }
 0x159   : > { %v8953_v53 = vsel %vm1298_vm1, %v1344_v33, %v1345_v35  ;;  %v1670_v33 = vpack.c.bf16 %v8866_v46, %v8826_v32  ;;  %v7588_v35 = vld [vmem:[#allocation6 + $0x470] ss:$8 sps:$4 sm:$0xff]   ;;  %v7602_v32 = vld [vmem:[#allocation6 + $0x4b4] ss:$8 sps:$4 sm:$0xff]  }
 0x15a   : > { %1601 = vmatpush1.bf16.msra.mxu0 %v7549_v41  ;;  %v8911_v41 = vsel %vm1298_vm1, %v1332_v0, %v1333_v1  ;;  %v7600_v46 = vld [vmem:[#allocation6 + $0x4b0] ss:$8 sps:$4 sm:$0xff]  }
 0x15b   : > { %1602 = vmatprep.subr.bf16.mxu0 %v7554_v9  ;;  %v7573_v9 = vld [vmem:[#allocation6 + $0x420] ss:$8 sps:$4 sm:$0xff]  }
 0x15e   : > { %1603 = vmatpush1.bf16.msra.mxu0 %v7552_v8  ;;  %v8915_v8 = vpack.c.bf16 %v8901_v11, %v8898_v6 }
 0x15f   : > { %1604 = vmatprep.subr.bf16.mxu0 %v7557_v13  ;;  %v8917_v13 = vld [vmem:[#allocation2 + $0x80] sm:$0xff] }
 0x162   : > { %1605 = vmatpush1.bf16.msra.mxu0 %v7555_v14  ;;  %v1323_v14 = vrot.slane %v8917_v13, 1 }
 0x163   : > { %1606 = vmatprep.subr.bf16.mxu0 %v7560_v10  ;;  %v1324_v10 = vrot.slane %v8892_v3, 1 }
 0x166   : > { %1607 = vmatpush1.bf16.msra.mxu0 %v7558_v15  ;;  %v7578_v15 = vld [vmem:[#allocation6 + $0x434] ss:$8 sps:$4 sm:$0xff]  }
 0x167   : > { %1608 = vmatprep.subr.bf16.mxu0 %v7563_v16  ;;  %v8923_v16 = vpack.c.bf16 %v8911_v41, %v8908_v30 }
 0x16a   : > { %1609 = vmatpush1.bf16.msra.mxu0 %v7561_v20  ;;  %v8925_v20 = vld [vmem:[#allocation2 + $0xa0] sm:$0xff] }
 0x16b   : > { %1610 = vmatprep.subr.bf16.mxu0 %v7566_v25  ;;  %v1329_v23 = vrot.slane %v8925_v20, 1  ;;  %v8929_v25 = vld [vmem:[#allocation2 + $0xc8] sm:$0xff] }
 0x16c   : > { %v1338_v26 = vrot.slane %v8929_v25, 1 }
 0x16d   : > { %v8943_v42 = vsel %vm1298_vm1, %v1329_v23, %v1330_v24 }
 0x16e   : > { %1611 = vmatpush1.bf16.msra.mxu0 %v7564_v62  ;;  %v7581_v62 = vld [vmem:[#allocation6 + $0x444] ss:$8 sps:$4 sm:$0xff]   ;;  %v8950_v52 = vsel %vm1298_vm1, %v1338_v26, %v1339_v27  ;;  %v7585_v26 = vld [vmem:[#allocation6 + $0x460] ss:$8 sps:$4 sm:$0xff]   ;;  %v7590_v27 = vld [vmem:[#allocation6 + $0x474] ss:$8 sps:$4 sm:$0xff]  }
 0x16f   : > { %1870 = vmatprep.subr.bf16.mxu0 %v7569_v38  ;;  %v8940_v38 = vsel %vm1298_vm1, %v1323_v14, %v1324_v10  ;;  %v8964_v0 = vpack.c.bf16 %v8953_v53, %v8950_v52  ;;  %v7582_v14 = vld [vmem:[#allocation6 + $0x450] ss:$8 sps:$4 sm:$0xff]   ;;  %v7587_v10 = vld [vmem:[#allocation6 + $0x464] ss:$8 sps:$4 sm:$0xff]  }
 0x170   : > { %v8957_v56 = vpack.c.bf16 %v8943_v42, %v8940_v38 }
 0x171   : > { %1613 = vmatmul.mubr.bf16.vlgmr.msra.gmra.mrb[0].mxu0 %v1379_v49  ;;  %v8947_v49 = vld [vmem:[#allocation2 + $0xf0] sm:$0x3] }
 0x172   : > { %1871 = vmatpush1.bf16.msra.mxu0 %v7567_v48  ;;  %1622 = vmatprep.mubr.bf16.mxu0 %v8878_v54  ;;  %v8945_v48 = vld [vmem:[#allocation2 + $0xd0] sm:$0x3] }
 0x173   : > { %1872 = vmatprep.subr.bf16.mxu0 %v7572_v29  ;;  %v7579_v29 = vld [vmem:[#allocation6 + $0x440] ss:$8 sps:$4 sm:$0xff]   ;;  %v1336_v1 = vrot.slane %v8945_v48, 1 }
 0x176   : > { %1873 = vmatpush1.bf16.msra.mxu0 %v7570_v2  ;;  %v8967_v2 = vld [vmem:[#allocation2 + $0xe0] sm:$0xff] }
 0x177   : > { %1874 = vmatprep.subr.bf16.mxu0 %v7575_v4  ;;  %v1341_v4 = vrot.slane %v8967_v2, 1 }
 0x179   : > { %1623 = vmatmul.mubr.bf16.gmra.mrb[4].mxu0 %v8915_v8 }
 0x17a   : > { %1875 = vmatpush1.bf16.msra.mxu0 %v7573_v9  ;;  %1632 = vmatprep.mubr.bf16.mxu0 %v8923_v16  ;;  %v1342_v9 = vrot.slane %v8947_v49, 1 }
 0x17b   : > { %1876 = vmatprep.subr.bf16.mxu0 %v7578_v15  ;;  %v8974_v15 = vsel %vm1298_vm1, %v1335_v60, %v1336_v1  ;;  %v7594_v60 = vld [vmem:[#allocation6 + $0x490] ss:$8 sps:$4 sm:$0xff]   ;;  %v7597_v1 = vld [vmem:[#allocation6 + $0x4a0] ss:$8 sps:$4 sm:$0xff]  }
 0x17c   : > { %v8977_v23 = vsel %vm1298_vm1, %v1341_v4, %v1342_v9  ;;  %v7605_v4 = vld [vmem:[#allocation6 + $0x4c4] ss:$8 sps:$4 sm:$0xff]   ;;  %v7603_v9 = vld [vmem:[#allocation6 + $0x4c0] ss:$8 sps:$4 sm:$0xff]  }
 0x17d   : > { %v8981_v24 = vpack.c.bf16 %v8977_v23, %v8974_v15 }
 0x17e   : > { %1877 = vmatpush1.bf16.msra.mxu0 %v7576_v36  ;;  %v7593_v36 = vld [vmem:[#allocation6 + $0x484] ss:$8 sps:$4 sm:$0xff]  }
 0x17f   : > { %1878 = vmatprep.subr.bf16.mxu0 %v7581_v62  ;;  %v7591_v62 = vld [vmem:[#allocation6 + $0x480] ss:$8 sps:$4 sm:$0xff]  }
 0x181   : > { %1633 = vmatmul.mubr.bf16.gmra.mrb[8].mxu0 %v8957_v56 }
 0x182   : > { %1879 = vmatpush1.bf16.msra.mxu0 %v7579_v29  ;;  %1642 = vmatprep.mubr.bf16.mxu0 %v8964_v0  ;;  %v7596_v29 = vld [vmem:[#allocation6 + $0x494] ss:$8 sps:$4 sm:$0xff]  }
 0x183   : > { %1880 = vmatprep.subr.bf16.mxu0 %v7584_v61  ;;  %v7599_v61 = vld [vmem:[#allocation6 + $0x4a4] ss:$8 sps:$4 sm:$0xff]  }
 0x186   : > { %1881 = vmatpush1.bf16.msra.mxu0 %v7582_v14  ;;  %v7608_v14 = vld [vmem:[#allocation6 + $0x4d4] ss:$8 sps:$4 sm:$0xff]  }
 0x187   : > { %1882 = vmatprep.subr.bf16.mxu0 %v7587_v10  ;;  %v8986_v10 = vld [vmem:[#allocation2 + $0x118] sm:$0x3] }
 0x188   : > { %10080 = vst [vmem:[#allocation13_spill] sm:$0xff] %v8986_v10 }
 0x189   : > { %1643 = vmatmul.mubr.bf16.gmra.mrb[12].mxu0 %v8981_v24 }
 0x18a   : > { %1883 = vmatpush1.bf16.msra.mxu0 %v7585_v26  ;;  %1902 = vmatprep.mubr.bf16.mxu0 %v1670_v33  ;;  %v8988_v26 = vld [vmem:[#allocation2 + $0x110] sm:$0x3]  ;;  %v1353_v33 = vrot.slane %v8822_v39, 1 }
 0x18b   : > { %1884 = vmatprep.subr.bf16.mxu0 %v7590_v27  ;;  %10081 = vst [vmem:[#allocation14_spill] sm:$0xff] %v8988_v26  ;;  %v1356_v27 = vrot.slane %v8812_v51, 1  ;;  %v9003_v39 = vld [vmem:[#allocation2 + $0x130] sm:$0x3] }
 0x18e   : > { %1885 = vmatpush1.bf16.msra.mxu0 %v7588_v35  ;;  %v7606_v35 = vld [vmem:[#allocation6 + $0x4d0] ss:$8 sps:$4 sm:$0xff]  }
 0x18f   : > { %1886 = vmatprep.subr.bf16.mxu0 %v7593_v36  ;;  %v8992_v36 = vld [vmem:[#allocation2 + $0x108] sm:$0xff] }
 0x190   : > { %10082 = vst [vmem:[#allocation15_spill] sm:$0xff] %v8992_v36 }
 0x192   : > { %1887 = vmatpush1.bf16.msra.mxu0 %v7591_v62  ;;  %v1350_v62 = vrot.slane %v8992_v36, 1 }
 0x193   : > { %1888 = vmatprep.subr.bf16.mxu0 %v7596_v29  ;;  %v1351_v29 = vrot.slane %v8986_v10, 1 }
 0x195   : > { %v9007_v10 = vsel %vm1298_vm1, %v1350_v62, %v1351_v29  ;;  %v7612_v62 = vld [vmem:[#allocation6 + $0x4f0] ss:$8 sps:$4 sm:$0xff]   ;;  %v7617_v29 = vld [vmem:[#allocation6 + $0x704] ss:$8 sps:$4 sm:$0xff]  }
 0x196   : > { %1889 = vmatpush1.bf16.msra.mxu0 %v7594_v60  ;;  %v7611_v60 = vld [vmem:[#allocation6 + $0x4e4] ss:$8 sps:$4 sm:$0xff]  }
 0x197   : > { %1890 = vmatprep.subr.bf16.mxu0 %v7599_v61  ;;  %v8996_v61 = vld [vmem:[#allocation2 + $0x100] sm:$0xff] }
 0x198   : > { %10083 = vst [vmem:[#allocation16_spill] sm:$0xff] %v8996_v61 }
 0x19a   : > { %1891 = vmatpush1.bf16.msra.mxu0 %v7597_v1  ;;  %v1347_v1 = vrot.slane %v8996_v61, 1  ;;  %v7614_v61 = vld [vmem:[#allocation6 + $0x4f4] ss:$8 sps:$4 sm:$0xff]  }
 0x19b   : > { %1892 = vmatprep.subr.bf16.mxu0 %v7602_v32  ;;  %v1348_v32 = vrot.slane %v8988_v26, 1 }
 0x19d   : > { %v9013_v26 = vsel %vm1298_vm1, %v1347_v1, %v1348_v32  ;;  %v1672_v1 = vpack.c.bf16 %v8908_v30, %v8869_v47  ;;  %v7620_v32 = vld [vmem:[#allocation6 + $0x714] ss:$8 sps:$4 sm:$0xff]   ;;  %v7624_v47 = vld [vmem:[#allocation6 + $0x730] ss:$8 sps:$4 sm:$0xff]   ;;  %v7629_v30 = vld [vmem:[#allocation6 + $0x744] ss:$8 sps:$4 sm:$0xff]  }
 0x19e   : > { %1893 = vmatpush1.bf16.msra.mxu0 %v7600_v46  ;;  %v9000_v46 = vld [vmem:[#allocation2 + $0x138] sm:$0x3] }
 0x19f   : > { %1894 = vmatprep.subr.bf16.mxu0 %v7605_v4  ;;  %10084 = vst [vmem:[#allocation17_spill] sm:$0xff] %v9000_v46  ;;  %v1357_v51 = vrot.slane %v9000_v46, 1  ;;  %v1354_v4 = vrot.slane %v9003_v39, 1 }
 0x1a1   : > { %v9018_v36 = vsel %vm1298_vm1, %v1353_v33, %v1354_v4  ;;  %v7618_v33 = vld [vmem:[#allocation6 + $0x710] ss:$8 sps:$4 sm:$0xff]   ;;  %v7621_v4 = vld [vmem:[#allocation6 + $0x720] ss:$8 sps:$4 sm:$0xff]  }
 0x1a2   : > { %1895 = vmatpush1.bf16.msra.mxu0 %v7603_v9  ;;  %v7609_v9 = vld [vmem:[#allocation6 + $0x4e0] ss:$8 sps:$4 sm:$0xff]  }
 0x1a3   : > { %1896 = vmatprep.subr.bf16.mxu0 %v7608_v14  ;;  %v9010_v14 = vsel %vm1298_vm1, %v1356_v27, %v1357_v51  ;;  %v1669_v27 = vpack.c.bf16 %v8898_v6, %v8859_v43  ;;  %v7623_v51 = vld [vmem:[#allocation6 + $0x724] ss:$8 sps:$4 sm:$0xff]   ;;  %v1674_v43 = vpack.c.bf16 %v8950_v52, %v8911_v41  ;;  %v7626_v6 = vld [vmem:[#allocation6 + $0x734] ss:$8 sps:$4 sm:$0xff]   ;;  %v7630_v41 = vld [vmem:[#allocation6 + $0x750] ss:$8 sps:$4 sm:$0xff]  }
 0x1a4   : > { %v1960_v46 = vpack.c.bf16 %v9010_v14, %v9007_v10  ;;  %v7635_v52 = vld [vmem:[#allocation6 + $0x764] ss:$8 sps:$4 sm:$0xff]   ;;  %v7692_v14 = vld [vmem:[#allocation6 + $0x294] ss:$8 sps:$4 sm:$0xff]  }
 0x1a6   : > { %1897 = vmatpush1.bf16.msra.mxu0 %v7606_v35  ;;  %v1959_v35 = vpack.c.bf16 %v9018_v36, %v9013_v26  ;;  %v7701_v36 = vld [vmem:[#allocation6 + $0x2c4] ss:$8 sps:$4 sm:$0xff]  }
 0x1a7   : > { %1898 = vmatprep.subr.bf16.mxu0 %v7611_v60  ;;  %v7615_v60 = vld [vmem:[#allocation6 + $0x700] ss:$8 sps:$4 sm:$0xff]  }
 0x1aa   : > { %1899 = vmatpush1.bf16.msra.mxu0 %v7609_v9  ;;  %v1673_v9 = vpack.c.bf16 %v8974_v15, %v8943_v42  ;;  %v7638_v42 = vld [vmem:[#allocation6 + $0x774] ss:$8 sps:$4 sm:$0xff]   ;;  %v7636_v15 = vld [vmem:[#allocation6 + $0x770] ss:$8 sps:$4 sm:$0xff]  }
 0x1ab   : > { %1900 = vmatprep.subr.bf16.mxu0 %v7614_v61  ;;  %v1671_v61 = vpack.c.bf16 %v8940_v38, %v8901_v11  ;;  %v1676_v11 = vpack.c.bf16 %v9007_v10, %v8953_v53  ;;  %v7632_v38 = vld [vmem:[#allocation6 + $0x754] ss:$8 sps:$4 sm:$0xff]   ;;  %v7641_v53 = vld [vmem:[#allocation6 + $0x784] ss:$8 sps:$4 sm:$0xff]  }
 0x1ac   : > { %v7689_v10 = vld [vmem:[#allocation6 + $0x284] ss:$8 sps:$4 sm:$0xff]  }
 0x1ae   : > { %1901 = vmatpush1.bf16.msra.mxu0 %v7612_v62  ;;  %v7627_v62 = vld [vmem:[#allocation6 + $0x740] ss:$8 sps:$4 sm:$0xff]  }
 0x1af   : > { %2154 = vmatprep.subr.bf16.mxu0 %v7617_v29  ;;  %v1675_v29 = vpack.c.bf16 %v9013_v26, %v8977_v23  ;;  %v7645_v23 = vld [vmem:[#allocation6 + $0x7a0] ss:$8 sps:$4 sm:$0xff]   ;;  %v7696_v26 = vld [vmem:[#allocation6 + $0x2b0] ss:$8 sps:$4 sm:$0xff]  }
 0x1b1   : > { %1903 = vmatmul.mubr.bf16.vlgmr.msra.gmra.mrb[0].mxu0 %v1669_v27  ;;  %v7633_v27 = vld [vmem:[#allocation6 + $0x760] ss:$8 sps:$4 sm:$0xff]  }
 0x1b2   : > { %2155 = vmatpush1.bf16.msra.mxu0 %v7615_v60  ;;  %1912 = vmatprep.mubr.bf16.mxu0 %v1672_v1  ;;  %v7639_v60 = vld [vmem:[#allocation6 + $0x780] ss:$8 sps:$4 sm:$0xff]   ;;  %v7644_v1 = vld [vmem:[#allocation6 + $0x794] ss:$8 sps:$4 sm:$0xff]  }
 0x1b3   : > { %2156 = vmatprep.subr.bf16.mxu0 %v7620_v32  ;;  %v7642_v32 = vld [vmem:[#allocation6 + $0x790] ss:$8 sps:$4 sm:$0xff]  }
 0x1b6   : > { %2157 = vmatpush1.bf16.msra.mxu0 %v7618_v33  ;;  %v7647_v33 = vld [vmem:[#allocation6 + $0x7a4] ss:$8 sps:$4 sm:$0xff]  }
 0x1b7   : > { %2158 = vmatprep.subr.bf16.mxu0 %v7623_v51  ;;  %v7650_v51 = vld [vmem:[#allocation6 + $0x7b4] ss:$8 sps:$4 sm:$0xff]  }
 0x1b9   : > { %1913 = vmatmul.mubr.bf16.gmra.mrb[4].mxu0 %v1671_v61  ;;  %v7648_v61 = vld [vmem:[#allocation6 + $0x7b0] ss:$8 sps:$4 sm:$0xff]  }
 0x1ba   : > { %2159 = vmatpush1.bf16.msra.mxu0 %v7621_v4  ;;  %1922 = vmatprep.mubr.bf16.mxu0 %v1674_v43  ;;  %v7653_v4 = vld [vmem:[#allocation6 + $0x7c4] ss:$8 sps:$4 sm:$0xff]   ;;  %v7656_v43 = vld [vmem:[#allocation6 + $0x7d4] ss:$8 sps:$4 sm:$0xff]  }
 0x1bb   : > { %2160 = vmatprep.subr.bf16.mxu0 %v7626_v6  ;;  %v7654_v6 = vld [vmem:[#allocation6 + $0x7d0] ss:$8 sps:$4 sm:$0xff]  }
 0x1be   : > { %2161 = vmatpush1.bf16.msra.mxu0 %v7624_v47  ;;  %v7659_v47 = vld [vmem:[#allocation6 + $0x7e4] ss:$8 sps:$4 sm:$0xff]  }
 0x1bf   : > { %2162 = vmatprep.subr.bf16.mxu0 %v7629_v30  ;;  %v7657_v30 = vld [vmem:[#allocation6 + $0x7e0] ss:$8 sps:$4 sm:$0xff]  }
 0x1c1   : > { %1923 = vmatmul.mubr.bf16.gmra.mrb[8].mxu0 %v1673_v9  ;;  %v7662_v9 = vld [vmem:[#allocation6 + $0x7f4] ss:$8 sps:$4 sm:$0xff]  }
 0x1c2   : > { %2163 = vmatpush1.bf16.msra.mxu0 %v7627_v62  ;;  %1932 = vmatprep.mubr.bf16.mxu0 %v1676_v11  ;;  %v7660_v62 = vld [vmem:[#allocation6 + $0x7f0] ss:$8 sps:$4 sm:$0xff]   ;;  %v7665_v11 = vld [vmem:[#allocation6 + $0x204] ss:$8 sps:$4 sm:$0xff]  }
 0x1c3   : > { %2164 = vmatprep.subr.bf16.mxu0 %v7632_v38  ;;  %v7663_v38 = vld [vmem:[#allocation6 + $0x200] ss:$8 sps:$4 sm:$0xff]  }
 0x1c6   : > { %2165 = vmatpush1.bf16.msra.mxu0 %v7630_v41  ;;  %v7668_v41 = vld [vmem:[#allocation6 + $0x214] ss:$8 sps:$4 sm:$0xff]  }
 0x1c7   : > { %2166 = vmatprep.subr.bf16.mxu0 %v7635_v52  ;;  %v7666_v52 = vld [vmem:[#allocation6 + $0x210] ss:$8 sps:$4 sm:$0xff]  }
 0x1c9   : > { %1933 = vmatmul.mubr.bf16.gmra.mrb[12].mxu0 %v1675_v29  ;;  %v7671_v29 = vld [vmem:[#allocation6 + $0x224] ss:$8 sps:$4 sm:$0xff]  }
 0x1ca   : > { %2167 = vmatpush1.bf16.msra.mxu0 %v7633_v27  ;;  %2186 = vmatprep.mubr.bf16.mxu0 %v8878_v54  ;;  %v7651_v54 = vld [vmem:[#allocation6 + $0x7c0] ss:$8 sps:$4 sm:$0xff]  }
 0x1cb   : > { %2168 = vmatprep.subr.bf16.mxu0 %v7638_v42  ;;  %v7669_v27 = vld [vmem:[#allocation6 + $0x220] ss:$8 sps:$4 sm:$0xff]   ;;  %v7674_v42 = vld [vmem:[#allocation6 + $0x234] ss:$8 sps:$4 sm:$0xff]  }
 0x1ce   : > { %2169 = vmatpush1.bf16.msra.mxu0 %v7636_v15  ;;  %v7672_v15 = vld [vmem:[#allocation6 + $0x230] ss:$8 sps:$4 sm:$0xff]  }
 0x1cf   : > { %2170 = vmatprep.subr.bf16.mxu0 %v7641_v53  ;;  %v7677_v53 = vld [vmem:[#allocation6 + $0x244] ss:$8 sps:$4 sm:$0xff]  }
 0x1d2   : > { %2171 = vmatpush1.bf16.msra.mxu0 %v7639_v60  ;;  %v8263_v60 = vld [vmem:[#allocation2 + $0x8] sm:$0xff] }
 0x1d3   : > { %2172 = vmatprep.subr.bf16.mxu0 %v7644_v1  ;;  %v2247_v1 = vrot.slane %v8263_v60, 2  ;;  %v2259_v60 = vrot.slane %v8845_v28, 2 }
 0x1d6   : > { %2173 = vmatpush1.bf16.msra.mxu0 %v7642_v32  ;;  %v8264_v32 = vld [vmem:[#allocation2 + $0x18] sm:$0x3] }
 0x1d7   : > { %2174 = vmatprep.subr.bf16.mxu0 %v7647_v33  ;;  %v2248_v33 = vrot.slane %v8264_v32, 2  ;;  %v2266_v32 = vrot.slane %v8837_v21, 2  ;;  %v7711_v21 = vld [vmem:[#allocation6 + $0x500] ss:$8 sps:$4 sm:$0xff]  }
 0x1da   : > { %2175 = vmatpush1.bf16.msra.mxu0 %v7645_v23  ;;  %v2253_v23 = vrot.slane %v8818_v58, 2  ;;  %v7681_v58 = vld [vmem:[#allocation6 + $0x260] ss:$8 sps:$4 sm:$0xff]  }
 0x1db   : > { %2176 = vmatprep.subr.bf16.mxu0 %v7650_v51  ;;  %v8265_v51 = vld [vmem:[#allocation2 + $0x38] sm:$0x3] }
 0x1de   : > { %2177 = vmatpush1.bf16.msra.mxu0 %v7648_v61  ;;  %v2254_v61 = vrot.slane %v8265_v51, 2 }
 0x1df   : > { %2178 = vmatprep.subr.bf16.mxu0 %v7653_v4  ;;  %v2249_v4 = vsel %vm2243_vm2, %v2247_v1, %v2248_v33  ;;  %v2260_v1 = vrot.slane %v8835_v19, 2 }
 0x1e2   : > { %2179 = vmatpush1.bf16.msra.mxu0 %v7651_v54  ;;  %v9048_v54 = vsel %vm2243_vm2, %v2253_v23, %v2254_v61  ;;  %v2257_v61 = vrot.slane %v8853_v37, 2 }
 0x1e3   : > { %2180 = vmatprep.subr.bf16.mxu0 %v7656_v43  ;;  %v2325_v43 = vpack.c.bf16 %v9048_v54, %v2249_v4  ;;  %v7716_v4 = vld [vmem:[#allocation6 + $0x514] ss:$8 sps:$4 sm:$0xff]  }
 0x1e6   : > { %2181 = vmatpush1.bf16.msra.mxu0 %v7654_v6  ;;  %v7686_v6 = vld [vmem:[#allocation6 + $0x274] ss:$8 sps:$4 sm:$0xff]  }
 0x1e7   : > { %2182 = vmatprep.subr.bf16.mxu0 %v7659_v47  ;;  %v7690_v47 = vld [vmem:[#allocation6 + $0x290] ss:$8 sps:$4 sm:$0xff]  }
 0x1ea   : > { %2183 = vmatpush1.bf16.msra.mxu0 %v7657_v30  ;;  %v7695_v30 = vld [vmem:[#allocation6 + $0x2a4] ss:$8 sps:$4 sm:$0xff]  }
 0x1eb   : > { %2184 = vmatprep.subr.bf16.mxu0 %v7662_v9  ;;  %v7693_v9 = vld [vmem:[#allocation6 + $0x2a0] ss:$8 sps:$4 sm:$0xff]  }
 0x1ee   : > { %2185 = vmatpush1.bf16.msra.mxu0 %v7660_v62  ;;  %v7698_v62 = vld [vmem:[#allocation6 + $0x2b4] ss:$8 sps:$4 sm:$0xff]  }
 0x1ef   : > { %2525 = vmatprep.subr.bf16.mxu0 %v7665_v11  ;;  %v7704_v11 = vld [vmem:[#allocation6 + $0x2d4] ss:$8 sps:$4 sm:$0xff]  }
 0x1f1   : > { %2187 = vmatmul.mubr.bf16.vlgmr.msra.gmra.mrb[0].mxu0 %v8915_v8  ;;  %v7675_v8 = vld [vmem:[#allocation6 + $0x240] ss:$8 sps:$4 sm:$0xff]  }
 0x1f2   : > { %2526 = vmatpush1.bf16.msra.mxu0 %v7663_v38  ;;  %2196 = vmatprep.mubr.bf16.mxu0 %v8923_v16  ;;  %v7680_v16 = vld [vmem:[#allocation6 + $0x254] ss:$8 sps:$4 sm:$0xff]   ;;  %v7702_v38 = vld [vmem:[#allocation6 + $0x2d0] ss:$8 sps:$4 sm:$0xff]  }
 0x1f3   : > { %2527 = vmatprep.subr.bf16.mxu0 %v7668_v41  ;;  %v7707_v41 = vld [vmem:[#allocation6 + $0x2e4] ss:$8 sps:$4 sm:$0xff]  }
 0x1f6   : > { %2528 = vmatpush1.bf16.msra.mxu0 %v7666_v52  ;;  %v2250_v52 = vrot.slane %v8839_v22, 2  ;;  %v7708_v22 = vld [vmem:[#allocation6 + $0x2f0] ss:$8 sps:$4 sm:$0xff]  }
 0x1f7   : > { %2529 = vmatprep.subr.bf16.mxu0 %v7671_v29  ;;  %v8266_v29 = vld [vmem:[#allocation2] sm:$0xff] }
 0x1f9   : > { %2197 = vmatmul.mubr.bf16.gmra.mrb[4].mxu0 %v8957_v56  ;;  %v7678_v56 = vld [vmem:[#allocation6 + $0x250] ss:$8 sps:$4 sm:$0xff]  }
 0x1fa   : > { %2530 = vmatpush1.bf16.msra.mxu0 %v7669_v27  ;;  %2206 = vmatprep.mubr.bf16.mxu0 %v8964_v0  ;;  %v7683_v0 = vld [vmem:[#allocation6 + $0x264] ss:$8 sps:$4 sm:$0xff]   ;;  %v2244_v27 = vrot.slane %v8266_v29, 2  ;;  %v2287_v29 = vrot.slane %v8947_v49, 2  ;;  %v7726_v49 = vld [vmem:[#allocation6 + $0x550] ss:$8 sps:$4 sm:$0xff]  }
 0x1fb   : > { %2531 = vmatprep.subr.bf16.mxu0 %v7674_v42  ;;  %v7705_v42 = vld [vmem:[#allocation6 + $0x2e0] ss:$8 sps:$4 sm:$0xff]  }
 0x1fe   : > { %2532 = vmatpush1.bf16.msra.mxu0 %v7672_v15  ;;  %v2245_v15 = vrot.slane %v8831_v17, 2  ;;  %v7713_v17 = vld [vmem:[#allocation6 + $0x504] ss:$8 sps:$4 sm:$0xff]  }
 0x1ff   : > { %2533 = vmatprep.subr.bf16.mxu0 %v7677_v53  ;;  %v2251_v53 = vrot.slane %v8833_v18, 2  ;;  %v9066_v18 = vsel %vm2243_vm2, %v2259_v60, %v2260_v1  ;;  %v10086_v60 = vld [vmem:[#allocation13_spill] sm:$0xff] }
 0x200   : > { %v2246_v33 = vsel %vm2243_vm2, %v2244_v27, %v2245_v15  ;;  %v8267_v27 = vld [vmem:[#allocation2 + $0x128] sm:$0xff]  ;;  %v7728_v15 = vld [vmem:[#allocation6 + $0x554] ss:$8 sps:$4 sm:$0xff]   ;;  %v8268_v1 = vld [vmem:[#allocation2 + $0x120] sm:$0xff] }
 0x201   : > { %2207 = vmatmul.mubr.bf16.gmra.mrb[8].mxu0 %v8981_v24  ;;  %v7684_v24 = vld [vmem:[#allocation6 + $0x270] ss:$8 sps:$4 sm:$0xff]   ;;  %v9063_v23 = vsel %vm2243_vm2, %v2250_v52, %v2251_v53  ;;  %v2286_v52 = vrot.slane %v8967_v2, 2 }
 0x202   : > { %2534 = vmatpush1.bf16.msra.mxu0 %v7675_v8  ;;  %2216 = vmatprep.mubr.bf16.mxu0 %v1960_v46  ;;  %v7687_v46 = vld [vmem:[#allocation6 + $0x280] ss:$8 sps:$4 sm:$0xff]   ;;  %v7710_v8 = vld [vmem:[#allocation6 + $0x2f4] ss:$8 sps:$4 sm:$0xff]   ;;  %v2324_v19 = vpack.c.bf16 %v9063_v23, %v2246_v33 }
 0x203   : > { %2535 = vmatprep.subr.bf16.mxu0 %v7680_v16  ;;  %v2265_v16 = vrot.slane %v8849_v34, 2  ;;  %v2256_v34 = vrot.slane %v8872_v50, 2  ;;  %v2277_v50 = vrot.slane %v8888_v63, 2  ;;  %v2268_v63 = vrot.slane %v8917_v13, 2  ;;  %v10085_v53 = vld [vmem:[#allocation15_spill] sm:$0xff]  ;;  %v10088_v33 = vld [vmem:[#allocation14_spill] sm:$0xff] }
 0x204   : > { %v2289_v13 = vrot.slane %v8933_v31, 2  ;;  %v2280_v31 = vrot.slane %v8959_v57, 2  ;;  %v2296_v57 = vrot.slane %v10086_v60, 2 }
 0x205   : > { %v9069_v28 = vsel %vm2243_vm2, %v2265_v16, %v2266_v32  ;;  %v9086_v37 = vsel %vm2243_vm2, %v2256_v34, %v2257_v61  ;;  %v2298_v16 = vrot.slane %v8268_v1, 2  ;;  %v10087_v32 = vld [vmem:[#allocation16_spill] sm:$0xff]  ;;  %v9150_v34 = vsel %vm2243_vm2, %v2286_v52, %v2287_v29  ;;  %v7731_v61 = vld [vmem:[#allocation6 + $0x564] ss:$8 sps:$4 sm:$0xff]  }
 0x206   : > { %2536 = vmatpush1.bf16.msra.mxu0 %v7678_v56  ;;  %v9075_v51 = vpack.c.bf16 %v9069_v28, %v9066_v18  ;;  %v2262_v56 = vrot.slane %v8880_v55, 2  ;;  %v7719_v55 = vld [vmem:[#allocation6 + $0x524] ss:$8 sps:$4 sm:$0xff]   ;;  %v2614_v29 = vpack.c.bf16 %v9086_v37, %v9063_v23 }
 0x207   : > { %2537 = vmatprep.subr.bf16.mxu0 %v7683_v0  ;;  %v2263_v0 = vrot.slane %v8855_v40, 2  ;;  %v7761_v52 = vld [vmem:[#allocation6 + $0x804] ss:$8 sps:$4 sm:$0xff]  }
 0x209   : > { %2217 = vmatmul.mubr.bf16.gmra.mrb[12].mxu0 %v1959_v35  ;;  %v7699_v35 = vld [vmem:[#allocation6 + $0x2c0] ss:$8 sps:$4 sm:$0xff]   ;;  %v9089_v40 = vsel %vm2243_vm2, %v2262_v56, %v2263_v0 }
 0x20a   : > { %2538 = vmatpush1.bf16.msra.mxu0 %v7681_v58  ;;  %2557 = vmatprep.mubr.bf16.mxu0 %v2325_v43  ;;  %v2271_v58 = vrot.slane %v8884_v59, 2  ;;  %v2272_v43 = vrot.slane %v8861_v44, 2 }
 0x20b   : > { %2539 = vmatprep.subr.bf16.mxu0 %v7686_v6  ;;  %v2278_v6 = vrot.slane %v8863_v45, 2  ;;  %v9099_v45 = vpack.c.bf16 %v9089_v40, %v9086_v37  ;;  %v7770_v37 = vld [vmem:[#allocation6 + $0x834] ss:$8 sps:$4 sm:$0xff]  }
 0x20c   : > { %v9092_v59 = vsel %vm2243_vm2, %v2271_v58, %v2272_v43 }
 0x20d   : > { %v9095_v44 = vsel %vm2243_vm2, %v2277_v50, %v2278_v6  ;;  %v7729_v6 = vld [vmem:[#allocation6 + $0x560] ss:$8 sps:$4 sm:$0xff]  }
 0x20e   : > { %2540 = vmatpush1.bf16.msra.mxu0 %v7684_v24  ;;  %v7714_v24 = vld [vmem:[#allocation6 + $0x510] ss:$8 sps:$4 sm:$0xff]  }
 0x20f   : > { %2541 = vmatprep.subr.bf16.mxu0 %v7689_v10  ;;  %v7717_v10 = vld [vmem:[#allocation6 + $0x520] ss:$8 sps:$4 sm:$0xff]  }
 0x212   : > { %2542 = vmatpush1.bf16.msra.mxu0 %v7687_v46  ;;  %v9104_v46 = vpack.c.bf16 %v9095_v44, %v9092_v59 }
 0x213   : > { %2543 = vmatprep.subr.bf16.mxu0 %v7692_v14  ;;  %v2269_v14 = vrot.slane %v8892_v3, 2 }
 0x215   : > { %v9116_v3 = vsel %vm2243_vm2, %v2268_v63, %v2269_v14  ;;  %v7732_v63 = vld [vmem:[#allocation6 + $0x570] ss:$8 sps:$4 sm:$0xff]   ;;  %v7735_v14 = vld [vmem:[#allocation6 + $0x580] ss:$8 sps:$4 sm:$0xff]  }
 0x216   : > { %2544 = vmatpush1.bf16.msra.mxu0 %v7690_v47  ;;  %v2274_v47 = vrot.slane %v8925_v20, 2  ;;  %v7725_v20 = vld [vmem:[#allocation6 + $0x544] ss:$8 sps:$4 sm:$0xff]   ;;  %v2616_v60 = vpack.c.bf16 %v9116_v3, %v9089_v40 }
 0x217   : > { %2545 = vmatprep.subr.bf16.mxu0 %v7695_v30  ;;  %v2275_v30 = vrot.slane %v8894_v5, 2 }
 0x219   : > { %v9119_v5 = vsel %vm2243_vm2, %v2274_v47, %v2275_v30  ;;  %v7740_v47 = vld [vmem:[#allocation6 + $0x594] ss:$8 sps:$4 sm:$0xff]   ;;  %v7738_v30 = vld [vmem:[#allocation6 + $0x590] ss:$8 sps:$4 sm:$0xff]  }
 0x21a   : > { %2546 = vmatpush1.bf16.msra.mxu0 %v7693_v9  ;;  %v7722_v9 = vld [vmem:[#allocation6 + $0x534] ss:$8 sps:$4 sm:$0xff]  }
 0x21b   : > { %2547 = vmatprep.subr.bf16.mxu0 %v7698_v62  ;;  %v2283_v62 = vrot.slane %v8929_v25, 2 }
 0x21e   : > { %2548 = vmatpush1.bf16.msra.mxu0 %v7696_v26  ;;  %v2284_v26 = vrot.slane %v8903_v7, 2 }
 0x21f   : > { %2549 = vmatprep.subr.bf16.mxu0 %v7701_v36  ;;  %v2290_v36 = vrot.slane %v8905_v12, 2  ;;  %v9129_v12 = vpack.c.bf16 %v9119_v5, %v9116_v3  ;;  %v7776_v3 = vld [vmem:[#allocation6 + $0x854] ss:$8 sps:$4 sm:$0xff]  }
 0x220   : > { %v9122_v7 = vsel %vm2243_vm2, %v2283_v62, %v2284_v26  ;;  %v7741_v62 = vld [vmem:[#allocation6 + $0x5a0] ss:$8 sps:$4 sm:$0xff]   ;;  %v7749_v26 = vld [vmem:[#allocation6 + $0x5c4] ss:$8 sps:$4 sm:$0xff]  }
 0x221   : > { %v9125_v25 = vsel %vm2243_vm2, %v2289_v13, %v2290_v36  ;;  %v7747_v13 = vld [vmem:[#allocation6 + $0x5c0] ss:$8 sps:$4 sm:$0xff]   ;;  %v7752_v36 = vld [vmem:[#allocation6 + $0x5d4] ss:$8 sps:$4 sm:$0xff]   ;;  %v2619_v23 = vpack.c.bf16 %v9122_v7, %v9095_v44  ;;  %v7774_v44 = vld [vmem:[#allocation6 + $0x850] ss:$8 sps:$4 sm:$0xff]  }
 0x222   : > { %2550 = vmatpush1.bf16.msra.mxu0 %v7699_v35  ;;  %v7720_v35 = vld [vmem:[#allocation6 + $0x530] ss:$8 sps:$4 sm:$0xff]  }
 0x223   : > { %2551 = vmatprep.subr.bf16.mxu0 %v7704_v11  ;;  %v7723_v11 = vld [vmem:[#allocation6 + $0x540] ss:$8 sps:$4 sm:$0xff]  }
 0x226   : > { %2552 = vmatpush1.bf16.msra.mxu0 %v7702_v38  ;;  %v9134_v38 = vpack.c.bf16 %v9125_v25, %v9122_v7  ;;  %v7779_v7 = vld [vmem:[#allocation6 + $0x864] ss:$8 sps:$4 sm:$0xff]  }
 0x227   : > { %2553 = vmatprep.subr.bf16.mxu0 %v7707_v41  ;;  %v2281_v41 = vrot.slane %v8945_v48, 2  ;;  %v10089_v48 = vld [vmem:[#allocation17_spill] sm:$0xff] }
 0x228   : > { %v2302_v2 = vrot.slane %v10089_v48, 2  ;;  %v7788_v48 = vld [vmem:[#allocation6 + $0x894] ss:$8 sps:$4 sm:$0xff]  }
 0x22a   : > { %2554 = vmatpush1.bf16.msra.mxu0 %v7705_v42  ;;  %v2301_v42 = vrot.slane %v8267_v27, 2  ;;  %v7759_v27 = vld [vmem:[#allocation6 + $0x800] ss:$8 sps:$4 sm:$0xff]  }
 0x22b   : > { %2555 = vmatprep.subr.bf16.mxu0 %v7710_v8  ;;  %v2295_v8 = vrot.slane %v10085_v53, 2  ;;  %v7762_v53 = vld [vmem:[#allocation6 + $0x810] ss:$8 sps:$4 sm:$0xff]  }
 0x22c   : > { %v9157_v0 = vsel %vm2243_vm2, %v2301_v42, %v2302_v2  ;;  %v2617_v42 = vpack.c.bf16 %v9092_v59, %v9069_v28  ;;  %v7768_v28 = vld [vmem:[#allocation6 + $0x830] ss:$8 sps:$4 sm:$0xff]   ;;  %v7773_v59 = vld [vmem:[#allocation6 + $0x844] ss:$8 sps:$4 sm:$0xff]  }
 0x22d   : > { %v9154_v56 = vsel %vm2243_vm2, %v2295_v8, %v2296_v57  ;;  %v7767_v8 = vld [vmem:[#allocation6 + $0x824] ss:$8 sps:$4 sm:$0xff]   ;;  %v7765_v57 = vld [vmem:[#allocation6 + $0x820] ss:$8 sps:$4 sm:$0xff]   ;;  %v7786_v2 = vld [vmem:[#allocation6 + $0x890] ss:$8 sps:$4 sm:$0xff]  }
 0x22e   : > { %2556 = vmatpush1.bf16.msra.mxu0 %v7708_v22  ;;  %v2292_v22 = vrot.slane %v10087_v32, 2  ;;  %v2905_v58 = vpack.c.bf16 %v9157_v0, %v9154_v56  ;;  %v2621_v40 = vpack.c.bf16 %v9154_v56, %v9125_v25  ;;  %v7785_v25 = vld [vmem:[#allocation6 + $0x884] ss:$8 sps:$4 sm:$0xff]   ;;  %v7821_v0 = vld [vmem:[#allocation8 + $0x340] ss:$8 sps:$4 sm:$0xff]  }
 0x22f   : > { %2815 = vmatprep.subr.bf16.mxu0 %v7713_v17  ;;  %v2293_v17 = vrot.slane %v10088_v33, 2  ;;  %v7780_v33 = vld [vmem:[#allocation6 + $0x870] ss:$8 sps:$4 sm:$0xff]   ;;  %v7819_v56 = vld [vmem:[#allocation8 + $0x344] ss:$8 sps:$4 sm:$0xff]  }
 0x231   : > { %2558 = vmatmul.mubr.bf16.vlgmr.msra.gmra.mrb[0].mxu0 %v2324_v19  ;;  %v9147_v19 = vsel %vm2243_vm2, %v2280_v31, %v2281_v41  ;;  %v7753_v31 = vld [vmem:[#allocation6 + $0x5e0] ss:$8 sps:$4 sm:$0xff]   ;;  %v7756_v41 = vld [vmem:[#allocation6 + $0x5f0] ss:$8 sps:$4 sm:$0xff]  }
 0x232   : > { %2816 = vmatpush1.bf16.msra.mxu0 %v7711_v21  ;;  %2567 = vmatprep.mubr.bf16.mxu0 %v9075_v51  ;;  %v2299_v21 = vrot.slane %v9003_v39, 2  ;;  %v9169_v39 = vpack.c.bf16 %v9150_v34, %v9147_v19  ;;  %v2618_v1 = vpack.c.bf16 %v9147_v19, %v9119_v5  ;;  %v7782_v5 = vld [vmem:[#allocation6 + $0x874] ss:$8 sps:$4 sm:$0xff]   ;;  %v7789_v19 = vld [vmem:[#allocation6 + $0x8a0] ss:$8 sps:$4 sm:$0xff]  }
 0x233   : > { %2817 = vmatprep.subr.bf16.mxu0 %v7716_v4  ;;  %v9160_v4 = vsel %vm2243_vm2, %v2292_v22, %v2293_v17  ;;  %v7777_v22 = vld [vmem:[#allocation6 + $0x860] ss:$8 sps:$4 sm:$0xff]  }
 0x234   : > { %v9165_v43 = vsel %vm2243_vm2, %v2298_v16, %v2299_v21  ;;  %v7771_v16 = vld [vmem:[#allocation6 + $0x840] ss:$8 sps:$4 sm:$0xff]   ;;  %v2620_v32 = vpack.c.bf16 %v9160_v4, %v9150_v34  ;;  %v7794_v34 = vld [vmem:[#allocation6 + $0x8b4] ss:$8 sps:$4 sm:$0xff]   ;;  %v7792_v21 = vld [vmem:[#allocation6 + $0x8b0] ss:$8 sps:$4 sm:$0xff]  }
 0x235   : > { %v2904_v50 = vpack.c.bf16 %v9165_v43, %v9160_v4  ;;  %v7783_v17 = vld [vmem:[#allocation6 + $0x880] ss:$8 sps:$4 sm:$0xff]   ;;  %v7822_v4 = vld [vmem:[#allocation8 + $0x354] ss:$8 sps:$4 sm:$0xff]   ;;  %v7825_v43 = vld [vmem:[#allocation8 + $0x364] ss:$8 sps:$4 sm:$0xff]  }
 0x236   : > { %2818 = vmatpush1.bf16.msra.mxu0 %v7714_v24  ;;  %v2615_v24 = vpack.c.bf16 %v9066_v18, %v9048_v54  ;;  %v7746_v54 = vld [vmem:[#allocation6 + $0x5b4] ss:$8 sps:$4 sm:$0xff]   ;;  %v7744_v18 = vld [vmem:[#allocation6 + $0x5b0] ss:$8 sps:$4 sm:$0xff]  }
 0x237   : > { %2819 = vmatprep.subr.bf16.mxu0 %v7719_v55  ;;  %v7734_v55 = vld [vmem:[#allocation6 + $0x574] ss:$8 sps:$4 sm:$0xff]  }
 0x239   : > { %2568 = vmatmul.mubr.bf16.gmra.mrb[4].mxu0 %v9099_v45 }
 0x23a   : > { %2820 = vmatpush1.bf16.msra.mxu0 %v7717_v10  ;;  %2577 = vmatprep.mubr.bf16.mxu0 %v9104_v46  ;;  %v7737_v10 = vld [vmem:[#allocation6 + $0x584] ss:$8 sps:$4 sm:$0xff]  }
 0x23b   : > { %2821 = vmatprep.subr.bf16.mxu0 %v7722_v9  ;;  %v7743_v9 = vld [vmem:[#allocation6 + $0x5a4] ss:$8 sps:$4 sm:$0xff]  }
 0x23e   : > { %2822 = vmatpush1.bf16.msra.mxu0 %v7720_v35  ;;  %v7750_v35 = vld [vmem:[#allocation6 + $0x5d0] ss:$8 sps:$4 sm:$0xff]  }
 0x23f   : > { %2823 = vmatprep.subr.bf16.mxu0 %v7725_v20  ;;  %v7755_v20 = vld [vmem:[#allocation6 + $0x5e4] ss:$8 sps:$4 sm:$0xff]  }
 0x241   : > { %2578 = vmatmul.mubr.bf16.gmra.mrb[8].mxu0 %v9129_v12 }
 0x242   : > { %2824 = vmatpush1.bf16.msra.mxu0 %v7723_v11  ;;  %2587 = vmatprep.mubr.bf16.mxu0 %v9134_v38  ;;  %v7758_v11 = vld [vmem:[#allocation6 + $0x5f4] ss:$8 sps:$4 sm:$0xff]  }
 0x243   : > { %2825 = vmatprep.subr.bf16.mxu0 %v7728_v15  ;;  %v7764_v15 = vld [vmem:[#allocation6 + $0x814] ss:$8 sps:$4 sm:$0xff]  }
 0x246   : > { %2826 = vmatpush1.bf16.msra.mxu0 %v7726_v49  ;;  %v7791_v49 = vld [vmem:[#allocation6 + $0x8a4] ss:$8 sps:$4 sm:$0xff]  }
 0x247   : > { %2827 = vmatprep.subr.bf16.mxu0 %v7731_v61  ;;  %v7797_v61 = vld [vmem:[#allocation6 + $0x8c4] ss:$8 sps:$4 sm:$0xff]  }
 0x249   : > { %2588 = vmatmul.mubr.bf16.gmra.mrb[12].mxu0 %v9169_v39 }
 0x24a   : > { %2828 = vmatpush1.bf16.msra.mxu0 %v7729_v6  ;;  %2847 = vmatprep.mubr.bf16.mxu0 %v2615_v24  ;;  %v7800_v6 = vld [vmem:[#allocation6 + $0x8d4] ss:$8 sps:$4 sm:$0xff]   ;;  %v7798_v24 = vld [vmem:[#allocation6 + $0x8d0] ss:$8 sps:$4 sm:$0xff]  }
 0x24b   : > { %2829 = vmatprep.subr.bf16.mxu0 %v7734_v55  ;;  %v7803_v55 = vld [vmem:[#allocation6 + $0x8e4] ss:$8 sps:$4 sm:$0xff]  }
 0x24e   : > { %2830 = vmatpush1.bf16.msra.mxu0 %v7732_v63  ;;  %v7801_v63 = vld [vmem:[#allocation6 + $0x8e0] ss:$8 sps:$4 sm:$0xff]  }
 0x24f   : > { %2831 = vmatprep.subr.bf16.mxu0 %v7737_v10  ;;  %v7806_v10 = vld [vmem:[#allocation6 + $0x8f4] ss:$8 sps:$4 sm:$0xff]  }
 0x252   : > { %2832 = vmatpush1.bf16.msra.mxu0 %v7735_v14  ;;  %v7804_v14 = vld [vmem:[#allocation6 + $0x8f0] ss:$8 sps:$4 sm:$0xff]  }
 0x253   : > { %2833 = vmatprep.subr.bf16.mxu0 %v7740_v47  ;;  %v7807_v47 = vld [vmem:[#allocation8 + $0x304] ss:$8 sps:$4 sm:$0xff]  }
 0x254   : > { %3679 = vmatprep.subr.bf16.mxu1 %v7807_v47 }
 0x256   : > { %2834 = vmatpush1.bf16.msra.mxu0 %v7738_v30  ;;  %v7809_v30 = vld [vmem:[#allocation8 + $0x300] ss:$8 sps:$4 sm:$0xff]  }
 0x257   : > { %2835 = vmatprep.subr.bf16.mxu0 %v7743_v9  ;;  %3680 = vmatpush1.bf16.msra.mxu1 %v7809_v30  ;;  %v7818_v9 = vld [vmem:[#allocation8 + $0x330] ss:$8 sps:$4 sm:$0xff]  }
 0x25a   : > { %2836 = vmatpush1.bf16.msra.mxu0 %v7741_v62  ;;  %v7828_v62 = vld [vmem:[#allocation8 + $0x374] ss:$8 sps:$4 sm:$0xff]  }
 0x25b   : > { %2837 = vmatprep.subr.bf16.mxu0 %v7746_v54  ;;  %v7830_v54 = vld [vmem:[#allocation8 + $0x370] ss:$8 sps:$4 sm:$0xff]  }
 0x25e   : > { %2838 = vmatpush1.bf16.msra.mxu0 %v7744_v18  ;;  %v7831_v18 = vld [vmem:[#allocation8 + $0x384] ss:$8 sps:$4 sm:$0xff]  }
 0x25f   : > { %2839 = vmatprep.subr.bf16.mxu0 %v7749_v26  ;;  %v7833_v26 = vld [vmem:[#allocation8 + $0x380] ss:$8 sps:$4 sm:$0xff]  }
 0x262   : > { %2840 = vmatpush1.bf16.msra.mxu0 %v7747_v13  ;;  %v7834_v13 = vld [vmem:[#allocation8 + $0x394] ss:$8 sps:$4 sm:$0xff]  }
 0x263   : > { %2841 = vmatprep.subr.bf16.mxu0 %v7752_v36  ;;  %v7836_v36 = vld [vmem:[#allocation8 + $0x390] ss:$8 sps:$4 sm:$0xff]  }
 0x266   : > { %2842 = vmatpush1.bf16.msra.mxu0 %v7750_v35  ;;  %v7837_v35 = vld [vmem:[#allocation8 + $0x3a4] ss:$8 sps:$4 sm:$0xff]  }
 0x267   : > { %2843 = vmatprep.subr.bf16.mxu0 %v7755_v20  ;;  %v7839_v20 = vld [vmem:[#allocation8 + $0x3a0] ss:$8 sps:$4 sm:$0xff]  }
 0x26a   : > { %2844 = vmatpush1.bf16.msra.mxu0 %v7753_v31  ;;  %v7840_v31 = vld [vmem:[#allocation8 + $0x3b4] ss:$8 sps:$4 sm:$0xff]  }
 0x26b   : > { %2845 = vmatprep.subr.bf16.mxu0 %v7758_v11  ;;  %v7842_v11 = vld [vmem:[#allocation8 + $0x3b0] ss:$8 sps:$4 sm:$0xff]  }
 0x26e   : > { %2846 = vmatpush1.bf16.msra.mxu0 %v7756_v41  ;;  %v7843_v41 = vld [vmem:[#allocation8 + $0x3c4] ss:$8 sps:$4 sm:$0xff]  }
 0x26f   : > { %3099 = vmatprep.subr.bf16.mxu0 %v7761_v52  ;;  %v7845_v52 = vld [vmem:[#allocation8 + $0x3c0] ss:$8 sps:$4 sm:$0xff]  }
 0x271   : > { %2848 = vmatmul.mubr.bf16.vlgmr.msra.gmra.mrb[0].mxu0 %v2614_v29  ;;  %v7846_v29 = vld [vmem:[#allocation8 + $0x3d4] ss:$8 sps:$4 sm:$0xff]  }
 0x272   : > { %3100 = vmatpush1.bf16.msra.mxu0 %v7759_v27  ;;  %2857 = vmatprep.mubr.bf16.mxu0 %v2617_v42  ;;  %v7848_v27 = vld [vmem:[#allocation8 + $0x3d0] ss:$8 sps:$4 sm:$0xff]   ;;  %v7849_v42 = vld [vmem:[#allocation8 + $0x3e4] ss:$8 sps:$4 sm:$0xff]  }
 0x273   : > { %3101 = vmatprep.subr.bf16.mxu0 %v7764_v15  ;;  %v7851_v15 = vld [vmem:[#allocation8 + $0x3e0] ss:$8 sps:$4 sm:$0xff]  }
 0x276   : > { %3102 = vmatpush1.bf16.msra.mxu0 %v7762_v53  ;;  %v7852_v53 = vld [vmem:[#allocation8 + $0x3f4] ss:$8 sps:$4 sm:$0xff]  }
 0x277   : > { %3103 = vmatprep.subr.bf16.mxu0 %v7767_v8  ;;  %v7854_v8 = vld [vmem:[#allocation8 + $0x3f0] ss:$8 sps:$4 sm:$0xff]  }
 0x279   : > { %2858 = vmatmul.mubr.bf16.gmra.mrb[4].mxu0 %v2616_v60  ;;  %v7857_v60 = vld [vmem:[#allocation8 + $0x4] ss:$8 sps:$4 sm:$0xff]  }
 0x27a   : > { %3104 = vmatpush1.bf16.msra.mxu0 %v7765_v57  ;;  %2867 = vmatprep.mubr.bf16.mxu0 %v2619_v23 }
 0x27b   : > { %3105 = vmatprep.subr.bf16.mxu0 %v7770_v37 }
 0x27e   : > { %3106 = vmatpush1.bf16.msra.mxu0 %v7768_v28 }
 0x27f   : > { %3107 = vmatprep.subr.bf16.mxu0 %v7773_v59 }
 0x281   : > { %2868 = vmatmul.mubr.bf16.gmra.mrb[8].mxu0 %v2618_v1 }
 0x282   : > { %3108 = vmatpush1.bf16.msra.mxu0 %v7771_v16  ;;  %2877 = vmatprep.mubr.bf16.mxu0 %v2621_v40 }
 0x283   : > { %3109 = vmatprep.subr.bf16.mxu0 %v7776_v3 }
 0x286   : > { %3110 = vmatpush1.bf16.msra.mxu0 %v7774_v44 }
 0x287   : > { %3111 = vmatprep.subr.bf16.mxu0 %v7779_v7 }
 0x289   : > { %2878 = vmatmul.mubr.bf16.gmra.mrb[12].mxu0 %v2620_v32 }
 0x28a   : > { %3112 = vmatpush1.bf16.msra.mxu0 %v7777_v22  ;;  %3131 = vmatprep.mubr.bf16.mxu0 %v9075_v51  ;;  %v7795_v51 = vld [vmem:[#allocation6 + $0x8c0] ss:$8 sps:$4 sm:$0xff]  }
 0x28b   : > { %3113 = vmatprep.subr.bf16.mxu0 %v7782_v5 }
 0x28e   : > { %3114 = vmatpush1.bf16.msra.mxu0 %v7780_v33 }
 0x28f   : > { %3115 = vmatprep.subr.bf16.mxu0 %v7785_v25 }
 0x292   : > { %3116 = vmatpush1.bf16.msra.mxu0 %v7783_v17 }
 0x293   : > { %3117 = vmatprep.subr.bf16.mxu0 %v7788_v48 }
 0x296   : > { %3118 = vmatpush1.bf16.msra.mxu0 %v7786_v2 }
 0x297   : > { %3119 = vmatprep.subr.bf16.mxu0 %v7791_v49 }
 0x29a   : > { %3120 = vmatpush1.bf16.msra.mxu0 %v7789_v19 }
 0x29b   : > { %3121 = vmatprep.subr.bf16.mxu0 %v7794_v34 }
 0x29e   : > { %3122 = vmatpush1.bf16.msra.mxu0 %v7792_v21 }
 0x29f   : > { %3123 = vmatprep.subr.bf16.mxu0 %v7797_v61 }
 0x2a2   : > { %3124 = vmatpush1.bf16.msra.mxu0 %v7795_v51 }
 0x2a3   : > { %3125 = vmatprep.subr.bf16.mxu0 %v7800_v6 }
 0x2a6   : > { %3126 = vmatpush1.bf16.msra.mxu0 %v7798_v24 }
 0x2a7   : > { %3127 = vmatprep.subr.bf16.mxu0 %v7803_v55 }
 0x2aa   : > { %3128 = vmatpush1.bf16.msra.mxu0 %v7801_v63 }
 0x2ab   : > { %3129 = vmatprep.subr.bf16.mxu0 %v7806_v10 }
 0x2ae   : > { %3130 = vmatpush1.bf16.msra.mxu0 %v7804_v14 }
 0x2b1   : > { %3132 = vmatmul.mubr.bf16.vlgmr.msra.gmra.mrb[0].mxu0 %v9099_v45  ;;  %v7810_v45 = vld [vmem:[#allocation8 + $0x314] ss:$8 sps:$4 sm:$0xff]  }
 0x2b2   : > { %3141 = vmatprep.mubr.bf16.mxu0 %v9104_v46  ;;  %v7812_v46 = vld [vmem:[#allocation8 + $0x310] ss:$8 sps:$4 sm:$0xff]   ;;  %3681 = vmatprep.subr.bf16.mxu1 %v7810_v45 }
 0x2b3   : > { %3682 = vmatpush1.bf16.msra.mxu1 %v7812_v46 }
 0x2b9   : > { %3142 = vmatmul.mubr.bf16.gmra.mrb[4].mxu0 %v9129_v12  ;;  %v7813_v12 = vld [vmem:[#allocation8 + $0x324] ss:$8 sps:$4 sm:$0xff]  }
 0x2ba   : > { %3151 = vmatprep.mubr.bf16.mxu0 %v9134_v38  ;;  %v7815_v38 = vld [vmem:[#allocation8 + $0x320] ss:$8 sps:$4 sm:$0xff]   ;;  %3683 = vmatprep.subr.bf16.mxu1 %v7813_v12 }
 0x2bb   : > { %3684 = vmatpush1.bf16.msra.mxu1 %v7815_v38 }
 0x2c1   : > { %3152 = vmatmul.mubr.bf16.gmra.mrb[8].mxu0 %v9169_v39  ;;  %v7816_v39 = vld [vmem:[#allocation8 + $0x334] ss:$8 sps:$4 sm:$0xff]  }
 0x2c2   : > { %3161 = vmatprep.mubr.bf16.mxu0 %v2905_v58  ;;  %3685 = vmatprep.subr.bf16.mxu1 %v7816_v39  ;;  %v7824_v58 = vld [vmem:[#allocation8 + $0x350] ss:$8 sps:$4 sm:$0xff]  }
 0x2c3   : > { %3686 = vmatpush1.bf16.msra.mxu1 %v7818_v9 }
 0x2c4   : > { %3687 = vmatprep.subr.bf16.mxu1 %v7819_v56 }
 0x2c7   : > { %3688 = vmatpush1.bf16.msra.mxu1 %v7821_v0 }
 0x2c8   : > { %3689 = vmatprep.subr.bf16.mxu1 %v7822_v4 }
 0x2c9   : > { %3162 = vmatmul.mubr.bf16.gmra.mrb[12].mxu0 %v2904_v50  ;;  %v7827_v50 = vld [vmem:[#allocation8 + $0x360] ss:$8 sps:$4 sm:$0xff]  }
 0x2cb   : > { %3690 = vmatpush1.bf16.msra.mxu1 %v7824_v58 }
 0x2cc   : > { %3691 = vmatprep.subr.bf16.mxu1 %v7825_v43 }
 0x2cf   : > { %3692 = vmatpush1.bf16.msra.mxu1 %v7827_v50 }
 0x2d0   : > { %3693 = vmatprep.subr.bf16.mxu1 %v7828_v62 }
 0x2d3   : > { %3694 = vmatpush1.bf16.msra.mxu1 %v7830_v54 }
 0x2d4   : > { %3695 = vmatprep.subr.bf16.mxu1 %v7831_v18 }
 0x2d7   : > { %3696 = vmatpush1.bf16.msra.mxu1 %v7833_v26 }
 0x2d8   : > { %3697 = vmatprep.subr.bf16.mxu1 %v7834_v13 }
 0x2db   : > { %3698 = vmatpush1.bf16.msra.mxu1 %v7836_v36 }
 0x2dc   : > { %3699 = vmatprep.subr.bf16.mxu1 %v7837_v35 }
 0x2df   : > { %3700 = vmatpush1.bf16.msra.mxu1 %v7839_v20 }
 0x2e0   : > { %3701 = vmatprep.subr.bf16.mxu1 %v7840_v31 }
 0x2e3   : > { %3702 = vmatpush1.bf16.msra.mxu1 %v7842_v11 }
 0x2e4   : > { %3703 = vmatprep.subr.bf16.mxu1 %v7843_v41 }
 0x2e7   : > { %3704 = vmatpush1.bf16.msra.mxu1 %v7845_v52 }
 0x2e8   : > { %3705 = vmatprep.subr.bf16.mxu1 %v7846_v29 }
 0x2eb   : > { %3706 = vmatpush1.bf16.msra.mxu1 %v7848_v27 }
 0x2ec   : > { %3707 = vmatprep.subr.bf16.mxu1 %v7849_v42 }
 0x2ef   : > { %3708 = vmatpush1.bf16.msra.mxu1 %v7851_v15 }
 0x2f0   : > { %3709 = vmatprep.subr.bf16.mxu1 %v7852_v53 }
 0x2f3   : > { %3710 = vmatpush1.bf16.msra.mxu1 %v7854_v8 }
 0x2f4   : > { %3912 = vmatprep.subr.bf16.mxu1 %v7857_v60 }
 0x384   : > { %v9202_v57 = vpop.f32.mrb[0].mxu0 }
 0x385   : > { %v9204_v23 = vpop.f32.mrb[1].mxu0  ;;  %v3214_v28 = vmul.f32 %v9202_v57, %v9202_v57 }
 0x386   : > { %v9206_v37 = vpop.f32.mrb[2].mxu0  ;;  %v3215_v40 = vmul.f32 %v9204_v23, %v9204_v23 }
 0x387   : > { %v3188_v59 = vadd.f32 %v9206_v37, %v9202_v57  ;;  %v3216_v1 = vmul.f32 %v9206_v37, %v9206_v37  ;;  %v9214_v16 = vpop.f32.mrb[3].mxu0 }
 0x388   : > { %v3201_v3 = vadd.f32 %v9214_v16, %v9204_v23  ;;  %v3217_v44 = vmul.f32 %v9214_v16, %v9214_v16 }
 0x389   : > { %v3230_v7 = vadd.f32 %v3216_v1, %v3214_v28 }
 0x38a   : > { %v3243_v32 = vadd.f32 %v3217_v44, %v3215_v40 }
 0x38c   : > { %v9222_v22 = vpop.f32.mrb[4].mxu0 }
 0x38d   : > { %v3189_v5 = vadd.f32 %v3188_v59, %v9222_v22  ;;  %v3218_v33 = vmul.f32 %v9222_v22, %v9222_v22  ;;  %v9227_v25 = vpop.f32.mrb[5].mxu0 }
 0x38e   : > { %v3202_v17 = vadd.f32 %v3201_v3, %v9227_v25  ;;  %v3219_v48 = vmul.f32 %v9227_v25, %v9227_v25  ;;  %v9232_v2 = vpop.f32.mrb[6].mxu0 }
 0x38f   : > { %v3231_v49 = vadd.f32 %v3230_v7, %v3218_v33  ;;  %v3190_v19 = vadd.f32 %v3189_v5, %v9232_v2  ;;  %v3220_v34 = vmul.f32 %v9232_v2, %v9232_v2  ;;  %v9237_v21 = vpop.f32.mrb[7].mxu0 }
 0x390   : > { %v3244_v61 = vadd.f32 %v3243_v32, %v3219_v48  ;;  %v3203_v51 = vadd.f32 %v3202_v17, %v9237_v21  ;;  %v3221_v6 = vmul.f32 %v9237_v21, %v9237_v21 }
 0x391   : > { %v3232_v24 = vadd.f32 %v3231_v49, %v3220_v34 }
 0x392   : > { %v3245_v55 = vadd.f32 %v3244_v61, %v3221_v6 }
 0x394   : > { %v9242_v63 = vpop.f32.mrb[8].mxu0 }
 0x395   : > { %v3191_v10 = vadd.f32 %v3190_v19, %v9242_v63  ;;  %v3222_v14 = vmul.f32 %v9242_v63, %v9242_v63  ;;  %v9247_v47 = vpop.f32.mrb[9].mxu0 }
 0x396   : > { %v3204_v30 = vadd.f32 %v3203_v51, %v9247_v47  ;;  %v3223_v45 = vmul.f32 %v9247_v47, %v9247_v47  ;;  %v9252_v46 = vpop.f32.mrb[10].mxu0 }
 0x397   : > { %v3233_v12 = vadd.f32 %v3232_v24, %v3222_v14  ;;  %v3192_v38 = vadd.f32 %v3191_v10, %v9252_v46  ;;  %v3224_v39 = vmul.f32 %v9252_v46, %v9252_v46  ;;  %v9257_v9 = vpop.f32.mrb[11].mxu0 }
 0x398   : > { %v3246_v56 = vadd.f32 %v3245_v55, %v3223_v45  ;;  %v3205_v0 = vadd.f32 %v3204_v30, %v9257_v9  ;;  %v3225_v4 = vmul.f32 %v9257_v9, %v9257_v9 }
 0x399   : > { %v3234_v58 = vadd.f32 %v3233_v12, %v3224_v39 }
 0x39a   : > { %v3247_v43 = vadd.f32 %v3246_v56, %v3225_v4 }
 0x39c   : > { %v9262_v50 = vpop.f32.mrb[12].mxu0 }
 0x39d   : > { %v3193_v62 = vadd.f32 %v3192_v38, %v9262_v50  ;;  %v3226_v54 = vmul.f32 %v9262_v50, %v9262_v50  ;;  %v9267_v18 = vpop.f32.mrb[13].mxu0 }
 0x39e   : > { %v3206_v26 = vadd.f32 %v3205_v0, %v9267_v18  ;;  %v3227_v13 = vmul.f32 %v9267_v18, %v9267_v18  ;;  %v9272_v36 = vpop.f32.mrb[14].mxu0 }
 0x39f   : > { %v3235_v35 = vadd.f32 %v3234_v58, %v3226_v54  ;;  %v3194_v20 = vadd.f32 %v3193_v62, %v9272_v36  ;;  %v3228_v31 = vmul.f32 %v9272_v36, %v9272_v36  ;;  %v9277_v11 = vpop.f32.mrb[15].mxu0 }
 0x3a0   : > { %v3248_v41 = vadd.f32 %v3247_v43, %v3227_v13  ;;  %v3207_v52 = vadd.f32 %v3206_v26, %v9277_v11  ;;  %v3229_v29 = vmul.f32 %v9277_v11, %v9277_v11 }
 0x3a1   : > { %v3195_v27 = vrot.slane %v3194_v20, 4  ;;  %v3236_v42 = vadd.f32 %v3235_v35, %v3228_v31 }
 0x3a2   : > { %v3208_v15 = vrot.slane %v3207_v52, 4  ;;  %v3249_v53 = vadd.f32 %v3248_v41, %v3229_v29 }
 0x3a3   : > { %v3196_v8 = vadd.f32 %v3195_v27, %v3194_v20  ;;  %v3237_v60 = vrot.slane %v3236_v42, 4  ;;  %v9310_v20 = vld [vmem:[#allocation2] sm:$0xff] }
 0x3a4   : > { %v3209_v28 = vadd.f32 %v3208_v15, %v3207_v52  ;;  %v3250_v59 = vrot.slane %v3249_v53, 4  ;;  %v5253_v31 = vrot.slane %v9310_v20, 2 }
 0x3a5   : > { %v3197_v1 = vrot.slane %v3196_v8, 2  ;;  %v3238_v40 = vadd.f32 %v3237_v60, %v3236_v42 }
 0x3a6   : > { %v3210_v3 = vrot.slane %v3209_v28, 2  ;;  %v3251_v44 = vadd.f32 %v3250_v59, %v3249_v53 }
 0x3a7   : > { %v3198_v7 = vadd.f32 %v3197_v1, %v3196_v8  ;;  %v3239_v32 = vrot.slane %v3238_v40, 2 }
 0x3a8   : > { %v3211_v5 = vadd.f32 %v3210_v3, %v3209_v28  ;;  %v3252_v33 = vrot.slane %v3251_v44, 2 }
 0x3a9   : > { %v3199_v17 = vrot.slane %v3198_v7, 1  ;;  %v3240_v48 = vadd.f32 %v3239_v32, %v3238_v40 }
 0x3aa   : > { %v3212_v49 = vrot.slane %v3211_v5, 1  ;;  %v3253_v19 = vadd.f32 %v3252_v33, %v3251_v44 }
 0x3ab   : > { %v3200_v34 = vadd.f32 %v3199_v17, %v3198_v7  ;;  %v3241_v61 = vrot.slane %v3240_v48, 1 }
 0x3ac   : > { %v3213_v51 = vadd.f32 %v3212_v49, %v3211_v5  ;;  %v3254_v6 = vrot.slane %v3253_v19, 1 }
 0x3ad   : > { %v3242_v24 = vadd.f32 %v3241_v61, %v3240_v48  ;;  %v3256_v55 = vmul.f32 0.015625, %v3200_v34 }
 0x3ae   : > { %v3255_v10 = vadd.f32 %v3254_v6, %v3253_v19  ;;  %v9282_v14 = vmul.f32 0.015625, %v3213_v51 }
 0x3af   : > { %v3258_v30 = vmul.f32 0.015625, %v3242_v24  ;;  %v3260_v45 = vmul.f32 %v3256_v55, %v3256_v55  ;;  %v3266_v12 = vsub.f32 %v9202_v57, %v3256_v55  ;;  %v3268_v38 = vsub.f32 %v9206_v37, %v3256_v55 }
 0x3b0   : > { %v3270_v39 = vsub.f32 %v9222_v22, %v3256_v55  ;;  %v3272_v56 = vsub.f32 %v9232_v2, %v3256_v55  ;;  %v3274_v0 = vsub.f32 %v9242_v63, %v3256_v55  ;;  %v3276_v4 = vsub.f32 %v9252_v46, %v3256_v55 }
 0x3b1   : > { %v3262_v58 = vsub.f32 %v3258_v30, %v3260_v45  ;;  %v3278_v43 = vsub.f32 %v9262_v50, %v3256_v55  ;;  %v3280_v62 = vsub.f32 %v9272_v36, %v3256_v55  ;;  %v3259_v54 = vmul.f32 0.015625, %v3255_v10  ;;  %v9319_v30 = vld [vmem:[#allocation2 + $0x10] sm:$0x3] }
 0x3b2   : > { %v3261_v26 = vmul.f32 %v9282_v14, %v9282_v14  ;;  %v3271_v57 = vsub.f32 %v9227_v25, %v9282_v14  ;;  %v3273_v37 = vsub.f32 %v9237_v21, %v9282_v14  ;;  %v3275_v22 = vsub.f32 %v9247_v47, %v9282_v14  ;;  %10090 = vst [vmem:[#allocation15_spill] sm:$0xff] %v9319_v30 }
 0x3b3   : > { %v3264_v2 = vmax.f32 %v3262_v58, 0.0  ;;  %v3277_v63 = vsub.f32 %v9257_v9, %v9282_v14  ;;  %v3279_v46 = vsub.f32 %v9267_v18, %v9282_v14  ;;  %v3281_v50 = vsub.f32 %v9277_v11, %v9282_v14 }
 0x3b4   : > { %v3263_v13 = vsub.f32 %v3259_v54, %v3261_v26  ;;  %v3267_v25 = vsub.f32 %v9204_v23, %v9282_v14  ;;  %v3269_v21 = vsub.f32 %v9214_v16, %v9282_v14  ;;  %v9331_v54 = vld [vmem:[#allocation2 + $0x18] sm:$0x3] }
 0x3b5   : > { %v3282_v36 = vadd.f32 1e-05, %v3264_v2  ;;  %10092 = vst [vmem:[#allocation16_spill] sm:$0xff] %v9331_v54  ;;  %v5254_v2 = vrot.slane %v9319_v30, 2 }
 0x3b6   : > { %v3265_v35 = vmax.f32 %v3263_v13, 0.0 }
 0x3b7   : > { %8239 = vrsqrt.f32 %v3282_v36 }
 0x3b8   : > { %v3283_v47 = vadd.f32 1e-05, %v3265_v35 }
 0x3ba   : > { %8241 = vrsqrt.f32 %v3283_v47 }
 0x3c1   : > { %v8240_v9 = vpop.eup %8239 }
 0x3c2   : > { %v3300_v41 = vmul.f32 %v8240_v9, %v3280_v62  ;;  %v3286_v52 = vmul.f32 %v8240_v9, %v3266_v12  ;;  %v3288_v11 = vmul.f32 %v8240_v9, %v3268_v38  ;;  %v3290_v29 = vmul.f32 %v8240_v9, %v3270_v39  ;;  %v9329_v62 = vld [vmem:[#allocation2 + $0x128] sm:$0xff] }
 0x3c3   : > { %v3292_v27 = vmul.f32 %v8240_v9, %v3272_v56  ;;  %v9313_v42 = vmul.f32 %v8240_v9, %v3274_v0  ;;  %v9315_v23 = vmul.f32 %v8240_v9, %v3276_v4  ;;  %v9317_v16 = vmul.f32 %v8240_v9, %v3278_v43  ;;  %v9321_v56 = vld [vmem:[#allocation2 + $0x8] sm:$0xff]  ;;  %10091 = vst [vmem:[#allocation13_spill] sm:$0xff] %v9329_v62 }
 0x3c4   : > { %v8242_v15 = vpop.eup %8241  ;;  %v3316_v53 = vmax.f32 %v3300_v41, 0.0  ;;  %v3302_v8 = vmax.f32 %v3286_v52, 0.0  ;;  %v3304_v60 = vmax.f32 %v3288_v11, 0.0  ;;  %v3306_v28 = vmax.f32 %v3290_v29, 0.0  ;;  %v7855_v29 = vld [vmem:[#allocation8] ss:$8 sps:$4 sm:$0xff]  }
 0x3c5   : > { %v3301_v59 = vmul.f32 %v8242_v15, %v3281_v50  ;;  %v3287_v1 = vmul.f32 %v8242_v15, %v3267_v25  ;;  %v3289_v40 = vmul.f32 %v8242_v15, %v3269_v21  ;;  %v3291_v3 = vmul.f32 %v8242_v15, %v3271_v57  ;;  %v3437_v50 = vld [vmem:[#allocation2 + $0x138] sm:$0x3] }
 0x3c6   : > { %v3348_v44 = vrot.slane %v3316_v53, 7  ;;  %v3334_v7 = vrot.slane %v3302_v8, 7  ;;  %v3336_v32 = vrot.slane %v3304_v60, 7  ;;  %v3293_v5 = vmul.f32 %v8242_v15, %v3273_v37  ;;  %v9333_v37 = vld [vmem:[#allocation2 + $0x120] sm:$0xff] }
 0x3c7   : > { %v3317_v33 = vmax.f32 %v3301_v59, 0.0  ;;  %v3303_v17 = vmax.f32 %v3287_v1, 0.0  ;;  %v3305_v48 = vmax.f32 %v3289_v40, 0.0  ;;  %v3307_v49 = vmax.f32 %v3291_v3, 0.0 }
 0x3c8   : > { %3394 = vst [vmem:[#allocation2 + $0x100] sm:$0xfe] %v3348_v44  ;;  %3396 = vst [vmem:[#allocation2 + $0x110] sm:$0x1] %v3348_v44  ;;  %v3309_v19 = vmax.f32 %v3293_v5, 0.0  ;;  %v3308_v34 = vmax.f32 %v3292_v27, 0.0  ;;  %v3295_v51 = vmul.f32 %v8242_v15, %v3275_v22  ;;  %v3297_v38 = vmul.f32 %v8242_v15, %v3277_v63 }
 0x3c9   : > { %3366 = vst [vmem:[#allocation2 + $0x20] sm:$0xfe] %v3334_v7  ;;  %3370 = vst [vmem:[#allocation2 + $0x40] sm:$0xfe] %v3336_v32  ;;  %v3338_v61 = vrot.slane %v3306_v28, 7  ;;  %v3349_v6 = vrot.slane %v3317_v33, 7  ;;  %v3299_v58 = vmul.f32 %v8242_v15, %v3279_v46  ;;  %v9357_v15 = vsel %vm2243_vm2, %v5253_v31, %v5254_v2 }
 0x3ca   : > { %3368 = vst [vmem:[#allocation2 + $0x30] sm:$0x1] %v3334_v7  ;;  %3372 = vst [vmem:[#allocation2 + $0x50] sm:$0x1] %v3336_v32  ;;  %v3335_v24 = vrot.slane %v3303_v17, 7  ;;  %v3337_v55 = vrot.slane %v3305_v48, 7 }
 0x3cb   : > { %v3339_v10 = vrot.slane %v3307_v49, 7  ;;  %v3341_v45 = vrot.slane %v3309_v19, 7  ;;  %v3340_v12 = vrot.slane %v3308_v34, 7  ;;  %3374 = vst [vmem:[#allocation2 + $0x60] sm:$0xfe] %v3338_v61  ;;  %v3311_v39 = vmax.f32 %v3295_v51, 0.0 }
 0x3cc   : > { %3376 = vst [vmem:[#allocation2 + $0x70] sm:$0x1] %v3338_v61  ;;  %3395 = vst [vmem:[#allocation2 + $0x108] sm:$0xfe] %v3349_v6  ;;  %v3310_v0 = vmax.f32 %v9313_v42, 0.0  ;;  %v3312_v4 = vmax.f32 %v9315_v23, 0.0 }
 0x3cd   : > { %3397 = vst [vmem:[#allocation2 + $0x118] sm:$0x1] %v3349_v6  ;;  %3367 = vst [vmem:[#allocation2 + $0x28] sm:$0xfe] %v3335_v24  ;;  %v3314_v43 = vmax.f32 %v9317_v16, 0.0  ;;  %v3313_v26 = vmax.f32 %v3297_v38, 0.0 }
 0x3ce   : > { %3371 = vst [vmem:[#allocation2 + $0x48] sm:$0xfe] %v3337_v55  ;;  %3369 = vst [vmem:[#allocation2 + $0x38] sm:$0x1] %v3335_v24  ;;  %v3343_v57 = vrot.slane %v3311_v39, 7  ;;  %v3342_v18 = vrot.slane %v3310_v0, 7 }
 0x3cf   : > { %3373 = vst [vmem:[#allocation2 + $0x58] sm:$0x1] %v3337_v55  ;;  %3375 = vst [vmem:[#allocation2 + $0x68] sm:$0xfe] %v3339_v10  ;;  %v9335_v22 = vld [vmem:[#allocation2 + $0x130] sm:$0x3] }
 0x3d0   : > { %3377 = vst [vmem:[#allocation2 + $0x78] sm:$0x1] %v3339_v10  ;;  %3379 = vst [vmem:[#allocation2 + $0x88] sm:$0xfe] %v3341_v45  ;;  %v3344_v14 = vrot.slane %v3312_v4, 7  ;;  %v3315_v63 = vmax.f32 %v3299_v58, 0.0 }
 0x3d1   : > { %3381 = vst [vmem:[#allocation2 + $0x98] sm:$0x1] %v3341_v45  ;;  %3378 = vst [vmem:[#allocation2 + $0x80] sm:$0xfe] %v3340_v12  ;;  %v3346_v46 = vrot.slane %v3314_v43, 7  ;;  %v3345_v13 = vrot.slane %v3313_v26, 7 }
 0x3d2   : > { %3380 = vst [vmem:[#allocation2 + $0x90] sm:$0x1] %v3340_v12  ;;  %3383 = vst [vmem:[#allocation2 + $0xa8] sm:$0xfe] %v3343_v57  ;;  %v9338_v25 = vld [vmem:[#allocation2 + $0x20] sm:$0xff]  ;;  %v3347_v36 = vrot.slane %v3315_v63, 7 }
 0x3d3   : > { %3385 = vst [vmem:[#allocation2 + $0xb8] sm:$0x1] %v3343_v57  ;;  %v9340_v21 = vld [vmem:[#allocation2 + $0x40] sm:$0xff]  ;;  %3382 = vst [vmem:[#allocation2 + $0xa0] sm:$0xfe] %v3342_v18  ;;  %v5256_v35 = vrot.slane %v9321_v56, 2 }
 0x3d4   : > { %3386 = vst [vmem:[#allocation2 + $0xc0] sm:$0xfe] %v3344_v14  ;;  %3384 = vst [vmem:[#allocation2 + $0xb0] sm:$0x1] %v3342_v18  ;;  %v5310_v47 = vrot.slane %v9329_v62, 2  ;;  %v5257_v41 = vrot.slane %v9331_v54, 2  ;;  %v3478_v17 = vpack.c.bf16 %v9340_v21, %v9338_v25 }
 0x3d5   : > { %3388 = vst [vmem:[#allocation2 + $0xd0] sm:$0x1] %v3344_v14  ;;  %3390 = vst [vmem:[#allocation2 + $0xe0] sm:$0xfe] %v3346_v46  ;;  %v5311_v52 = vrot.slane %v3437_v50, 2  ;;  %v4315_v27 = vrot.slane %v9338_v25, 1 }
 0x3d6   : > { %3392 = vst [vmem:[#allocation2 + $0xf0] sm:$0x1] %v3346_v46  ;;  %3387 = vst [vmem:[#allocation2 + $0xc8] sm:$0xfe] %v3345_v13  ;;  %v9348_v42 = vld [vmem:[#allocation2 + $0x60] sm:$0xff]  ;;  %v9359_v53 = vld [vmem:[#allocation2 + $0x28] sm:$0xff]  ;;  %v9389_v34 = vsel %vm2243_vm2, %v5256_v35, %v5257_v41 }
 0x3d7   : > { %3389 = vst [vmem:[#allocation2 + $0xd8] sm:$0x1] %v3345_v13  ;;  %3391 = vst [vmem:[#allocation2 + $0xe8] sm:$0xfe] %v3347_v36  ;;  %v9350_v23 = vld [vmem:[#allocation2 + $0x30] sm:$0x3]  ;;  %v9368_v59 = vpack.c.bf16 %v9348_v42, %v9340_v21  ;;  %v9392_v61 = vsel %vm2243_vm2, %v5310_v47, %v5311_v52 }
 0x3d8   : > { %3393 = vst [vmem:[#allocation2 + $0xf8] sm:$0x1] %v3347_v36  ;;  %v9352_v16 = vld [vmem:[#allocation2 + $0x50] sm:$0x3]  ;;  %v9361_v8 = vld [vmem:[#allocation2 + $0x48] sm:$0xff]  ;;  %v4316_v1 = vrot.slane %v9350_v23, 1 }
 0x3d9   : > { %v9364_v28 = vld [vmem:[#allocation2 + $0x68] sm:$0xff]  ;;  %v4321_v40 = vrot.slane %v9340_v21, 1  ;;  %v3479_v31 = vpack.c.bf16 %v9361_v8, %v9359_v53  ;;  %v4318_v3 = vrot.slane %v9359_v53, 1  ;;  %v7860_v7 = vld [vmem:[#allocation8 + $0x14] ss:$8 sps:$4 sm:$0xff]   ;;  %v4322_v32 = vrot.slane %v9352_v16, 1 }
 0x3da   : > { %v9375_v44 = vld [vmem:[#allocation2 + $0x88] sm:$0xff]  ;;  %v4327_v5 = vrot.slane %v9348_v42, 1  ;;  %v4324_v33 = vrot.slane %v9361_v8, 1  ;;  %v9382_v48 = vld [vmem:[#allocation2 + $0x80] sm:$0xff]  ;;  %v9384_v49 = vld [vmem:[#allocation2 + $0x38] sm:$0x3]  ;;  %v9403_v10 = vpack.c.bf16 %v9364_v28, %v9361_v8  ;;  %v9430_v63 = vsel %vm1298_vm1, %v4315_v27, %v4316_v1 }
 0x3db   : > { %v9386_v19 = vld [vmem:[#allocation2 + $0x58] sm:$0x3]  ;;  %3711 = vmatprep.mubr.bf16.mxu1 %v3479_v31  ;;  %v3481_v6 = vpack.c.bf16 %v9375_v44, %v9364_v28  ;;  %v9397_v24 = vld [vmem:[#allocation2 + $0xa8] sm:$0xff]  ;;  %v4319_v45 = vrot.slane %v9384_v49, 1  ;;  %v9409_v39 = vld [vmem:[#allocation2 + $0xa0] sm:$0xff]  ;;  %v4330_v26 = vrot.slane %v9364_v28, 1  ;;  %v3480_v2 = vpack.c.bf16 %v9382_v48, %v9348_v42 }
 0x3dc   : > { %v9399_v55 = vld [vmem:[#allocation2 + $0x108] sm:$0xff]  ;;  %v9406_v12 = vld [vmem:[#allocation2 + $0x78] sm:$0x3]  ;;  %3712 = vmatmul.mubr.bf16.vlgmr.msra.gmra.mrb[0].mxu1 %v3478_v17  ;;  %v9411_v0 = vld [vmem:[#allocation2 + $0xc0] sm:$0xff]  ;;  %v9417_v58 = vpack.c.bf16 %v9397_v24, %v9375_v44  ;;  %v4325_v43 = vrot.slane %v9386_v19, 1  ;;  %v9427_v14 = vpack.c.bf16 %v9409_v39, %v9382_v48  ;;  %10093 = vst [vmem:[#allocation14_spill] sm:$0xff] %v9430_v63  ;;  %v9471_v11 = vsel %vm1298_vm1, %v4321_v40, %v4322_v32 }
 0x3dd   : > { %v9413_v4 = vld [vmem:[#allocation2 + $0xe0] sm:$0xff]  ;;  %3913 = vmatpush1.bf16.msra.mxu1 %v7855_v29  ;;  %3721 = vmatprep.mubr.bf16.mxu1 %v3481_v6  ;;  %v7858_v57 = vld [vmem:[#allocation8 + $0x10] ss:$8 sps:$4 sm:$0xff]   ;;  %v9423_v18 = vld [vmem:[#allocation2 + $0xc8] sm:$0xff]  ;;  %v4331_v46 = vrot.slane %v9406_v12, 1  ;;  %v9455_v31 = vsel %vm1298_vm1, %v4318_v3, %v4319_v45  ;;  %10100 = vst [vmem:[#allocation23_spill] sm:$0xff] %v9471_v11 }
 0x3de   : > { %v9433_v50 = vld [vmem:[#allocation2 + $0x70] sm:$0x3]  ;;  %3914 = vmatprep.subr.bf16.mxu1 %v7860_v7  ;;  %v7863_v13 = vld [vmem:[#allocation8 + $0x24] ss:$8 sps:$4 sm:$0xff]   ;;  %v3483_v36 = vpack.c.bf16 %v9423_v18, %v9397_v24  ;;  %v9443_v41 = vpack.c.bf16 %v9413_v4, %v9411_v0  ;;  %v9446_v52 = vsel %vm1298_vm1, %v4324_v33, %v4325_v43  ;;  %v7861_v29 = vld [vmem:[#allocation8 + $0x20] ss:$8 sps:$4 sm:$0xff]  }
 0x3df   : > { %v9439_v47 = vld [vmem:[#allocation2 + $0xe8] sm:$0xff]  ;;  %10095 = vst [vmem:[#allocation18_spill] sm:$0xff] %v9446_v52  ;;  %10097 = vst [vmem:[#allocation20_spill] sm:$0xff] %v9455_v31  ;;  %v9458_v7 = vsel %vm1298_vm1, %v4330_v26, %v4331_v46  ;;  %v9460_v17 = vld [vmem:[#allocation2 + $0x98] sm:$0x3]  ;;  %v4328_v3 = vrot.slane %v9433_v50, 1 }
 0x3e0   : > { %10094 = vst [vmem:[#allocation17_spill] sm:$0xff] %v9443_v41  ;;  %v9452_v1 = vpack.c.bf16 %v9439_v47, %v9423_v18  ;;  %10098 = vst [vmem:[#allocation21_spill] sm:$0xff] %v9458_v7  ;;  %v9462_v6 = vld [vmem:[#allocation2 + $0xb8] sm:$0x3]  ;;  %v9464_v33 = vld [vmem:[#allocation2 + $0x90] sm:$0x3]  ;;  %v9468_v9 = vpack.c.bf16 %v9458_v7, %v9446_v52 }
 0x3e1   : > { %v7866_v43 = vld [vmem:[#allocation8 + $0x34] ss:$8 sps:$4 sm:$0xff]   ;;  %v4336_v45 = vrot.slane %v9375_v44, 1  ;;  %v9475_v26 = vld [vmem:[#allocation2 + $0xb0] sm:$0x3]  ;;  %3915 = vmatpush1.bf16.msra.mxu1 %v7858_v57  ;;  %v4337_v38 = vrot.slane %v9460_v17, 1  ;;  %v9485_v40 = vsel %vm1298_vm1, %v4327_v5, %v4328_v3 }
 0x3e2   : > { %10096 = vst [vmem:[#allocation19_spill] sm:$0xff] %v9452_v1  ;;  %10099 = vst [vmem:[#allocation22_spill] sm:$0xff] %v9468_v9  ;;  %v4342_v60 = vrot.slane %v9397_v24, 1  ;;  %v4343_v27 = vrot.slane %v9462_v6, 1  ;;  %v9482_v51 = vld [vmem:[#allocation2 + $0xd8] sm:$0x3]  ;;  %3916 = vmatprep.subr.bf16.mxu1 %v7863_v13  ;;  %v9494_v46 = vpack.c.bf16 %v9485_v40, %v9471_v11 }
 0x3e3   : > { %v4333_v32 = vrot.slane %v9382_v48, 1  ;;  %v4334_v35 = vrot.slane %v9464_v33, 1  ;;  %v4339_v57 = vrot.slane %v9409_v39, 1  ;;  %v9490_v9 = vld [vmem:[#allocation2 + $0xf8] sm:$0x3]  ;;  %v9497_v63 = vsel %vm1298_vm1, %v4336_v45, %v4337_v38  ;;  %v9534_v62 = vld [vmem:[#allocation2 + $0x100] sm:$0xff] }
 0x3e4   : > { %10101 = vst [vmem:[#allocation24_spill] sm:$0xff] %v9494_v46  ;;  %10102 = vst [vmem:[#allocation25_spill] sm:$0xff] %v9497_v63  ;;  %v9500_v13 = vsel %vm1298_vm1, %v4342_v60, %v4343_v27  ;;  %v4340_v5 = vrot.slane %v9475_v26, 1  ;;  %v9503_v3 = vld [vmem:[#allocation2 + $0xd0] sm:$0x3]  ;;  %3722 = vmatmul.mubr.bf16.gmra.mrb[4].mxu1 %v3480_v2  ;;  %v4348_v11 = vrot.slane %v9423_v18, 1 }
 0x3e5   : > { %10103 = vst [vmem:[#allocation26_spill] sm:$0xff] %v9500_v13  ;;  %v9507_v30 = vpack.c.bf16 %v9500_v13, %v9497_v63  ;;  %v9510_v54 = vsel %vm1298_vm1, %v4333_v32, %v4334_v35  ;;  %v4349_v38 = vrot.slane %v9482_v51, 1  ;;  %v9514_v45 = vld [vmem:[#allocation2 + $0xf0] sm:$0x3]  ;;  %3917 = vmatpush1.bf16.msra.mxu1 %v7861_v29  ;;  %3731 = vmatprep.mubr.bf16.mxu1 %v3483_v36  ;;  %v4354_v2 = vrot.slane %v9439_v47, 1 }
 0x3e6   : > { %v7864_v60 = vld [vmem:[#allocation8 + $0x30] ss:$8 sps:$4 sm:$0xff]   ;;  %v9517_v27 = vsel %vm1298_vm1, %v4339_v57, %v4340_v5  ;;  %v4355_v46 = vrot.slane %v9490_v9, 1  ;;  %3918 = vmatprep.subr.bf16.mxu1 %v7866_v43  ;;  %v7869_v32 = vld [vmem:[#allocation8 + $0x44] ss:$8 sps:$4 sm:$0xff]   ;;  %v4345_v36 = vrot.slane %v9411_v0, 1 }
 0x3e7   : > { %10104 = vst [vmem:[#allocation27_spill] sm:$0xff] %v9507_v30  ;;  %10105 = vst [vmem:[#allocation28_spill] sm:$0xff] %v9517_v27  ;;  %v9525_v30 = vpack.c.bf16 %v9517_v27, %v9510_v54  ;;  %v9528_v29 = vsel %vm1298_vm1, %v4348_v11, %v4349_v38  ;;  %v4346_v57 = vrot.slane %v9503_v3, 1  ;;  %v9532_v5 = vld [vmem:[#allocation2 + $0x118] sm:$0x3]  ;;  %v4351_v43 = vrot.slane %v9413_v4, 1 }
 0x3e8   : > { %v9537_v41 = vsel %vm1298_vm1, %v4354_v2, %v4355_v46  ;;  %v4352_v35 = vrot.slane %v9514_v45, 1  ;;  %v9543_v11 = vld [vmem:[#allocation2 + $0x110] sm:$0x3]  ;;  %v7867_v31 = vld [vmem:[#allocation8 + $0x40] ss:$8 sps:$4 sm:$0xff]   ;;  %v4360_v7 = vrot.slane %v9399_v55, 1  ;;  %v10108_v27 = vpack.c.bf16 %v9411_v0, %v9409_v39 }
 0x3e9   : > { %10106 = vst [vmem:[#allocation29_spill] sm:$0xff] %v9525_v30  ;;  %v9547_v38 = vpack.c.bf16 %v9537_v41, %v9528_v29  ;;  %v9550_v30 = vsel %vm1298_vm1, %v4345_v36, %v4346_v57  ;;  %3919 = vmatpush1.bf16.msra.mxu1 %v7864_v60  ;;  %v4361_v63 = vrot.slane %v9532_v5, 1  ;;  %v7872_v36 = vld [vmem:[#allocation8 + $0x54] ss:$8 sps:$4 sm:$0xff]   ;;  %v4357_v2 = vrot.slane %v9534_v62, 1 }
 0x3ea   : > { %10107 = vst [vmem:[#allocation30_spill] sm:$0xff] %v9550_v30  ;;  %v9557_v1 = vsel %vm1298_vm1, %v4351_v43, %v4352_v35  ;;  %3920 = vmatprep.subr.bf16.mxu1 %v7869_v32  ;;  %v4358_v60 = vrot.slane %v9543_v11, 1  ;;  %v5263_v35 = vrot.slane %v9384_v49, 2  ;;  %v5260_v52 = vrot.slane %v9350_v23, 2 }
 0x3eb   : > { %v9565_v57 = vpack.c.bf16 %v9557_v1, %v9550_v30  ;;  %v9571_v43 = vsel %vm1298_vm1, %v4360_v7, %v4361_v63  ;;  %v5269_v46 = vrot.slane %v9386_v19, 2  ;;  %v5274_v32 = vrot.slane %v9364_v28, 2  ;;  %v7870_v19 = vld [vmem:[#allocation8 + $0x50] ss:$8 sps:$4 sm:$0xff]  }
 0x3ec   : > { %3732 = vmatmul.mubr.bf16.gmra.mrb[8].mxu1 %v10108_v27  ;;  %v3439_v30 = vpack.c.bf16 %v9359_v53, %v9321_v56  ;;  %v9584_v49 = vsel %vm1298_vm1, %v4357_v2, %v4358_v60  ;;  %v10109_v63 = vrot.slane %v9359_v53, 2  ;;  %v10110_v28 = vpack.c.bf16 %v9399_v55, %v9439_v47  ;;  %v7875_v60 = vld [vmem:[#allocation8 + $0x64] ss:$8 sps:$4 sm:$0xff]  }
 0x3ed   : > { %3921 = vmatpush1.bf16.msra.mxu1 %v7867_v31  ;;  %v3484_v7 = vpack.c.bf16 %v9534_v62, %v9413_v4  ;;  %v5275_v53 = vrot.slane %v9406_v12, 2  ;;  %v10111_v31 = vrot.slane %v9338_v25, 2  ;;  %v5265_v13 = vrot.slane %v9340_v21, 2 }
 0x3ee   : > { %v9589_v23 = vsel %vm2243_vm2, %v10109_v63, %v5263_v35  ;;  %3741 = vmatprep.mubr.bf16.mxu1 %v10110_v28  ;;  %3922 = vmatprep.subr.bf16.mxu1 %v7872_v36  ;;  %v10112_v63 = vrot.slane %v9361_v8, 2  ;;  %v5266_v27 = vrot.slane %v9352_v16, 2  ;;  %v5271_v36 = vrot.slane %v9348_v42, 2 }
 0x3ef   : > { %v9604_v35 = vsel %vm2243_vm2, %v10111_v31, %v5260_v52  ;;  %v9616_v12 = vsel %vm2243_vm2, %v5274_v32, %v5275_v53  ;;  %v5272_v52 = vrot.slane %v9433_v50, 2  ;;  %v5280_v21 = vrot.slane %v9375_v44, 2  ;;  %v7873_v31 = vld [vmem:[#allocation8 + $0x60] ss:$8 sps:$4 sm:$0xff]  }
 0x3f0   : > { %v9609_v28 = vsel %vm2243_vm2, %v10112_v63, %v5269_v46  ;;  %v5333_v2 = vpack.c.bf16 %v9604_v35, %v9357_v15  ;;  %v9625_v46 = vsel %vm2243_vm2, %v5265_v13, %v5266_v27  ;;  %v5281_v16 = vrot.slane %v9460_v17, 2  ;;  %v7878_v63 = vld [vmem:[#allocation8 + $0x74] ss:$8 sps:$4 sm:$0xff]   ;;  %v8155_v15 = vld [vmem:[#allocation8 + $0x540] ss:$8 sps:$4 sm:$0xff]  }
 0x3f1   : > { %v9622_v8 = vpack.c.bf16 %v9616_v12, %v9609_v28  ;;  %3923 = vmatpush1.bf16.msra.mxu1 %v7870_v19  ;;  %v9630_v32 = vsel %vm2243_vm2, %v5271_v36, %v5272_v52  ;;  %v5623_v42 = vpack.c.bf16 %v9625_v46, %v9604_v35  ;;  %v5286_v50 = vrot.slane %v9397_v24, 2  ;;  %v8200_v35 = vld [vmem:[#allocation8 + $0x830] ss:$8 sps:$4 sm:$0xff]  }
 0x3f2   : > { %v5287_v53 = vrot.slane %v9462_v6, 2  ;;  %3924 = vmatprep.subr.bf16.mxu1 %v7875_v60  ;;  %v9638_v13 = vpack.c.bf16 %v9630_v32, %v9625_v46  ;;  %v9641_v44 = vsel %vm2243_vm2, %v5280_v21, %v5281_v16  ;;  %v5277_v17 = vrot.slane %v9382_v48, 2  ;;  %v7876_v21 = vld [vmem:[#allocation8 + $0x70] ss:$8 sps:$4 sm:$0xff]   ;;  %v7881_v16 = vld [vmem:[#allocation8 + $0x84] ss:$8 sps:$4 sm:$0xff]  }
 0x3f3   : > { %v5278_v19 = vrot.slane %v9464_v33, 2  ;;  %v5283_v24 = vrot.slane %v9409_v39, 2  ;;  %v5284_v6 = vrot.slane %v9475_v26, 2  ;;  %v5292_v60 = vrot.slane %v9423_v18, 2  ;;  %v8203_v46 = vld [vmem:[#allocation8 + $0x840] ss:$8 sps:$4 sm:$0xff]  }
 0x3f4   : > { %v9646_v27 = vsel %vm2243_vm2, %v5286_v50, %v5287_v53  ;;  %3742 = vmatmul.mubr.bf16.gmra.mrb[12].mxu1 %v3484_v7  ;;  %v5293_v48 = vrot.slane %v9482_v51, 2  ;;  %v5298_v33 = vrot.slane %v9439_v47, 2  ;;  %v5299_v18 = vrot.slane %v9490_v9, 2 }
 0x3f5   : > { %v9653_v36 = vpack.c.bf16 %v9646_v27, %v9641_v44  ;;  %v9656_v52 = vsel %vm2243_vm2, %v5277_v17, %v5278_v19  ;;  %3925 = vmatpush1.bf16.msra.mxu1 %v7873_v31  ;;  %3944 = vmatprep.mubr.bf16.mxu1 %v3439_v30  ;;  %v9661_v39 = vsel %vm2243_vm2, %v5283_v24, %v5284_v6  ;;  %v5289_v26 = vrot.slane %v9411_v0, 2 }
 0x3f6   : > { %v5624_v7 = vpack.c.bf16 %v9609_v28, %v9589_v23  ;;  %3926 = vmatprep.subr.bf16.mxu1 %v7878_v63  ;;  %v9669_v51 = vpack.c.bf16 %v9661_v39, %v9656_v52  ;;  %v9672_v47 = vsel %vm2243_vm2, %v5292_v60, %v5293_v48  ;;  %v5290_v30 = vrot.slane %v9503_v3, 2  ;;  %v7884_v48 = vld [vmem:[#allocation8 + $0x94] ss:$8 sps:$4 sm:$0xff]   ;;  %v8179_v28 = vld [vmem:[#allocation8 + $0x5c0] ss:$8 sps:$4 sm:$0xff]  }
 0x3f7   : > { %v5295_v31 = vrot.slane %v9413_v4, 2  ;;  %v9677_v9 = vsel %vm2243_vm2, %v5298_v33, %v5299_v18  ;;  %v5296_v0 = vrot.slane %v9514_v45, 2  ;;  %v5626_v50 = vpack.c.bf16 %v9641_v44, %v9616_v12  ;;  %v7879_v45 = vld [vmem:[#allocation8 + $0x80] ss:$8 sps:$4 sm:$0xff]   ;;  %v8205_v12 = vld [vmem:[#allocation8 + $0x844] ss:$8 sps:$4 sm:$0xff]  }
 0x3f8   : > { %v5625_v53 = vpack.c.bf16 %v9656_v52, %v9630_v32  ;;  %v9686_v63 = vpack.c.bf16 %v9677_v9, %v9672_v47  ;;  %v9689_v17 = vsel %vm2243_vm2, %v5289_v26, %v5290_v30  ;;  %v5628_v4 = vpack.c.bf16 %v9672_v47, %v9646_v27  ;;  %v8206_v44 = vld [vmem:[#allocation8 + $0x850] ss:$8 sps:$4 sm:$0xff]   ;;  %v8211_v27 = vld [vmem:[#allocation8 + $0x864] ss:$8 sps:$4 sm:$0xff]   ;;  %v8209_v52 = vld [vmem:[#allocation8 + $0x860] ss:$8 sps:$4 sm:$0xff]  }
 0x3f9   : > { %v5304_v3 = vrot.slane %v9399_v55, 2  ;;  %3927 = vmatpush1.bf16.msra.mxu1 %v7876_v21  ;;  %v9695_v19 = vsel %vm2243_vm2, %v5295_v31, %v5296_v0  ;;  %v5627_v24 = vpack.c.bf16 %v9689_v17, %v9661_v39  ;;  %v5305_v6 = vrot.slane %v9532_v5, 2  ;;  %v7891_v0 = vld [vmem:[#allocation8 + $0xc0] ss:$8 sps:$4 sm:$0xff]   ;;  %v7894_v5 = vld [vmem:[#allocation8 + $0xd0] ss:$8 sps:$4 sm:$0xff]  }
 0x3fa   : > { %v5301_v60 = vrot.slane %v9534_v62, 2  ;;  %3928 = vmatprep.subr.bf16.mxu1 %v7881_v16  ;;  %v9703_v33 = vpack.c.bf16 %v9695_v19, %v9689_v17  ;;  %v5302_v18 = vrot.slane %v9543_v11, 2  ;;  %v10113_v21 = vrot.slane %v9335_v22, 2  ;;  %v7882_v11 = vld [vmem:[#allocation8 + $0x90] ss:$8 sps:$4 sm:$0xff]  }
 0x3fb   : > { %v10114_v26 = vrot.slane %v9333_v37, 2  ;;  %v9714_v31 = vsel %vm2243_vm2, %v5304_v3, %v5305_v6  ;;  %v7887_v3 = vld [vmem:[#allocation8 + $0xa4] ss:$8 sps:$4 sm:$0xff]   ;;  %v7885_v6 = vld [vmem:[#allocation8 + $0xa0] ss:$8 sps:$4 sm:$0xff]  }
 0x3fc   : > { %v9719_v16 = vsel %vm2243_vm2, %v5301_v60, %v5302_v18  ;;  %v7888_v60 = vld [vmem:[#allocation8 + $0xb0] ss:$8 sps:$4 sm:$0xff]   ;;  %v7893_v18 = vld [vmem:[#allocation8 + $0xc4] ss:$8 sps:$4 sm:$0xff]   ;;  %v10142_v32 = vpack.c.bf16 %v9714_v31, %v9677_v9  ;;  %v8214_v47 = vld [vmem:[#allocation8 + $0x874] ss:$8 sps:$4 sm:$0xff]  }
 0x3fd   : > { %v9711_v30 = vsel %vm2243_vm2, %v10114_v26, %v10113_v21  ;;  %3929 = vmatpush1.bf16.msra.mxu1 %v7879_v45  ;;  %v7890_v26 = vld [vmem:[#allocation8 + $0xb4] ss:$8 sps:$4 sm:$0xff]   ;;  %v7899_v22 = vld [vmem:[#allocation8 + $0xe4] ss:$8 sps:$4 sm:$0xff]   ;;  %v7897_v21 = vld [vmem:[#allocation8 + $0xe0] ss:$8 sps:$4 sm:$0xff]  }
 0x3fe   : > { %3930 = vmatprep.subr.bf16.mxu1 %v7884_v48  ;;  %v7896_v45 = vld [vmem:[#allocation8 + $0xd4] ss:$8 sps:$4 sm:$0xff]   ;;  %v8212_v39 = vld [vmem:[#allocation8 + $0x870] ss:$8 sps:$4 sm:$0xff]   ;;  %v8215_v9 = vld [vmem:[#allocation8 + $0x880] ss:$8 sps:$4 sm:$0xff]  }
 0x3ff   : > { %v7902_v48 = vld [vmem:[#allocation8 + $0xf4] ss:$8 sps:$4 sm:$0xff]  }
 0x400   : > { %v8220_v17 = vld [vmem:[#allocation8 + $0x894] ss:$8 sps:$4 sm:$0xff]  }
 0x401   : > { %3931 = vmatpush1.bf16.msra.mxu1 %v7882_v11  ;;  %v7900_v11 = vld [vmem:[#allocation8 + $0xf0] ss:$8 sps:$4 sm:$0xff]  }
 0x402   : > { %3932 = vmatprep.subr.bf16.mxu1 %v7887_v3  ;;  %v7905_v3 = vld [vmem:[#allocation8 + $0x604] ss:$8 sps:$4 sm:$0xff]  }
 0x405   : > { %3933 = vmatpush1.bf16.msra.mxu1 %v7885_v6  ;;  %v7903_v6 = vld [vmem:[#allocation8 + $0x600] ss:$8 sps:$4 sm:$0xff]  }
 0x406   : > { %3934 = vmatprep.subr.bf16.mxu1 %v7890_v26  ;;  %v3438_v26 = vpack.c.bf16 %v9338_v25, %v9310_v20  ;;  %v7917_v25 = vld [vmem:[#allocation8 + $0x644] ss:$8 sps:$4 sm:$0xff]  }
 0x409   : > { %3935 = vmatpush1.bf16.msra.mxu1 %v7888_v60  ;;  %v7908_v60 = vld [vmem:[#allocation8 + $0x614] ss:$8 sps:$4 sm:$0xff]  }
 0x40a   : > { %3936 = vmatprep.subr.bf16.mxu1 %v7893_v18  ;;  %v7912_v18 = vld [vmem:[#allocation8 + $0x630] ss:$8 sps:$4 sm:$0xff]  }
 0x40d   : > { %3937 = vmatpush1.bf16.msra.mxu1 %v7891_v0  ;;  %v7906_v0 = vld [vmem:[#allocation8 + $0x610] ss:$8 sps:$4 sm:$0xff]  }
 0x40e   : > { %3938 = vmatprep.subr.bf16.mxu1 %v7896_v45  ;;  %v7915_v45 = vld [vmem:[#allocation8 + $0x640] ss:$8 sps:$4 sm:$0xff]  }
 0x411   : > { %3939 = vmatpush1.bf16.msra.mxu1 %v7894_v5  ;;  %v7911_v5 = vld [vmem:[#allocation8 + $0x624] ss:$8 sps:$4 sm:$0xff]  }
 0x412   : > { %3940 = vmatprep.subr.bf16.mxu1 %v7899_v22  ;;  %v7909_v22 = vld [vmem:[#allocation8 + $0x620] ss:$8 sps:$4 sm:$0xff]  }
 0x415   : > { %3941 = vmatpush1.bf16.msra.mxu1 %v7897_v21  ;;  %v7914_v21 = vld [vmem:[#allocation8 + $0x634] ss:$8 sps:$4 sm:$0xff]  }
 0x416   : > { %3942 = vmatprep.subr.bf16.mxu1 %v7902_v48  ;;  %v7920_v48 = vld [vmem:[#allocation8 + $0x654] ss:$8 sps:$4 sm:$0xff]  }
 0x419   : > { %3943 = vmatpush1.bf16.msra.mxu1 %v7900_v11  ;;  %v10115_v11 = vld [vmem:[#allocation19_spill] sm:$0xff] }
 0x41a   : > { %4180 = vmatprep.subr.bf16.mxu1 %v7905_v3  ;;  %v7918_v3 = vld [vmem:[#allocation8 + $0x650] ss:$8 sps:$4 sm:$0xff]  }
 0x41c   : > { %3945 = vmatmul.mubr.bf16.vlgmr.msra.gmra.mrb[0].mxu1 %v3438_v26  ;;  %v7921_v26 = vld [vmem:[#allocation8 + $0x660] ss:$8 sps:$4 sm:$0xff]  }
 0x41d   : > { %3954 = vmatprep.mubr.bf16.mxu1 %v9403_v10  ;;  %4181 = vmatpush1.bf16.msra.mxu1 %v7903_v6  ;;  %v7923_v6 = vld [vmem:[#allocation8 + $0x664] ss:$8 sps:$4 sm:$0xff]  }
 0x41e   : > { %4182 = vmatprep.subr.bf16.mxu1 %v7908_v60  ;;  %v7926_v60 = vld [vmem:[#allocation8 + $0x674] ss:$8 sps:$4 sm:$0xff]  }
 0x421   : > { %4183 = vmatpush1.bf16.msra.mxu1 %v7906_v0  ;;  %v10116_v0 = vld [vmem:[#allocation17_spill] sm:$0xff] }
 0x422   : > { %4184 = vmatprep.subr.bf16.mxu1 %v7911_v5  ;;  %v7924_v5 = vld [vmem:[#allocation8 + $0x670] ss:$8 sps:$4 sm:$0xff]  }
 0x424   : > { %3955 = vmatmul.mubr.bf16.gmra.mrb[4].mxu1 %v9368_v59 }
 0x425   : > { %3964 = vmatprep.mubr.bf16.mxu1 %v9417_v58  ;;  %4185 = vmatpush1.bf16.msra.mxu1 %v7909_v22  ;;  %v7929_v22 = vld [vmem:[#allocation8 + $0x684] ss:$8 sps:$4 sm:$0xff]  }
 0x426   : > { %4186 = vmatprep.subr.bf16.mxu1 %v7914_v21  ;;  %v7927_v21 = vld [vmem:[#allocation8 + $0x680] ss:$8 sps:$4 sm:$0xff]  }
 0x429   : > { %4187 = vmatpush1.bf16.msra.mxu1 %v7912_v18  ;;  %v7932_v18 = vld [vmem:[#allocation8 + $0x694] ss:$8 sps:$4 sm:$0xff]  }
 0x42a   : > { %4188 = vmatprep.subr.bf16.mxu1 %v7917_v25  ;;  %v7930_v25 = vld [vmem:[#allocation8 + $0x690] ss:$8 sps:$4 sm:$0xff]  }
 0x42c   : > { %3965 = vmatmul.mubr.bf16.gmra.mrb[8].mxu1 %v9427_v14 }
 0x42d   : > { %3974 = vmatprep.mubr.bf16.mxu1 %v10115_v11  ;;  %4189 = vmatpush1.bf16.msra.mxu1 %v7915_v45  ;;  %v7935_v45 = vld [vmem:[#allocation8 + $0x6a4] ss:$8 sps:$4 sm:$0xff]  }
 0x42e   : > { %4190 = vmatprep.subr.bf16.mxu1 %v7920_v48  ;;  %v7933_v48 = vld [vmem:[#allocation8 + $0x6a0] ss:$8 sps:$4 sm:$0xff]  }
 0x431   : > { %4191 = vmatpush1.bf16.msra.mxu1 %v7918_v3  ;;  %v7938_v3 = vld [vmem:[#allocation8 + $0x6b4] ss:$8 sps:$4 sm:$0xff]  }
 0x432   : > { %4192 = vmatprep.subr.bf16.mxu1 %v7923_v6  ;;  %v7936_v6 = vld [vmem:[#allocation8 + $0x6b0] ss:$8 sps:$4 sm:$0xff]  }
 0x434   : > { %3975 = vmatmul.mubr.bf16.gmra.mrb[12].mxu1 %v10116_v0 }
 0x435   : > { %4193 = vmatpush1.bf16.msra.mxu1 %v7921_v26  ;;  %4212 = vmatprep.mubr.bf16.mxu1 %v9403_v10  ;;  %v7941_v26 = vld [vmem:[#allocation8 + $0x6c4] ss:$8 sps:$4 sm:$0xff]   ;;  %v7939_v10 = vld [vmem:[#allocation8 + $0x6c0] ss:$8 sps:$4 sm:$0xff]  }
 0x436   : > { %4194 = vmatprep.subr.bf16.mxu1 %v7926_v60  ;;  %v7944_v60 = vld [vmem:[#allocation8 + $0x6d4] ss:$8 sps:$4 sm:$0xff]  }
 0x439   : > { %4195 = vmatpush1.bf16.msra.mxu1 %v7924_v5  ;;  %v7942_v5 = vld [vmem:[#allocation8 + $0x6d0] ss:$8 sps:$4 sm:$0xff]  }
 0x43a   : > { %4196 = vmatprep.subr.bf16.mxu1 %v7929_v22  ;;  %v7947_v22 = vld [vmem:[#allocation8 + $0x6e4] ss:$8 sps:$4 sm:$0xff]  }
 0x43d   : > { %4197 = vmatpush1.bf16.msra.mxu1 %v7927_v21  ;;  %v7945_v21 = vld [vmem:[#allocation8 + $0x6e0] ss:$8 sps:$4 sm:$0xff]  }
 0x43e   : > { %4198 = vmatprep.subr.bf16.mxu1 %v7932_v18  ;;  %v7950_v18 = vld [vmem:[#allocation8 + $0x6f4] ss:$8 sps:$4 sm:$0xff]  }
 0x441   : > { %4199 = vmatpush1.bf16.msra.mxu1 %v7930_v25  ;;  %v7948_v25 = vld [vmem:[#allocation8 + $0x6f0] ss:$8 sps:$4 sm:$0xff]  }
 0x442   : > { %4200 = vmatprep.subr.bf16.mxu1 %v7935_v45  ;;  %v7953_v45 = vld [vmem:[#allocation8 + $0x104] ss:$8 sps:$4 sm:$0xff]  }
 0x445   : > { %4201 = vmatpush1.bf16.msra.mxu1 %v7933_v48  ;;  %v7951_v48 = vld [vmem:[#allocation8 + $0x100] ss:$8 sps:$4 sm:$0xff]  }
 0x446   : > { %4202 = vmatprep.subr.bf16.mxu1 %v7938_v3  ;;  %v7956_v3 = vld [vmem:[#allocation8 + $0x114] ss:$8 sps:$4 sm:$0xff]  }
 0x449   : > { %4203 = vmatpush1.bf16.msra.mxu1 %v7936_v6  ;;  %v7954_v6 = vld [vmem:[#allocation8 + $0x110] ss:$8 sps:$4 sm:$0xff]  }
 0x44a   : > { %4204 = vmatprep.subr.bf16.mxu1 %v7941_v26  ;;  %v7959_v26 = vld [vmem:[#allocation8 + $0x124] ss:$8 sps:$4 sm:$0xff]  }
 0x44d   : > { %4205 = vmatpush1.bf16.msra.mxu1 %v7939_v10  ;;  %v7957_v10 = vld [vmem:[#allocation8 + $0x120] ss:$8 sps:$4 sm:$0xff]  }
 0x44e   : > { %4206 = vmatprep.subr.bf16.mxu1 %v7944_v60  ;;  %v7962_v60 = vld [vmem:[#allocation8 + $0x134] ss:$8 sps:$4 sm:$0xff]  }
 0x451   : > { %4207 = vmatpush1.bf16.msra.mxu1 %v7942_v5  ;;  %v7960_v5 = vld [vmem:[#allocation8 + $0x130] ss:$8 sps:$4 sm:$0xff]  }
 0x452   : > { %4208 = vmatprep.subr.bf16.mxu1 %v7947_v22  ;;  %v7965_v22 = vld [vmem:[#allocation8 + $0x144] ss:$8 sps:$4 sm:$0xff]  }
 0x455   : > { %4209 = vmatpush1.bf16.msra.mxu1 %v7945_v21  ;;  %v10117_v21 = vld [vmem:[#allocation13_spill] sm:$0xff] }
 0x456   : > { %4210 = vmatprep.subr.bf16.mxu1 %v7950_v18  ;;  %v3986_v18 = vpack.c.bf16 %v10117_v21, %v9399_v55  ;;  %v7974_v55 = vld [vmem:[#allocation8 + $0x174] ss:$8 sps:$4 sm:$0xff]   ;;  %v7984_v21 = vld [vmem:[#allocation8 + $0x1b0] ss:$8 sps:$4 sm:$0xff]  }
 0x459   : > { %4211 = vmatpush1.bf16.msra.mxu1 %v7948_v25  ;;  %v4312_v25 = vrot.slane %v9321_v56, 1 }
 0x45a   : > { %4590 = vmatprep.subr.bf16.mxu1 %v7953_v45  ;;  %v10118_v45 = vld [vmem:[#allocation16_spill] sm:$0xff] }
 0x45c   : > { %4213 = vmatmul.mubr.bf16.vlgmr.msra.gmra.mrb[0].mxu1 %v9368_v59  ;;  %v7963_v59 = vld [vmem:[#allocation8 + $0x140] ss:$8 sps:$4 sm:$0xff]  }
 0x45d   : > { %4222 = vmatprep.mubr.bf16.mxu1 %v9417_v58  ;;  %4591 = vmatpush1.bf16.msra.mxu1 %v7951_v48  ;;  %v7968_v58 = vld [vmem:[#allocation8 + $0x154] ss:$8 sps:$4 sm:$0xff]   ;;  %v4313_v48 = vrot.slane %v10118_v45, 1 }
 0x45e   : > { %4592 = vmatprep.subr.bf16.mxu1 %v7956_v3  ;;  %v7992_v45 = vld [vmem:[#allocation8 + $0x1d4] ss:$8 sps:$4 sm:$0xff]  }
 0x45f   : > { %v4314_v3 = vsel %vm1298_vm1, %v4312_v25, %v4313_v48  ;;  %v7987_v25 = vld [vmem:[#allocation8 + $0x1c0] ss:$8 sps:$4 sm:$0xff]   ;;  %v7990_v48 = vld [vmem:[#allocation8 + $0x1d0] ss:$8 sps:$4 sm:$0xff]  }
 0x461   : > { %4593 = vmatpush1.bf16.msra.mxu1 %v7954_v6  ;;  %v7969_v6 = vld [vmem:[#allocation8 + $0x160] ss:$8 sps:$4 sm:$0xff]  }
 0x462   : > { %4594 = vmatprep.subr.bf16.mxu1 %v7959_v26  ;;  %v3985_v26 = vpack.c.bf16 %v9333_v37, %v9534_v62  ;;  %v7981_v62 = vld [vmem:[#allocation8 + $0x1a0] ss:$8 sps:$4 sm:$0xff]   ;;  %v7986_v37 = vld [vmem:[#allocation8 + $0x1b4] ss:$8 sps:$4 sm:$0xff]  }
 0x464   : > { %4223 = vmatmul.mubr.bf16.gmra.mrb[4].mxu1 %v9427_v14  ;;  %v7966_v14 = vld [vmem:[#allocation8 + $0x150] ss:$8 sps:$4 sm:$0xff]  }
 0x465   : > { %4232 = vmatprep.mubr.bf16.mxu1 %v10115_v11  ;;  %4595 = vmatpush1.bf16.msra.mxu1 %v7957_v10  ;;  %v7971_v11 = vld [vmem:[#allocation8 + $0x164] ss:$8 sps:$4 sm:$0xff]   ;;  %v10119_v10 = vld [vmem:[#allocation20_spill] sm:$0xff] }
 0x466   : > { %4596 = vmatprep.subr.bf16.mxu1 %v7962_v60  ;;  %v4390_v56 = vpack.c.bf16 %v10119_v10, %v4314_v3  ;;  %v7977_v60 = vld [vmem:[#allocation8 + $0x184] ss:$8 sps:$4 sm:$0xff]   ;;  %v7998_v3 = vld [vmem:[#allocation8 + $0x1f4] ss:$8 sps:$4 sm:$0xff]  }
 0x469   : > { %4597 = vmatpush1.bf16.msra.mxu1 %v7960_v5  ;;  %v7975_v5 = vld [vmem:[#allocation8 + $0x180] ss:$8 sps:$4 sm:$0xff]  }
 0x46a   : > { %4598 = vmatprep.subr.bf16.mxu1 %v7965_v22  ;;  %v7980_v22 = vld [vmem:[#allocation8 + $0x194] ss:$8 sps:$4 sm:$0xff]  }
 0x46c   : > { %4233 = vmatmul.mubr.bf16.gmra.mrb[8].mxu1 %v10116_v0  ;;  %v7972_v0 = vld [vmem:[#allocation8 + $0x170] ss:$8 sps:$4 sm:$0xff]  }
 0x46d   : > { %4242 = vmatprep.mubr.bf16.mxu1 %v3986_v18  ;;  %4599 = vmatpush1.bf16.msra.mxu1 %v7963_v59  ;;  %v7978_v59 = vld [vmem:[#allocation8 + $0x190] ss:$8 sps:$4 sm:$0xff]   ;;  %v7989_v18 = vld [vmem:[#allocation8 + $0x1c4] ss:$8 sps:$4 sm:$0xff]  }
 0x46e   : > { %4600 = vmatprep.subr.bf16.mxu1 %v7968_v58  ;;  %v7983_v58 = vld [vmem:[#allocation8 + $0x1a4] ss:$8 sps:$4 sm:$0xff]  }
 0x471   : > { %4601 = vmatpush1.bf16.msra.mxu1 %v7966_v14  ;;  %v7995_v14 = vld [vmem:[#allocation8 + $0x1e4] ss:$8 sps:$4 sm:$0xff]  }
 0x472   : > { %4602 = vmatprep.subr.bf16.mxu1 %v7971_v11  ;;  %v7993_v11 = vld [vmem:[#allocation8 + $0x1e0] ss:$8 sps:$4 sm:$0xff]  }
 0x474   : > { %4243 = vmatmul.mubr.bf16.gmra.mrb[12].mxu1 %v3985_v26  ;;  %v10120_v26 = vld [vmem:[#allocation15_spill] sm:$0xff] }
 0x475   : > { %4603 = vmatpush1.bf16.msra.mxu1 %v7969_v6  ;;  %4622 = vmatprep.mubr.bf16.mxu1 %v4390_v56  ;;  %v4309_v6 = vrot.slane %v9310_v20, 1  ;;  %v7996_v56 = vld [vmem:[#allocation8 + $0x1f0] ss:$8 sps:$4 sm:$0xff]   ;;  %v8007_v20 = vld [vmem:[#allocation8 + $0x424] ss:$8 sps:$4 sm:$0xff]  }
 0x476   : > { %4604 = vmatprep.subr.bf16.mxu1 %v7974_v55  ;;  %v4310_v55 = vrot.slane %v10120_v26, 1  ;;  %v8014_v26 = vld [vmem:[#allocation8 + $0x450] ss:$8 sps:$4 sm:$0xff]  }
 0x479   : > { %4605 = vmatpush1.bf16.msra.mxu1 %v7972_v0  ;;  %v8001_v0 = vld [vmem:[#allocation8 + $0x404] ss:$8 sps:$4 sm:$0xff]  }
 0x47a   : > { %4606 = vmatprep.subr.bf16.mxu1 %v7977_v60  ;;  %v4311_v60 = vsel %vm1298_vm1, %v4309_v6, %v4310_v55  ;;  %v10125_v6 = vld [vmem:[#allocation29_spill] sm:$0xff] }
 0x47b   : > { %v8019_v55 = vld [vmem:[#allocation8 + $0x464] ss:$8 sps:$4 sm:$0xff]  }
 0x47d   : > { %4607 = vmatpush1.bf16.msra.mxu1 %v7975_v5  ;;  %v7999_v5 = vld [vmem:[#allocation8 + $0x400] ss:$8 sps:$4 sm:$0xff]  }
 0x47e   : > { %4608 = vmatprep.subr.bf16.mxu1 %v7980_v22  ;;  %v10121_v22 = vld [vmem:[#allocation14_spill] sm:$0xff] }
 0x481   : > { %4609 = vmatpush1.bf16.msra.mxu1 %v7978_v59  ;;  %v4389_v59 = vpack.c.bf16 %v10121_v22, %v4311_v60  ;;  %v10126_v60 = vld [vmem:[#allocation18_spill] sm:$0xff] }
 0x482   : > { %4610 = vmatprep.subr.bf16.mxu1 %v7983_v58  ;;  %v8004_v58 = vld [vmem:[#allocation8 + $0x414] ss:$8 sps:$4 sm:$0xff]  }
 0x485   : > { %4611 = vmatpush1.bf16.msra.mxu1 %v7981_v62  ;;  %v10122_v62 = vld [vmem:[#allocation22_spill] sm:$0xff] }
 0x486   : > { %4612 = vmatprep.subr.bf16.mxu1 %v7986_v37  ;;  %v8002_v37 = vld [vmem:[#allocation8 + $0x410] ss:$8 sps:$4 sm:$0xff]  }
 0x489   : > { %4613 = vmatpush1.bf16.msra.mxu1 %v7984_v21  ;;  %v8005_v21 = vld [vmem:[#allocation8 + $0x420] ss:$8 sps:$4 sm:$0xff]  }
 0x48a   : > { %4614 = vmatprep.subr.bf16.mxu1 %v7989_v18  ;;  %v8010_v18 = vld [vmem:[#allocation8 + $0x434] ss:$8 sps:$4 sm:$0xff]  }
 0x48d   : > { %4615 = vmatpush1.bf16.msra.mxu1 %v7987_v25  ;;  %v10123_v25 = vld [vmem:[#allocation24_spill] sm:$0xff] }
 0x48e   : > { %4616 = vmatprep.subr.bf16.mxu1 %v7992_v45  ;;  %v10124_v45 = vld [vmem:[#allocation27_spill] sm:$0xff] }
 0x491   : > { %4617 = vmatpush1.bf16.msra.mxu1 %v7990_v48  ;;  %v8008_v48 = vld [vmem:[#allocation8 + $0x430] ss:$8 sps:$4 sm:$0xff]  }
 0x492   : > { %4618 = vmatprep.subr.bf16.mxu1 %v7995_v14  ;;  %v8013_v14 = vld [vmem:[#allocation8 + $0x444] ss:$8 sps:$4 sm:$0xff]  }
 0x495   : > { %4619 = vmatpush1.bf16.msra.mxu1 %v7993_v11  ;;  %v8011_v11 = vld [vmem:[#allocation8 + $0x440] ss:$8 sps:$4 sm:$0xff]  }
 0x496   : > { %4620 = vmatprep.subr.bf16.mxu1 %v7998_v3  ;;  %v8016_v3 = vld [vmem:[#allocation8 + $0x454] ss:$8 sps:$4 sm:$0xff]  }
 0x499   : > { %4621 = vmatpush1.bf16.msra.mxu1 %v7996_v56  ;;  %v8017_v56 = vld [vmem:[#allocation8 + $0x460] ss:$8 sps:$4 sm:$0xff]  }
 0x49a   : > { %4880 = vmatprep.subr.bf16.mxu1 %v8001_v0  ;;  %v8022_v0 = vld [vmem:[#allocation8 + $0x474] ss:$8 sps:$4 sm:$0xff]  }
 0x49c   : > { %4623 = vmatmul.mubr.bf16.vlgmr.msra.gmra.mrb[0].mxu1 %v4389_v59  ;;  %v8020_v59 = vld [vmem:[#allocation8 + $0x470] ss:$8 sps:$4 sm:$0xff]  }
 0x49d   : > { %4632 = vmatprep.mubr.bf16.mxu1 %v10122_v62  ;;  %4881 = vmatpush1.bf16.msra.mxu1 %v7999_v5  ;;  %v10127_v5 = vpack.c.bf16 %v10126_v60, %v10119_v10  ;;  %v8037_v10 = vld [vmem:[#allocation8 + $0x4c4] ss:$8 sps:$4 sm:$0xff]   ;;  %v8046_v60 = vld [vmem:[#allocation8 + $0x4f4] ss:$8 sps:$4 sm:$0xff]  }
 0x49e   : > { %4882 = vmatprep.subr.bf16.mxu1 %v8004_v58  ;;  %v8025_v58 = vld [vmem:[#allocation8 + $0x484] ss:$8 sps:$4 sm:$0xff]  }
 0x4a1   : > { %4883 = vmatpush1.bf16.msra.mxu1 %v8002_v37  ;;  %v8023_v37 = vld [vmem:[#allocation8 + $0x480] ss:$8 sps:$4 sm:$0xff]  }
 0x4a2   : > { %4884 = vmatprep.subr.bf16.mxu1 %v8007_v20  ;;  %v8028_v20 = vld [vmem:[#allocation8 + $0x494] ss:$8 sps:$4 sm:$0xff]  }
 0x4a4   : > { %4633 = vmatmul.mubr.bf16.gmra.mrb[4].mxu1 %v10123_v25 }
 0x4a5   : > { %4642 = vmatprep.mubr.bf16.mxu1 %v10124_v45  ;;  %4885 = vmatpush1.bf16.msra.mxu1 %v8005_v21  ;;  %v8026_v21 = vld [vmem:[#allocation8 + $0x490] ss:$8 sps:$4 sm:$0xff]  }
 0x4a6   : > { %4886 = vmatprep.subr.bf16.mxu1 %v8010_v18  ;;  %v8031_v18 = vld [vmem:[#allocation8 + $0x4a4] ss:$8 sps:$4 sm:$0xff]  }
 0x4a9   : > { %4887 = vmatpush1.bf16.msra.mxu1 %v8008_v48  ;;  %v8029_v48 = vld [vmem:[#allocation8 + $0x4a0] ss:$8 sps:$4 sm:$0xff]  }
 0x4aa   : > { %4888 = vmatprep.subr.bf16.mxu1 %v8013_v14  ;;  %v8034_v14 = vld [vmem:[#allocation8 + $0x4b4] ss:$8 sps:$4 sm:$0xff]  }
 0x4ac   : > { %4643 = vmatmul.mubr.bf16.gmra.mrb[8].mxu1 %v10125_v6 }
 0x4ad   : > { %4652 = vmatprep.mubr.bf16.mxu1 %v9547_v38  ;;  %4889 = vmatpush1.bf16.msra.mxu1 %v8011_v11  ;;  %v8032_v11 = vld [vmem:[#allocation8 + $0x4b0] ss:$8 sps:$4 sm:$0xff]  }
 0x4ae   : > { %4890 = vmatprep.subr.bf16.mxu1 %v8016_v3  ;;  %v8035_v3 = vld [vmem:[#allocation8 + $0x4c0] ss:$8 sps:$4 sm:$0xff]  }
 0x4b1   : > { %4891 = vmatpush1.bf16.msra.mxu1 %v8014_v26  ;;  %v8040_v26 = vld [vmem:[#allocation8 + $0x4d4] ss:$8 sps:$4 sm:$0xff]  }
 0x4b2   : > { %4892 = vmatprep.subr.bf16.mxu1 %v8019_v55  ;;  %v8038_v55 = vld [vmem:[#allocation8 + $0x4d0] ss:$8 sps:$4 sm:$0xff]  }
 0x4b4   : > { %4653 = vmatmul.mubr.bf16.gmra.mrb[12].mxu1 %v9565_v57 }
 0x4b5   : > { %4893 = vmatpush1.bf16.msra.mxu1 %v8017_v56  ;;  %4912 = vmatprep.mubr.bf16.mxu1 %v10127_v5  ;;  %v8043_v56 = vld [vmem:[#allocation8 + $0x4e4] ss:$8 sps:$4 sm:$0xff]   ;;  %v8044_v5 = vld [vmem:[#allocation8 + $0x4f0] ss:$8 sps:$4 sm:$0xff]  }
 0x4b6   : > { %4894 = vmatprep.subr.bf16.mxu1 %v8022_v0  ;;  %v8041_v0 = vld [vmem:[#allocation8 + $0x4e0] ss:$8 sps:$4 sm:$0xff]  }
 0x4b9   : > { %4895 = vmatpush1.bf16.msra.mxu1 %v8020_v59  ;;  %v8049_v59 = vld [vmem:[#allocation8 + $0x704] ss:$8 sps:$4 sm:$0xff]  }
 0x4ba   : > { %4896 = vmatprep.subr.bf16.mxu1 %v8025_v58  ;;  %v8047_v58 = vld [vmem:[#allocation8 + $0x700] ss:$8 sps:$4 sm:$0xff]  }
 0x4bd   : > { %4897 = vmatpush1.bf16.msra.mxu1 %v8023_v37  ;;  %v8052_v37 = vld [vmem:[#allocation8 + $0x714] ss:$8 sps:$4 sm:$0xff]  }
 0x4be   : > { %4898 = vmatprep.subr.bf16.mxu1 %v8028_v20  ;;  %v10128_v20 = vld [vmem:[#allocation23_spill] sm:$0xff] }
 0x4c1   : > { %4899 = vmatpush1.bf16.msra.mxu1 %v8026_v21  ;;  %v10129_v21 = vpack.c.bf16 %v10128_v20, %v10121_v22 }
 0x4c2   : > { %4900 = vmatprep.subr.bf16.mxu1 %v8031_v18  ;;  %v10130_v18 = vld [vmem:[#allocation25_spill] sm:$0xff] }
 0x4c5   : > { %4901 = vmatpush1.bf16.msra.mxu1 %v8029_v48  ;;  %v10131_v48 = vld [vmem:[#allocation21_spill] sm:$0xff] }
 0x4c6   : > { %4902 = vmatprep.subr.bf16.mxu1 %v8034_v14  ;;  %v10132_v14 = vpack.c.bf16 %v10130_v18, %v10131_v48  ;;  %v8070_v18 = vld [vmem:[#allocation8 + $0x774] ss:$8 sps:$4 sm:$0xff]   ;;  %v10140_v48 = vpack.c.bf16 %v9584_v49, %v9557_v1  ;;  %v8080_v1 = vld [vmem:[#allocation8 + $0x7b0] ss:$8 sps:$4 sm:$0xff]  }
 0x4c9   : > { %4903 = vmatpush1.bf16.msra.mxu1 %v8032_v11  ;;  %v8050_v11 = vld [vmem:[#allocation8 + $0x710] ss:$8 sps:$4 sm:$0xff]  }
 0x4ca   : > { %4904 = vmatprep.subr.bf16.mxu1 %v8037_v10  ;;  %v8055_v10 = vld [vmem:[#allocation8 + $0x724] ss:$8 sps:$4 sm:$0xff]  }
 0x4cd   : > { %4905 = vmatpush1.bf16.msra.mxu1 %v8035_v3  ;;  %v8053_v3 = vld [vmem:[#allocation8 + $0x720] ss:$8 sps:$4 sm:$0xff]  }
 0x4ce   : > { %4906 = vmatprep.subr.bf16.mxu1 %v8040_v26  ;;  %v8058_v26 = vld [vmem:[#allocation8 + $0x734] ss:$8 sps:$4 sm:$0xff]  }
 0x4d1   : > { %4907 = vmatpush1.bf16.msra.mxu1 %v8038_v55  ;;  %v10133_v55 = vpack.c.bf16 %v9510_v54, %v9485_v40  ;;  %v10139_v54 = vpack.c.bf16 %v9571_v43, %v9537_v41  ;;  %v8062_v40 = vld [vmem:[#allocation8 + $0x750] ss:$8 sps:$4 sm:$0xff]   ;;  %v8071_v41 = vld [vmem:[#allocation8 + $0x780] ss:$8 sps:$4 sm:$0xff]  }
 0x4d2   : > { %4908 = vmatprep.subr.bf16.mxu1 %v8043_v56  ;;  %v10134_v56 = vld [vmem:[#allocation26_spill] sm:$0xff] }
 0x4d3   : > { %v10135_v22 = vpack.c.bf16 %v9528_v29, %v10134_v56  ;;  %v8067_v29 = vld [vmem:[#allocation8 + $0x764] ss:$8 sps:$4 sm:$0xff]   ;;  %v8082_v56 = vld [vmem:[#allocation8 + $0x7b4] ss:$8 sps:$4 sm:$0xff]  }
 0x4d5   : > { %4909 = vmatpush1.bf16.msra.mxu1 %v8041_v0  ;;  %v8056_v0 = vld [vmem:[#allocation8 + $0x730] ss:$8 sps:$4 sm:$0xff]  }
 0x4d6   : > { %4910 = vmatprep.subr.bf16.mxu1 %v8046_v60  ;;  %v8061_v60 = vld [vmem:[#allocation8 + $0x744] ss:$8 sps:$4 sm:$0xff]  }
 0x4d9   : > { %4911 = vmatpush1.bf16.msra.mxu1 %v8044_v5  ;;  %v8059_v5 = vld [vmem:[#allocation8 + $0x740] ss:$8 sps:$4 sm:$0xff]  }
 0x4da   : > { %5164 = vmatprep.subr.bf16.mxu1 %v8049_v59  ;;  %v8064_v59 = vld [vmem:[#allocation8 + $0x754] ss:$8 sps:$4 sm:$0xff]  }
 0x4dc   : > { %4913 = vmatmul.mubr.bf16.vlgmr.msra.gmra.mrb[0].mxu1 %v10129_v21  ;;  %v8065_v21 = vld [vmem:[#allocation8 + $0x760] ss:$8 sps:$4 sm:$0xff]  }
 0x4dd   : > { %4922 = vmatprep.mubr.bf16.mxu1 %v10132_v14  ;;  %5165 = vmatpush1.bf16.msra.mxu1 %v8047_v58  ;;  %v10136_v58 = vld [vmem:[#allocation30_spill] sm:$0xff]  ;;  %v8068_v14 = vld [vmem:[#allocation8 + $0x770] ss:$8 sps:$4 sm:$0xff]  }
 0x4de   : > { %5166 = vmatprep.subr.bf16.mxu1 %v8052_v37  ;;  %v10137_v37 = vld [vmem:[#allocation28_spill] sm:$0xff] }
 0x4df   : > { %v10138_v20 = vpack.c.bf16 %v10136_v58, %v10137_v37  ;;  %v8094_v58 = vld [vmem:[#allocation8 + $0x7f4] ss:$8 sps:$4 sm:$0xff]   ;;  %v8092_v37 = vld [vmem:[#allocation8 + $0x7f0] ss:$8 sps:$4 sm:$0xff]  }
 0x4e1   : > { %5167 = vmatpush1.bf16.msra.mxu1 %v8050_v11  ;;  %v8073_v11 = vld [vmem:[#allocation8 + $0x784] ss:$8 sps:$4 sm:$0xff]  }
 0x4e2   : > { %5168 = vmatprep.subr.bf16.mxu1 %v8055_v10  ;;  %v8076_v10 = vld [vmem:[#allocation8 + $0x794] ss:$8 sps:$4 sm:$0xff]  }
 0x4e4   : > { %4923 = vmatmul.mubr.bf16.gmra.mrb[4].mxu1 %v10133_v55  ;;  %v8077_v55 = vld [vmem:[#allocation8 + $0x7a0] ss:$8 sps:$4 sm:$0xff]  }
 0x4e5   : > { %4932 = vmatprep.mubr.bf16.mxu1 %v10135_v22  ;;  %5169 = vmatpush1.bf16.msra.mxu1 %v8053_v3  ;;  %v8074_v3 = vld [vmem:[#allocation8 + $0x790] ss:$8 sps:$4 sm:$0xff]   ;;  %v8085_v22 = vld [vmem:[#allocation8 + $0x7c4] ss:$8 sps:$4 sm:$0xff]  }
 0x4e6   : > { %5170 = vmatprep.subr.bf16.mxu1 %v8058_v26  ;;  %v8079_v26 = vld [vmem:[#allocation8 + $0x7a4] ss:$8 sps:$4 sm:$0xff]  }
 0x4e9   : > { %5171 = vmatpush1.bf16.msra.mxu1 %v8056_v0  ;;  %v8088_v0 = vld [vmem:[#allocation8 + $0x7d4] ss:$8 sps:$4 sm:$0xff]  }
 0x4ea   : > { %5172 = vmatprep.subr.bf16.mxu1 %v8061_v60  ;;  %v8086_v60 = vld [vmem:[#allocation8 + $0x7d0] ss:$8 sps:$4 sm:$0xff]  }
 0x4ec   : > { %4933 = vmatmul.mubr.bf16.gmra.mrb[8].mxu1 %v10138_v20  ;;  %v8097_v20 = vld [vmem:[#allocation8 + $0x204] ss:$8 sps:$4 sm:$0xff]  }
 0x4ed   : > { %4942 = vmatprep.mubr.bf16.mxu1 %v10139_v54  ;;  %5173 = vmatpush1.bf16.msra.mxu1 %v8059_v5  ;;  %v8091_v5 = vld [vmem:[#allocation8 + $0x7e4] ss:$8 sps:$4 sm:$0xff]   ;;  %v8095_v54 = vld [vmem:[#allocation8 + $0x200] ss:$8 sps:$4 sm:$0xff]  }
 0x4ee   : > { %5174 = vmatprep.subr.bf16.mxu1 %v8064_v59  ;;  %v8089_v59 = vld [vmem:[#allocation8 + $0x7e0] ss:$8 sps:$4 sm:$0xff]  }
 0x4f1   : > { %5175 = vmatpush1.bf16.msra.mxu1 %v8062_v40  ;;  %v8100_v40 = vld [vmem:[#allocation8 + $0x214] ss:$8 sps:$4 sm:$0xff]  }
 0x4f2   : > { %5176 = vmatprep.subr.bf16.mxu1 %v8067_v29  ;;  %v8098_v29 = vld [vmem:[#allocation8 + $0x210] ss:$8 sps:$4 sm:$0xff]  }
 0x4f4   : > { %4943 = vmatmul.mubr.bf16.gmra.mrb[12].mxu1 %v10140_v48  ;;  %v8106_v48 = vld [vmem:[#allocation8 + $0x234] ss:$8 sps:$4 sm:$0xff]  }
 0x4f5   : > { %5177 = vmatpush1.bf16.msra.mxu1 %v8065_v21  ;;  %5196 = vmatprep.mubr.bf16.mxu1 %v10122_v62  ;;  %v8083_v62 = vld [vmem:[#allocation8 + $0x7c0] ss:$8 sps:$4 sm:$0xff]   ;;  %v8103_v21 = vld [vmem:[#allocation8 + $0x224] ss:$8 sps:$4 sm:$0xff]  }
 0x4f6   : > { %5178 = vmatprep.subr.bf16.mxu1 %v8070_v18  ;;  %v8101_v18 = vld [vmem:[#allocation8 + $0x220] ss:$8 sps:$4 sm:$0xff]  }
 0x4f9   : > { %5179 = vmatpush1.bf16.msra.mxu1 %v8068_v14  ;;  %v8269_v14 = vld [vmem:[#allocation2 + $0x128] sm:$0xff] }
 0x4fa   : > { %5180 = vmatprep.subr.bf16.mxu1 %v8073_v11  ;;  %v4366_v11 = vrot.slane %v8269_v14, 1  ;;  %v8136_v14 = vld [vmem:[#allocation8 + $0x2d4] ss:$8 sps:$4 sm:$0xff]  }
 0x4fd   : > { %5181 = vmatpush1.bf16.msra.mxu1 %v8071_v41  ;;  %v8270_v41 = vld [vmem:[#allocation2 + $0x138] sm:$0x3] }
 0x4fe   : > { %5182 = vmatprep.subr.bf16.mxu1 %v8076_v10  ;;  %v4367_v10 = vrot.slane %v8270_v41, 1  ;;  %v8139_v41 = vld [vmem:[#allocation8 + $0x2e4] ss:$8 sps:$4 sm:$0xff]  }
 0x501   : > { %5183 = vmatpush1.bf16.msra.mxu1 %v8074_v3  ;;  %v4368_v3 = vsel %vm1298_vm1, %v4366_v11, %v4367_v10  ;;  %v8134_v11 = vld [vmem:[#allocation8 + $0x2d0] ss:$8 sps:$4 sm:$0xff]   ;;  %v8137_v10 = vld [vmem:[#allocation8 + $0x2e0] ss:$8 sps:$4 sm:$0xff]  }
 0x502   : > { %5184 = vmatprep.subr.bf16.mxu1 %v8079_v26  ;;  %v8107_v26 = vld [vmem:[#allocation8 + $0x240] ss:$8 sps:$4 sm:$0xff]  }
 0x505   : > { %5185 = vmatpush1.bf16.msra.mxu1 %v8077_v55  ;;  %v8112_v55 = vld [vmem:[#allocation8 + $0x254] ss:$8 sps:$4 sm:$0xff]  }
 0x506   : > { %5186 = vmatprep.subr.bf16.mxu1 %v8082_v56  ;;  %v8271_v56 = vld [vmem:[#allocation2 + $0x120] sm:$0xff] }
 0x509   : > { %5187 = vmatpush1.bf16.msra.mxu1 %v8080_v1  ;;  %v4363_v1 = vrot.slane %v8271_v56, 1  ;;  %v8146_v56 = vld [vmem:[#allocation8 + $0x510] ss:$8 sps:$4 sm:$0xff]  }
 0x50a   : > { %5188 = vmatprep.subr.bf16.mxu1 %v8085_v22  ;;  %v4970_v22 = vpack.c.bf16 %v4368_v3, %v9571_v43  ;;  %v10141_v43 = vpack.c.bf16 %v9589_v23, %v9389_v34  ;;  %v8133_v34 = vld [vmem:[#allocation8 + $0x2c4] ss:$8 sps:$4 sm:$0xff]  }
 0x50b   : > { %v8145_v3 = vld [vmem:[#allocation8 + $0x504] ss:$8 sps:$4 sm:$0xff]  }
 0x50c   : > { %v8181_v23 = vld [vmem:[#allocation8 + $0x5c4] ss:$8 sps:$4 sm:$0xff]  }
 0x50d   : > { %5189 = vmatpush1.bf16.msra.mxu1 %v8083_v62  ;;  %v8272_v62 = vld [vmem:[#allocation2 + $0x130] sm:$0x3] }
 0x50e   : > { %5190 = vmatprep.subr.bf16.mxu1 %v8088_v0  ;;  %v8115_v0 = vld [vmem:[#allocation8 + $0x264] ss:$8 sps:$4 sm:$0xff]  }
 0x511   : > { %5191 = vmatpush1.bf16.msra.mxu1 %v8086_v60 }
 0x512   : > { %5192 = vmatprep.subr.bf16.mxu1 %v8091_v5  ;;  %v8113_v5 = vld [vmem:[#allocation8 + $0x260] ss:$8 sps:$4 sm:$0xff]  }
 0x515   : > { %5193 = vmatpush1.bf16.msra.mxu1 %v8089_v59 }
 0x516   : > { %5194 = vmatprep.subr.bf16.mxu1 %v8094_v58  ;;  %v8118_v58 = vld [vmem:[#allocation8 + $0x274] ss:$8 sps:$4 sm:$0xff]  }
 0x519   : > { %5195 = vmatpush1.bf16.msra.mxu1 %v8092_v37  ;;  %v8121_v37 = vld [vmem:[#allocation8 + $0x284] ss:$8 sps:$4 sm:$0xff]  }
 0x51a   : > { %5534 = vmatprep.subr.bf16.mxu1 %v8097_v20  ;;  %v8119_v20 = vld [vmem:[#allocation8 + $0x280] ss:$8 sps:$4 sm:$0xff]  }
 0x51c   : > { %5197 = vmatmul.mubr.bf16.vlgmr.msra.gmra.mrb[0].mxu1 %v10123_v25  ;;  %v8104_v25 = vld [vmem:[#allocation8 + $0x230] ss:$8 sps:$4 sm:$0xff]  }
 0x51d   : > { %5206 = vmatprep.mubr.bf16.mxu1 %v10124_v45  ;;  %5535 = vmatpush1.bf16.msra.mxu1 %v8095_v54  ;;  %v8109_v45 = vld [vmem:[#allocation8 + $0x244] ss:$8 sps:$4 sm:$0xff]   ;;  %v8124_v54 = vld [vmem:[#allocation8 + $0x294] ss:$8 sps:$4 sm:$0xff]  }
 0x51e   : > { %5536 = vmatprep.subr.bf16.mxu1 %v8100_v40  ;;  %v8122_v40 = vld [vmem:[#allocation8 + $0x290] ss:$8 sps:$4 sm:$0xff]  }
 0x521   : > { %5537 = vmatpush1.bf16.msra.mxu1 %v8098_v29  ;;  %v8127_v29 = vld [vmem:[#allocation8 + $0x2a4] ss:$8 sps:$4 sm:$0xff]  }
 0x522   : > { %5538 = vmatprep.subr.bf16.mxu1 %v8103_v21  ;;  %v8130_v21 = vld [vmem:[#allocation8 + $0x2b4] ss:$8 sps:$4 sm:$0xff]  }
 0x524   : > { %5207 = vmatmul.mubr.bf16.gmra.mrb[4].mxu1 %v10125_v6  ;;  %v4364_v6 = vrot.slane %v8272_v62, 1  ;;  %v8154_v62 = vld [vmem:[#allocation8 + $0x534] ss:$8 sps:$4 sm:$0xff]  }
 0x525   : > { %5216 = vmatprep.mubr.bf16.mxu1 %v9547_v38  ;;  %5539 = vmatpush1.bf16.msra.mxu1 %v8101_v18  ;;  %v8110_v38 = vld [vmem:[#allocation8 + $0x250] ss:$8 sps:$4 sm:$0xff]  }
 0x526   : > { %5540 = vmatprep.subr.bf16.mxu1 %v8106_v48  ;;  %v4365_v60 = vsel %vm1298_vm1, %v4363_v1, %v4364_v6  ;;  %v8128_v18 = vld [vmem:[#allocation8 + $0x2b0] ss:$8 sps:$4 sm:$0xff]   ;;  %v8131_v48 = vld [vmem:[#allocation8 + $0x2c0] ss:$8 sps:$4 sm:$0xff]   ;;  %v8151_v1 = vld [vmem:[#allocation8 + $0x524] ss:$8 sps:$4 sm:$0xff]  }
 0x527   : > { %v4969_v59 = vpack.c.bf16 %v4365_v60, %v9584_v49  ;;  %v8125_v49 = vld [vmem:[#allocation8 + $0x2a0] ss:$8 sps:$4 sm:$0xff]   ;;  %v8152_v6 = vld [vmem:[#allocation8 + $0x530] ss:$8 sps:$4 sm:$0xff]   ;;  %v8163_v60 = vld [vmem:[#allocation8 + $0x564] ss:$8 sps:$4 sm:$0xff]  }
 0x529   : > { %5541 = vmatpush1.bf16.msra.mxu1 %v8104_v25  ;;  %v8142_v25 = vld [vmem:[#allocation8 + $0x2f4] ss:$8 sps:$4 sm:$0xff]  }
 0x52a   : > { %5542 = vmatprep.subr.bf16.mxu1 %v8109_v45  ;;  %v8140_v45 = vld [vmem:[#allocation8 + $0x2f0] ss:$8 sps:$4 sm:$0xff]  }
 0x52c   : > { %5217 = vmatmul.mubr.bf16.gmra.mrb[8].mxu1 %v9565_v57  ;;  %v8116_v57 = vld [vmem:[#allocation8 + $0x270] ss:$8 sps:$4 sm:$0xff]  }
 0x52d   : > { %5226 = vmatprep.mubr.bf16.mxu1 %v4970_v22  ;;  %5543 = vmatpush1.bf16.msra.mxu1 %v8107_v26  ;;  %v8143_v26 = vld [vmem:[#allocation8 + $0x500] ss:$8 sps:$4 sm:$0xff]  }
 0x52e   : > { %5544 = vmatprep.subr.bf16.mxu1 %v8112_v55  ;;  %v8148_v55 = vld [vmem:[#allocation8 + $0x514] ss:$8 sps:$4 sm:$0xff]   ;;  %v8149_v22 = vld [vmem:[#allocation8 + $0x520] ss:$8 sps:$4 sm:$0xff]  }
 0x531   : > { %5545 = vmatpush1.bf16.msra.mxu1 %v8110_v38  ;;  %v8157_v38 = vld [vmem:[#allocation8 + $0x544] ss:$8 sps:$4 sm:$0xff]  }
 0x532   : > { %5546 = vmatprep.subr.bf16.mxu1 %v8115_v0  ;;  %v8158_v0 = vld [vmem:[#allocation8 + $0x550] ss:$8 sps:$4 sm:$0xff]  }
 0x534   : > { %5227 = vmatmul.mubr.bf16.gmra.mrb[12].mxu1 %v4969_v59  ;;  %v8166_v59 = vld [vmem:[#allocation8 + $0x574] ss:$8 sps:$4 sm:$0xff]  }
 0x535   : > { %5547 = vmatpush1.bf16.msra.mxu1 %v8113_v5  ;;  %5566 = vmatprep.mubr.bf16.mxu1 %v10141_v43  ;;  %v8161_v5 = vld [vmem:[#allocation8 + $0x560] ss:$8 sps:$4 sm:$0xff]   ;;  %v8169_v43 = vld [vmem:[#allocation8 + $0x584] ss:$8 sps:$4 sm:$0xff]  }
 0x536   : > { %5548 = vmatprep.subr.bf16.mxu1 %v8118_v58  ;;  %v8164_v58 = vld [vmem:[#allocation8 + $0x570] ss:$8 sps:$4 sm:$0xff]  }
 0x539   : > { %5549 = vmatpush1.bf16.msra.mxu1 %v8116_v57  ;;  %v8167_v57 = vld [vmem:[#allocation8 + $0x580] ss:$8 sps:$4 sm:$0xff]  }
 0x53a   : > { %5550 = vmatprep.subr.bf16.mxu1 %v8121_v37  ;;  %v8172_v37 = vld [vmem:[#allocation8 + $0x594] ss:$8 sps:$4 sm:$0xff]  }
 0x53d   : > { %5551 = vmatpush1.bf16.msra.mxu1 %v8119_v20  ;;  %v8170_v20 = vld [vmem:[#allocation8 + $0x590] ss:$8 sps:$4 sm:$0xff]  }
 0x53e   : > { %5552 = vmatprep.subr.bf16.mxu1 %v8124_v54  ;;  %v8175_v54 = vld [vmem:[#allocation8 + $0x5a4] ss:$8 sps:$4 sm:$0xff]  }
 0x541   : > { %5553 = vmatpush1.bf16.msra.mxu1 %v8122_v40  ;;  %v8173_v40 = vld [vmem:[#allocation8 + $0x5a0] ss:$8 sps:$4 sm:$0xff]  }
 0x542   : > { %5554 = vmatprep.subr.bf16.mxu1 %v8127_v29  ;;  %v8178_v29 = vld [vmem:[#allocation8 + $0x5b4] ss:$8 sps:$4 sm:$0xff]  }
 0x545   : > { %5555 = vmatpush1.bf16.msra.mxu1 %v8125_v49  ;;  %v8176_v49 = vld [vmem:[#allocation8 + $0x5b0] ss:$8 sps:$4 sm:$0xff]  }
 0x546   : > { %5556 = vmatprep.subr.bf16.mxu1 %v8130_v21  ;;  %v8182_v21 = vld [vmem:[#allocation8 + $0x5d0] ss:$8 sps:$4 sm:$0xff]  }
 0x549   : > { %5557 = vmatpush1.bf16.msra.mxu1 %v8128_v18  ;;  %v8187_v18 = vld [vmem:[#allocation8 + $0x5e4] ss:$8 sps:$4 sm:$0xff]  }
 0x54a   : > { %5558 = vmatprep.subr.bf16.mxu1 %v8133_v34  ;;  %v8185_v34 = vld [vmem:[#allocation8 + $0x5e0] ss:$8 sps:$4 sm:$0xff]  }
 0x54d   : > { %5559 = vmatpush1.bf16.msra.mxu1 %v8131_v48  ;;  %v8190_v48 = vld [vmem:[#allocation8 + $0x5f4] ss:$8 sps:$4 sm:$0xff]  }
 0x54e   : > { %5560 = vmatprep.subr.bf16.mxu1 %v8136_v14  ;;  %v8188_v14 = vld [vmem:[#allocation8 + $0x5f0] ss:$8 sps:$4 sm:$0xff]  }
 0x551   : > { %5561 = vmatpush1.bf16.msra.mxu1 %v8134_v11  ;;  %v8193_v11 = vld [vmem:[#allocation8 + $0x804] ss:$8 sps:$4 sm:$0xff]  }
 0x552   : > { %5562 = vmatprep.subr.bf16.mxu1 %v8139_v41  ;;  %v8191_v41 = vld [vmem:[#allocation8 + $0x800] ss:$8 sps:$4 sm:$0xff]  }
 0x555   : > { %5563 = vmatpush1.bf16.msra.mxu1 %v8137_v10  ;;  %v8196_v10 = vld [vmem:[#allocation8 + $0x814] ss:$8 sps:$4 sm:$0xff]  }
 0x556   : > { %5564 = vmatprep.subr.bf16.mxu1 %v8142_v25  ;;  %v8194_v25 = vld [vmem:[#allocation8 + $0x810] ss:$8 sps:$4 sm:$0xff]  }
 0x559   : > { %5565 = vmatpush1.bf16.msra.mxu1 %v8140_v45  ;;  %v8199_v45 = vld [vmem:[#allocation8 + $0x824] ss:$8 sps:$4 sm:$0xff]  }
 0x55a   : > { %5824 = vmatprep.subr.bf16.mxu1 %v8145_v3  ;;  %v8197_v3 = vld [vmem:[#allocation8 + $0x820] ss:$8 sps:$4 sm:$0xff]  }
 0x55c   : > { %5567 = vmatmul.mubr.bf16.vlgmr.msra.gmra.mrb[0].mxu1 %v5333_v2  ;;  %v8160_v2 = vld [vmem:[#allocation8 + $0x554] ss:$8 sps:$4 sm:$0xff]  }
 0x55d   : > { %5576 = vmatprep.mubr.bf16.mxu1 %v9622_v8  ;;  %5825 = vmatpush1.bf16.msra.mxu1 %v8143_v26  ;;  %v8202_v26 = vld [vmem:[#allocation8 + $0x834] ss:$8 sps:$4 sm:$0xff]  }
 0x55e   : > { %5826 = vmatprep.subr.bf16.mxu1 %v8148_v55  ;;  %v8221_v55 = vld [vmem:[#allocation8 + $0x8a0] ss:$8 sps:$4 sm:$0xff]  }
 0x561   : > { %5827 = vmatpush1.bf16.msra.mxu1 %v8146_v56  ;;  %v8226_v56 = vld [vmem:[#allocation8 + $0x8b4] ss:$8 sps:$4 sm:$0xff]  }
 0x562   : > { %5828 = vmatprep.subr.bf16.mxu1 %v8151_v1  ;;  %v8229_v1 = vld [vmem:[#allocation8 + $0x8c4] ss:$8 sps:$4 sm:$0xff]  }
 0x564   : > { %5577 = vmatmul.mubr.bf16.gmra.mrb[4].mxu1 %v9638_v13 }
 0x565   : > { %5586 = vmatprep.mubr.bf16.mxu1 %v9653_v36  ;;  %5829 = vmatpush1.bf16.msra.mxu1 %v8149_v22  ;;  %v8232_v22 = vld [vmem:[#allocation8 + $0x8d4] ss:$8 sps:$4 sm:$0xff]  }
 0x566   : > { %5830 = vmatprep.subr.bf16.mxu1 %v8154_v62  ;;  %v8230_v62 = vld [vmem:[#allocation8 + $0x8d0] ss:$8 sps:$4 sm:$0xff]  }
 0x569   : > { %5831 = vmatpush1.bf16.msra.mxu1 %v8152_v6  ;;  %v8235_v6 = vld [vmem:[#allocation8 + $0x8e4] ss:$8 sps:$4 sm:$0xff]  }
 0x56a   : > { %5832 = vmatprep.subr.bf16.mxu1 %v8157_v38  ;;  %v8233_v38 = vld [vmem:[#allocation8 + $0x8e0] ss:$8 sps:$4 sm:$0xff]  }
 0x56c   : > { %5587 = vmatmul.mubr.bf16.gmra.mrb[8].mxu1 %v9669_v51 }
 0x56d   : > { %5596 = vmatprep.mubr.bf16.mxu1 %v9686_v63  ;;  %5833 = vmatpush1.bf16.msra.mxu1 %v8155_v15  ;;  %v8238_v15 = vld [vmem:[#allocation8 + $0x8f4] ss:$8 sps:$4 sm:$0xff]  }
 0x56e   : > { %5834 = vmatprep.subr.bf16.mxu1 %v8160_v2  ;;  %v8236_v2 = vld [vmem:[#allocation8 + $0x8f0] ss:$8 sps:$4 sm:$0xff]  }
 0x571   : > { %5835 = vmatpush1.bf16.msra.mxu1 %v8158_v0  ;;  %v10144_v0 = vpack.c.bf16 %v9392_v61, %v9714_v31 }
 0x572   : > { %5836 = vmatprep.subr.bf16.mxu1 %v8163_v60  ;;  %v10145_v60 = vpack.c.bf16 %v9711_v30, %v9719_v16 }
 0x574   : > { %5597 = vmatmul.mubr.bf16.gmra.mrb[12].mxu1 %v9703_v33 }
 0x575   : > { %5837 = vmatpush1.bf16.msra.mxu1 %v8161_v5  ;;  %5856 = vmatprep.mubr.bf16.mxu1 %v5624_v7  ;;  %v8184_v7 = vld [vmem:[#allocation8 + $0x5d4] ss:$8 sps:$4 sm:$0xff]  }
 0x576   : > { %5838 = vmatprep.subr.bf16.mxu1 %v8166_v59 }
 0x579   : > { %5839 = vmatpush1.bf16.msra.mxu1 %v8164_v58 }
 0x57a   : > { %5840 = vmatprep.subr.bf16.mxu1 %v8169_v43 }
 0x57d   : > { %5841 = vmatpush1.bf16.msra.mxu1 %v8167_v57 }
 0x57e   : > { %5842 = vmatprep.subr.bf16.mxu1 %v8172_v37 }
 0x581   : > { %5843 = vmatpush1.bf16.msra.mxu1 %v8170_v20 }
 0x582   : > { %5844 = vmatprep.subr.bf16.mxu1 %v8175_v54 }
 0x585   : > { %5845 = vmatpush1.bf16.msra.mxu1 %v8173_v40 }
 0x586   : > { %5846 = vmatprep.subr.bf16.mxu1 %v8178_v29 }
 0x589   : > { %5847 = vmatpush1.bf16.msra.mxu1 %v8176_v49 }
 0x58a   : > { %5848 = vmatprep.subr.bf16.mxu1 %v8181_v23 }
 0x58d   : > { %5849 = vmatpush1.bf16.msra.mxu1 %v8179_v28 }
 0x58e   : > { %5850 = vmatprep.subr.bf16.mxu1 %v8184_v7 }
 0x591   : > { %5851 = vmatpush1.bf16.msra.mxu1 %v8182_v21 }
 0x592   : > { %5852 = vmatprep.subr.bf16.mxu1 %v8187_v18 }
 0x595   : > { %5853 = vmatpush1.bf16.msra.mxu1 %v8185_v34 }
 0x596   : > { %5854 = vmatprep.subr.bf16.mxu1 %v8190_v48 }
 0x599   : > { %5855 = vmatpush1.bf16.msra.mxu1 %v8188_v14 }
 0x59a   : > { %6108 = vmatprep.subr.bf16.mxu1 %v8193_v11 }
 0x59c   : > { %5857 = vmatmul.mubr.bf16.vlgmr.msra.gmra.mrb[0].mxu1 %v5623_v42  ;;  %v8208_v42 = vld [vmem:[#allocation8 + $0x854] ss:$8 sps:$4 sm:$0xff]  }
 0x59d   : > { %5866 = vmatprep.mubr.bf16.mxu1 %v5626_v50  ;;  %6109 = vmatpush1.bf16.msra.mxu1 %v8191_v41  ;;  %v10143_v50 = vpack.c.bf16 %v9719_v16, %v9695_v19  ;;  %v8224_v19 = vld [vmem:[#allocation8 + $0x8b0] ss:$8 sps:$4 sm:$0xff]  }
 0x59e   : > { %6110 = vmatprep.subr.bf16.mxu1 %v8196_v10 }
 0x5a1   : > { %6111 = vmatpush1.bf16.msra.mxu1 %v8194_v25 }
 0x5a2   : > { %6112 = vmatprep.subr.bf16.mxu1 %v8199_v45 }
 0x5a4   : > { %5867 = vmatmul.mubr.bf16.gmra.mrb[4].mxu1 %v5625_v53  ;;  %v8217_v53 = vld [vmem:[#allocation8 + $0x884] ss:$8 sps:$4 sm:$0xff]  }
 0x5a5   : > { %5876 = vmatprep.mubr.bf16.mxu1 %v5628_v4  ;;  %6113 = vmatpush1.bf16.msra.mxu1 %v8197_v3  ;;  %v8218_v4 = vld [vmem:[#allocation8 + $0x890] ss:$8 sps:$4 sm:$0xff]  }
 0x5a6   : > { %6114 = vmatprep.subr.bf16.mxu1 %v8202_v26 }
 0x5a9   : > { %6115 = vmatpush1.bf16.msra.mxu1 %v8200_v35 }
 0x5aa   : > { %6116 = vmatprep.subr.bf16.mxu1 %v8205_v12 }
 0x5ac   : > { %5877 = vmatmul.mubr.bf16.gmra.mrb[8].mxu1 %v5627_v24  ;;  %v8223_v24 = vld [vmem:[#allocation8 + $0x8a4] ss:$8 sps:$4 sm:$0xff]  }
 0x5ad   : > { %5886 = vmatprep.mubr.bf16.mxu1 %v10142_v32  ;;  %6117 = vmatpush1.bf16.msra.mxu1 %v8203_v46 }
 0x5ae   : > { %6118 = vmatprep.subr.bf16.mxu1 %v8208_v42 }
 0x5b1   : > { %6119 = vmatpush1.bf16.msra.mxu1 %v8206_v44 }
 0x5b2   : > { %6120 = vmatprep.subr.bf16.mxu1 %v8211_v27 }
 0x5b4   : > { %5887 = vmatmul.mubr.bf16.gmra.mrb[12].mxu1 %v10143_v50 }
 0x5b5   : > { %6121 = vmatpush1.bf16.msra.mxu1 %v8209_v52  ;;  %6140 = vmatprep.mubr.bf16.mxu1 %v9622_v8  ;;  %v8227_v8 = vld [vmem:[#allocation8 + $0x8c0] ss:$8 sps:$4 sm:$0xff]  }
 0x5b6   : > { %6122 = vmatprep.subr.bf16.mxu1 %v8214_v47 }
 0x5b9   : > { %6123 = vmatpush1.bf16.msra.mxu1 %v8212_v39 }
 0x5ba   : > { %6124 = vmatprep.subr.bf16.mxu1 %v8217_v53 }
 0x5bd   : > { %6125 = vmatpush1.bf16.msra.mxu1 %v8215_v9 }
 0x5be   : > { %6126 = vmatprep.subr.bf16.mxu1 %v8220_v17 }
 0x5c1   : > { %6127 = vmatpush1.bf16.msra.mxu1 %v8218_v4 }
 0x5c2   : > { %6128 = vmatprep.subr.bf16.mxu1 %v8223_v24 }
 0x5c5   : > { %6129 = vmatpush1.bf16.msra.mxu1 %v8221_v55 }
 0x5c6   : > { %6130 = vmatprep.subr.bf16.mxu1 %v8226_v56 }
 0x5c9   : > { %6131 = vmatpush1.bf16.msra.mxu1 %v8224_v19 }
 0x5ca   : > { %6132 = vmatprep.subr.bf16.mxu1 %v8229_v1 }
 0x5cd   : > { %6133 = vmatpush1.bf16.msra.mxu1 %v8227_v8 }
 0x5ce   : > { %6134 = vmatprep.subr.bf16.mxu1 %v8232_v22 }
 0x5d1   : > { %6135 = vmatpush1.bf16.msra.mxu1 %v8230_v62 }
 0x5d2   : > { %6136 = vmatprep.subr.bf16.mxu1 %v8235_v6 }
 0x5d5   : > { %6137 = vmatpush1.bf16.msra.mxu1 %v8233_v38 }
 0x5d6   : > { %6138 = vmatprep.subr.bf16.mxu1 %v8238_v15 }
 0x5d9   : > { %6139 = vmatpush1.bf16.msra.mxu1 %v8236_v2 }
 0x5dc   : > { %6141 = vmatmul.mubr.bf16.vlgmr.msra.gmra.mrb[0].mxu1 %v9638_v13 }
 0x5dd   : > { %6150 = vmatprep.mubr.bf16.mxu1 %v9653_v36 }
 0x5e4   : > { %6151 = vmatmul.mubr.bf16.gmra.mrb[4].mxu1 %v9669_v51 }
 0x5e5   : > { %6160 = vmatprep.mubr.bf16.mxu1 %v9686_v63 }
 0x5ec   : > { %6161 = vmatmul.mubr.bf16.gmra.mrb[8].mxu1 %v9703_v33 }
 0x5ed   : > { %6170 = vmatprep.mubr.bf16.mxu1 %v10144_v0 }
 0x5f4   : > { %6171 = vmatmul.mubr.bf16.gmra.mrb[12].mxu1 %v10145_v60 }
 0x6af   : > { %v9841_v5 = vpop.f32.mrb[0].mxu1 }
 0x6b0   : > { %v9843_v59 = vpop.f32.mrb[1].mxu1  ;;  %v6223_v36 = vmul.f32 %v9841_v5, %v9841_v5 }
 0x6b1   : > { %v9845_v13 = vpop.f32.mrb[2].mxu1  ;;  %v6224_v33 = vmul.f32 %v9843_v59, %v9843_v59 }
 0x6b2   : > { %v6197_v51 = vadd.f32 %v9845_v13, %v9841_v5  ;;  %v6225_v61 = vmul.f32 %v9845_v13, %v9845_v13  ;;  %v9853_v63 = vpop.f32.mrb[3].mxu1 }
 0x6b3   : > { %v6210_v30 = vadd.f32 %v9853_v63, %v9843_v59  ;;  %v6226_v31 = vmul.f32 %v9853_v63, %v9853_v63 }
 0x6b4   : > { %v6239_v16 = vadd.f32 %v6225_v61, %v6223_v36 }
 0x6b5   : > { %v6252_v58 = vadd.f32 %v6226_v31, %v6224_v33 }
 0x6b7   : > { %v9861_v43 = vpop.f32.mrb[4].mxu1 }
 0x6b8   : > { %v6198_v57 = vadd.f32 %v6197_v51, %v9861_v43  ;;  %v6227_v37 = vmul.f32 %v9861_v43, %v9861_v43  ;;  %v9866_v20 = vpop.f32.mrb[5].mxu1 }
 0x6b9   : > { %v6211_v54 = vadd.f32 %v6210_v30, %v9866_v20  ;;  %v6228_v40 = vmul.f32 %v9866_v20, %v9866_v20  ;;  %v9871_v29 = vpop.f32.mrb[6].mxu1 }
 0x6ba   : > { %v6240_v49 = vadd.f32 %v6239_v16, %v6227_v37  ;;  %v6199_v23 = vadd.f32 %v6198_v57, %v9871_v29  ;;  %v6229_v28 = vmul.f32 %v9871_v29, %v9871_v29  ;;  %v9876_v7 = vpop.f32.mrb[7].mxu1 }
 0x6bb   : > { %v6253_v21 = vadd.f32 %v6252_v58, %v6228_v40  ;;  %v6212_v18 = vadd.f32 %v6211_v54, %v9876_v7  ;;  %v6230_v34 = vmul.f32 %v9876_v7, %v9876_v7 }
 0x6bc   : > { %v6241_v48 = vadd.f32 %v6240_v49, %v6229_v28 }
 0x6bd   : > { %v6254_v14 = vadd.f32 %v6253_v21, %v6230_v34 }
 0x6bf   : > { %v9881_v11 = vpop.f32.mrb[8].mxu1 }
 0x6c0   : > { %v6200_v41 = vadd.f32 %v6199_v23, %v9881_v11  ;;  %v6231_v10 = vmul.f32 %v9881_v11, %v9881_v11  ;;  %v9886_v25 = vpop.f32.mrb[9].mxu1 }
 0x6c1   : > { %v6213_v45 = vadd.f32 %v6212_v18, %v9886_v25  ;;  %v6232_v3 = vmul.f32 %v9886_v25, %v9886_v25  ;;  %v9891_v26 = vpop.f32.mrb[10].mxu1 }
 0x6c2   : > { %v6242_v35 = vadd.f32 %v6241_v48, %v6231_v10  ;;  %v6201_v12 = vadd.f32 %v6200_v41, %v9891_v26  ;;  %v6233_v46 = vmul.f32 %v9891_v26, %v9891_v26  ;;  %v9896_v42 = vpop.f32.mrb[11].mxu1 }
 0x6c3   : > { %v6255_v32 = vadd.f32 %v6254_v14, %v6232_v3  ;;  %v6214_v44 = vadd.f32 %v6213_v45, %v9896_v42  ;;  %v6234_v27 = vmul.f32 %v9896_v42, %v9896_v42 }
 0x6c4   : > { %v6243_v52 = vadd.f32 %v6242_v35, %v6233_v46 }
 0x6c5   : > { %v6256_v47 = vadd.f32 %v6255_v32, %v6234_v27 }
 0x6c7   : > { %v9901_v50 = vpop.f32.mrb[12].mxu1 }
 0x6c8   : > { %v6202_v39 = vadd.f32 %v6201_v12, %v9901_v50  ;;  %v6235_v53 = vmul.f32 %v9901_v50, %v9901_v50  ;;  %v9906_v9 = vpop.f32.mrb[13].mxu1 }
 0x6c9   : > { %v6215_v17 = vadd.f32 %v6214_v44, %v9906_v9  ;;  %v6236_v4 = vmul.f32 %v9906_v9, %v9906_v9  ;;  %v9911_v24 = vpop.f32.mrb[14].mxu1 }
 0x6ca   : > { %v6244_v55 = vadd.f32 %v6243_v52, %v6235_v53  ;;  %v6203_v56 = vadd.f32 %v6202_v39, %v9911_v24  ;;  %v6237_v19 = vmul.f32 %v9911_v24, %v9911_v24  ;;  %v9916_v1 = vpop.f32.mrb[15].mxu1 }
 0x6cb   : > { %v6257_v8 = vadd.f32 %v6256_v47, %v6236_v4  ;;  %v6216_v22 = vadd.f32 %v6215_v17, %v9916_v1  ;;  %v6238_v62 = vmul.f32 %v9916_v1, %v9916_v1 }
 0x6cc   : > { %v6204_v6 = vrot.slane %v6203_v56, 4  ;;  %v6245_v38 = vadd.f32 %v6244_v55, %v6237_v19 }
 0x6cd   : > { %v6217_v15 = vrot.slane %v6216_v22, 4  ;;  %v6258_v2 = vadd.f32 %v6257_v8, %v6238_v62 }
 0x6ce   : > { %v6205_v0 = vadd.f32 %v6204_v6, %v6203_v56  ;;  %v6246_v60 = vrot.slane %v6245_v38, 4  ;;  %v8273_v6 = vld [vmem:[%s8656_s30] sm:$0xff] }
 0x6cf   : > { %v6218_v36 = vadd.f32 %v6217_v15, %v6216_v22  ;;  %v6259_v51 = vrot.slane %v6258_v2, 4  ;;  %v8274_v15 = vld [vmem:[%s8656_s30 + $0x10] sm:$0xff] }
 0x6d0   : > { %v6206_v61 = vrot.slane %v6205_v0, 2  ;;  %v6247_v33 = vadd.f32 %v6246_v60, %v6245_v38 }
 0x6d1   : > { %v6219_v30 = vrot.slane %v6218_v36, 2  ;;  %v6260_v31 = vadd.f32 %v6259_v51, %v6258_v2 }
 0x6d2   : > { %v6207_v16 = vadd.f32 %v6206_v61, %v6205_v0  ;;  %v6248_v58 = vrot.slane %v6247_v33, 2  ;;  %v8275_v0 = vld [vmem:[%s8656_s30 + $0x20] sm:$0xff] }
 0x6d3   : > { %v6220_v57 = vadd.f32 %v6219_v30, %v6218_v36  ;;  %v6261_v37 = vrot.slane %v6260_v31, 2  ;;  %v8276_v36 = vld [vmem:[%s8656_s30 + $0x30] sm:$0xff]  ;;  %v8277_v61 = vld [vmem:[%s8656_s30 + $0x40] sm:$0xff] }
 0x6d4   : > { %v6208_v54 = vrot.slane %v6207_v16, 1  ;;  %v6249_v40 = vadd.f32 %v6248_v58, %v6247_v33  ;;  %v8278_v30 = vld [vmem:[%s8656_s30 + $0x50] sm:$0xff] }
 0x6d5   : > { %v6221_v49 = vrot.slane %v6220_v57, 1  ;;  %v6262_v23 = vadd.f32 %v6261_v37, %v6260_v31 }
 0x6d6   : > { %v6209_v28 = vadd.f32 %v6208_v54, %v6207_v16  ;;  %v6250_v21 = vrot.slane %v6249_v40, 1  ;;  %v8279_v16 = vld [vmem:[%s8656_s30 + $0x60] sm:$0xff] }
 0x6d7   : > { %v6222_v18 = vadd.f32 %v6221_v49, %v6220_v57  ;;  %v6263_v34 = vrot.slane %v6262_v23, 1  ;;  %v8280_v57 = vld [vmem:[%s8656_s30 + $0x70] sm:$0xff] }
 0x6d8   : > { %v6251_v48 = vadd.f32 %v6250_v21, %v6249_v40  ;;  %v6265_v14 = vmul.f32 0.015625, %v6209_v28 }
 0x6d9   : > { %v6264_v41 = vadd.f32 %v6263_v34, %v6262_v23  ;;  %v9921_v10 = vmul.f32 0.015625, %v6222_v18 }
 0x6da   : > { %v6267_v45 = vmul.f32 0.015625, %v6251_v48  ;;  %v6269_v3 = vmul.f32 %v6265_v14, %v6265_v14  ;;  %v6275_v35 = vsub.f32 %v9841_v5, %v6265_v14  ;;  %v6277_v12 = vsub.f32 %v9845_v13, %v6265_v14  ;;  %v8281_v48 = vld [vmem:[%s8656_s30 + $0x8] sm:$0xff] }
 0x6db   : > { %v6279_v46 = vsub.f32 %v9861_v43, %v6265_v14  ;;  %v6281_v32 = vsub.f32 %v9871_v29, %v6265_v14  ;;  %v6283_v44 = vsub.f32 %v9881_v11, %v6265_v14  ;;  %v6285_v27 = vsub.f32 %v9891_v26, %v6265_v14 }
 0x6dc   : > { %v6271_v52 = vsub.f32 %v6267_v45, %v6269_v3  ;;  %v6287_v47 = vsub.f32 %v9901_v50, %v6265_v14  ;;  %v6289_v39 = vsub.f32 %v9911_v24, %v6265_v14  ;;  %v6268_v53 = vmul.f32 0.015625, %v6264_v41  ;;  %v8282_v41 = vld [vmem:[%s8656_s30 + $0x18] sm:$0xff]  ;;  %v8283_v45 = vld [vmem:[%s8656_s30 + $0x28] sm:$0xff] }
 0x6dd   : > { %v6270_v17 = vmul.f32 %v9921_v10, %v9921_v10  ;;  %v6276_v5 = vsub.f32 %v9843_v59, %v9921_v10  ;;  %v6278_v13 = vsub.f32 %v9853_v63, %v9921_v10  ;;  %v6280_v43 = vsub.f32 %v9866_v20, %v9921_v10 }
 0x6de   : > { %v6273_v29 = vmax.f32 %v6271_v52, 0.0  ;;  %v6282_v11 = vsub.f32 %v9876_v7, %v9921_v10  ;;  %v6284_v26 = vsub.f32 %v9886_v25, %v9921_v10  ;;  %v6286_v50 = vsub.f32 %v9896_v42, %v9921_v10  ;;  %v8287_v52 = vld [vmem:[%s8656_s30 + $0x68] sm:$0xff] }
 0x6df   : > { %v6272_v4 = vsub.f32 %v6268_v53, %v6270_v17  ;;  %v6288_v59 = vsub.f32 %v9906_v9, %v9921_v10  ;;  %v6290_v63 = vsub.f32 %v9916_v1, %v9921_v10 }
 0x6e0   : > { %v6291_v24 = vadd.f32 1e-05, %v6273_v29 }
 0x6e1   : > { %v6274_v20 = vmax.f32 %v6272_v4, 0.0 }
 0x6e2   : > { %8243 = vrsqrt.f32 %v6291_v24 }
 0x6e3   : > { %v6292_v55 = vadd.f32 1e-05, %v6274_v20 }
 0x6e5   : > { %8245 = vrsqrt.f32 %v6292_v55 }
 0x6ec   : > { %v8244_v7 = vpop.eup %8243 }
 0x6ed   : > { %v6295_v25 = vmul.f32 %v8244_v7, %v6275_v35  ;;  %v6297_v56 = vmul.f32 %v8244_v7, %v6277_v12  ;;  %v6299_v42 = vmul.f32 %v8244_v7, %v6279_v46  ;;  %v6301_v19 = vmul.f32 %v8244_v7, %v6281_v32  ;;  %v8284_v35 = vld [vmem:[%s8656_s30 + $0x38] sm:$0xff]  ;;  %v8285_v46 = vld [vmem:[%s8656_s30 + $0x48] sm:$0xff] }
 0x6ee   : > { %v6303_v9 = vmul.f32 %v8244_v7, %v6283_v44  ;;  %v6305_v8 = vmul.f32 %v8244_v7, %v6285_v27  ;;  %v6307_v1 = vmul.f32 %v8244_v7, %v6287_v47  ;;  %v6309_v22 = vmul.f32 %v8244_v7, %v6289_v39  ;;  %v8286_v44 = vld [vmem:[%s8656_s30 + $0x58] sm:$0xff] }
 0x6ef   : > { %v8246_v62 = vpop.eup %8245  ;;  %v6311_v38 = vadd.f32 %v8273_v6, %v6295_v25  ;;  %v6313_v2 = vadd.f32 %v8274_v15, %v6297_v56  ;;  %v6315_v60 = vadd.f32 %v8275_v0, %v6299_v42  ;;  %v6317_v51 = vadd.f32 %v8276_v36, %v6301_v19  ;;  %v8288_v39 = vld [vmem:[%s8656_s30 + $0x78] sm:$0xff] }
 0x6f0   : > { %v6319_v33 = vadd.f32 %v8277_v61, %v6303_v9  ;;  %v6321_v31 = vadd.f32 %v8278_v30, %v6305_v8  ;;  %v6323_v58 = vadd.f32 %v8279_v16, %v6307_v1  ;;  %v6325_v37 = vadd.f32 %v8280_v57, %v6309_v22 }
 0x6f1   : > { %6327 = vst [vmem:[%s9960_s20] sm:$0xff] %v6311_v38  ;;  %6329 = vst [vmem:[%s9960_s20 + $0x10] sm:$0xff] %v6313_v2  ;;  %v6296_v54 = vmul.f32 %v8246_v62, %v6276_v5  ;;  %v6298_v40 = vmul.f32 %v8246_v62, %v6278_v13  ;;  %v6300_v49 = vmul.f32 %v8246_v62, %v6280_v43 }
 0x6f2   : > { %6331 = vst [vmem:[%s9960_s20 + $0x20] sm:$0xff] %v6315_v60  ;;  %6333 = vst [vmem:[%s9960_s20 + $0x30] sm:$0xff] %v6317_v51  ;;  %v6302_v23 = vmul.f32 %v8246_v62, %v6282_v11  ;;  %v6304_v28 = vmul.f32 %v8246_v62, %v6284_v26  ;;  %v6306_v21 = vmul.f32 %v8246_v62, %v6286_v50 }
 0x6f3   : > { %6335 = vst [vmem:[%s9960_s20 + $0x40] sm:$0xff] %v6319_v33  ;;  %6337 = vst [vmem:[%s9960_s20 + $0x50] sm:$0xff] %v6321_v31  ;;  %v6308_v18 = vmul.f32 %v8246_v62, %v6288_v59  ;;  %v6310_v34 = vmul.f32 %v8246_v62, %v6290_v63  ;;  %v6312_v14 = vadd.f32 %v8281_v48, %v6296_v54 }
 0x6f4   : > { %6339 = vst [vmem:[%s9960_s20 + $0x60] sm:$0xff] %v6323_v58  ;;  %6341 = vst [vmem:[%s9960_s20 + $0x70] sm:$0xff] %v6325_v37  ;;  %v6314_v10 = vadd.f32 %v8282_v41, %v6298_v40  ;;  %v6316_v3 = vadd.f32 %v8283_v45, %v6300_v49  ;;  %v6318_v12 = vadd.f32 %v8284_v35, %v6302_v23 }
 0x6f5   : > { %v6320_v32 = vadd.f32 %v8285_v46, %v6304_v28  ;;  %v6322_v27 = vadd.f32 %v8286_v44, %v6306_v21  ;;  %v6324_v47 = vadd.f32 %v8287_v52, %v6308_v18  ;;  %v6326_v53 = vadd.f32 %v8288_v39, %v6310_v34  ;;  %6328 = vst [vmem:[%s9960_s20 + $0x8] sm:$0xff] %v6312_v14 }
 0x6f6   : > { %6330 = vst [vmem:[%s9960_s20 + $0x18] sm:$0xff] %v6314_v10  ;;  %6332 = vst [vmem:[%s9960_s20 + $0x28] sm:$0xff] %v6316_v3 }
 0x6f7   : > { %6334 = vst [vmem:[%s9960_s20 + $0x38] sm:$0xff] %v6318_v12  ;;  %6336 = vst [vmem:[%s9960_s20 + $0x48] sm:$0xff] %v6320_v32 }
 0x6f8   : > { %6338 = vst [vmem:[%s9960_s20 + $0x58] sm:$0xff] %v6322_v27  ;;  %6340 = vst [vmem:[%s9960_s20 + $0x68] sm:$0xff] %v6324_v47 }
 0x6f9   : > { %6342 = vst [vmem:[%s9960_s20 + $0x78] sm:$0xff] %v6326_v53 }
 0x6fa   : > { %8388 = shalt.err (!%p8385_p2)
}
 0x6fb   : > { %s8389_s25 = scalar_lea.hbm %s9978_s26, 2048  ;;  %s8393_s21 = scalar_lea.hbm %s10039_s3, 4096 }
 0x6fc   : > { %p8390_p13 = scmp.ne.s32.totalorder %s9978_s26, %s8389_s25  ;;  %p8394_p4 = scmp.lt.u32.totalorder %s9978_s26, %s10039_s3 }
 0x6fd   : > { %p8395_p5 = scmp.lt.u32.totalorder %s8393_s21, %s8389_s25  ;;  %p8397_p11 = scmp.lt.u32.totalorder %s8389_s25, %s9978_s26 }
 0x6fe   : > { %p8391_p6 = pnand %p8390_p13, %p10146_p0 }
 0x6ff   : > { %p8396_p8 = por %p8395_p5, %p8394_p4 }
 0x700   : > { %p8392_p10 = pneg %p8391_p6 }
 0x701   : > { %p8398_p1 = por %p8397_p11, %p8396_p8 }
 0x703   : > { %p8399_p3 = pnand %p8398_p1, %p8392_p10 }
 0x705   : > { %8402 = shalt.err (!%p8399_p3)
}
 0x706   : > { %s8456_s30 = smov 256   ;;  %s8457_s18 = smov 16  }
 0x707   : > { %7311 = dma.vmem_to_hbm [thread:$0]  (%p10146_p0), %s9980_s17, 2048, %s9978_s26, %s6344_s27, %s8456_s30, %s8456_s30, %s8457_s18  }
 0x708 PF: > { %s6372_s20 = sand.u32 1, %s8433_s12   ;;  %p10147_p7 = scmp.ne.s32.totalorder %s10069_s19, 0 }
 0x709   : > { %p10148_p9 = scmp.ge.s32.totalorder %s8445_s15, 2  ;;  %s6373_s16 = scalar_lea.sflag [#allocation5], %s6372_s20 }
 0x70b   : > { %p7325_p12 = pnand %p10148_p9, %p10147_p7 }
 0x70d   : > { %8428 = dma.done.wait (!%p7325_p12), %s6373_s16, 2048  }
 0x70e   : > { %8430 = vsyncadd (!%p7325_p12), %s6373_s16, 4294965248  ;;  %p17_p2 = scmp.ge.s32.totalorder %s8588_s4, 4   ;;  %s10149_s12 = smov %s8437_s13 }
 0x70f   : > { %s10150_s13 = smov %s8441_s14  ;;  %s10151_s14 = smov %s8604_s9 }
 0x710   : > { %s10152_s15 = smov %s8588_s4  ;;  %19 = sbr.rel (!%p17_p2) target bundleno = 6 (0x6), region = 122 }
 0x717   :  { %6378 = vsyncpa [#allocation4], 1 }
 0x718   :  { %6380 = vsyncpa [#allocation4 + $0x1], 1 }
 0x719   :  { %6381 = vsyncpa [#allocation7], 1 }
 0x71a   :  { %6382 = vsyncpa [#allocation5], 1 }
 0x71b   :  { %6384 = vsyncpa [#allocation5 + $0x1], 1 }

</bundles_post_ra>
